<compile_context>
chip_gen: v6e
topology: v6e:2x2x1
jax: 0.10.0
libtpu: 0.0.40
codegen_flags: <defaults>
</compile_context>

<pallas_src>
import functools

import jax
import jax.numpy as jnp
from jax.experimental import pallas as pl
from jax.experimental.pallas import tpu as pltpu

LANE = 128      # lane width of a vreg (last dim)
SUBLANE = 8     # sublane count of an f32 vreg (second-to-last dim)


def _round_up(x: int, m: int) -> int:
    return (x + m - 1) // m * m


def _pad2d(a, rows: int, cols: int):
    r, c = a.shape
    return jnp.pad(a, ((0, rows - r), (0, cols - c)))


# -----------------------------------------------------------------------------
# Fused MLP kernel: the whole forward pass in one kernel body (all refs VMEM).
#   x_ref:        (N, in_features)            -- unpadded feature dim
#   w_first_ref:  (in_features, HP)           -- first Linear, out dim padded
#   w_hidden_ref: (max(1, 2*depth), HP, HP)   -- stacked hidden Linears
#   w_last_ref:   (HP, OP)                    -- final Linear
#   b_ref:        (num_layers, BP)            -- stacked biases, lane padded
#   o_ref:        (N, OP)
# -----------------------------------------------------------------------------
def _fused_mlp_kernel(x_ref, w_first_ref, w_hidden_ref, w_last_ref, b_ref, o_ref,
                      *, num_hidden, hp, op):
    prec = jax.lax.Precision.HIGHEST
    b_all = b_ref[...]                                  # (num_layers, BP), few KB

    h = x_ref[...].astype(jnp.float32)                  # (N, in_features)

    # First Linear + ReLU.  K = in_features (ragged) is masked internally.
    h = jnp.dot(h, w_first_ref[...], preferred_element_type=jnp.float32,
                precision=prec)
    h = jnp.maximum(h + b_all[0:1, :hp], 0.0)

    # hidden_depth x DoubleLinearBlock == num_hidden x (Linear -> ReLU).
    # Dropout(p=0.0) is the identity and is not emitted.
    for i in range(num_hidden):                         # static unrolled loop
        h = jnp.dot(h, w_hidden_ref[i], preferred_element_type=jnp.float32,
                    precision=prec)
        h = jnp.maximum(h + b_all[i + 1:i + 2, :hp], 0.0)

    # Final Linear (no activation).
    h = jnp.dot(h, w_last_ref[...], preferred_element_type=jnp.float32,
                precision=prec)
    h = h + b_all[num_hidden + 1:num_hidden + 2, :op]

    o_ref[...] = h.astype(o_ref.dtype)                  # unmasked lane-dense vst


# -----------------------------------------------------------------------------
# Wrapper: jitted end-to-end forward on pre-packed (pre-padded) parameters.
# -----------------------------------------------------------------------------
@functools.partial(jax.jit, static_argnames=("config",))
def fused_mlp_forward(x, w_first, w_hidden, w_last, biases, *, config):
    in_features, hidden_features, hidden_depth, output_size = config
    num_hidden = 2 * hidden_depth
    hp = w_first.shape[1]       # padded hidden width (128-multiple)
    op = w_last.shape[1]        # padded output width (128-multiple)

    n = x.shape[0]
    n_pad = _round_up(n, SUBLANE)
    if n_pad != n:              # trace-time no-op when N is a multiple of 8
        x = jnp.pad(x, ((0, n_pad - n), (0, 0)))

    # True (unpadded) cost so XLA schedules the custom call tightly.
    true_w = (in_features * hidden_features
              + num_hidden * hidden_features * hidden_features
              + hidden_features * output_size)
    true_b = hidden_features * (num_hidden + 1) + output_size
    cost = pl.CostEstimate(
        flops=2 * n * true_w,
        transcendentals=0,
        bytes_accessed=4 * (n * in_features + true_w + true_b + n * output_size),
    )

    kernel = functools.partial(_fused_mlp_kernel,
                               num_hidden=num_hidden, hp=hp, op=op)
    vmem = pl.BlockSpec(memory_space=pltpu.MemorySpace.VMEM)

    out_pad = pl.pallas_call(
        kernel,
        out_shape=jax.ShapeDtypeStruct((n_pad, op), x.dtype),
        in_specs=[vmem] * 5,
        out_specs=vmem,
        cost_estimate=cost,
    )(x, w_first, w_hidden, w_last, biases)

    # Slice lane / batch padding back off (fused into the jit around the call).
    return out_pad[:n, :output_size]


# -----------------------------------------------------------------------------
# Parameter init mirroring the PyTorch module, plus one-time padding/packing.
# -----------------------------------------------------------------------------
def kaiming_normal(key, fan_in, fan_out, dtype=jnp.float32):
    # Matches nn.init.kaiming_normal_ (mode='fan_in', gain=sqrt(2)); PyTorch
    # weight shape is (out, in) -> we store the transpose (in, out).
    std = (2.0 / fan_in) ** 0.5
    w_pt = jax.random.normal(key, (fan_out, fan_in), dtype) * std
    return w_pt.T  # (in, out)


def bias_init(key, fan_in, fan_out, dtype=jnp.float32):
    # Matches nn.Linear default bias init: U(-1/sqrt(fan_in), 1/sqrt(fan_in)).
    bound = 1.0 / (fan_in ** 0.5)
    return jax.random.uniform(key, (fan_out,), dtype, minval=-bound, maxval=bound)


def init_model_params(key, in_features, hidden_features, hidden_depth, output_size):
    """Returns a list of (W, b, apply_relu) mirroring Model.__init__ ordering."""
    dims = [(in_features, hidden_features, True)]            # first Linear + ReLU
    for _ in range(hidden_depth):                            # DoubleLinearBlocks
        dims.append((hidden_features, hidden_features, True))
        dims.append((hidden_features, hidden_features, True))
    dims.append((hidden_features, output_size, False))       # final Linear

    layers = []
    for (fin, fout, relu) in dims:
        key, kw, kb = jax.random.split(key, 3)
        layers.append((kaiming_normal(kw, fin, fout), bias_init(kb, fin, fout), relu))
    return layers


def pack_params(params, in_features, hidden_features, hidden_depth, output_size):
    """One-time padding/stacking of parameters into the kernel's operand layout."""
    hp = _round_up(hidden_features, LANE)
    op = _round_up(output_size, LANE)
    bp = max(hp, op)
    num_hidden = 2 * hidden_depth

    ws = [w for (w, _, _) in params]
    bs = [b for (_, b, _) in params]

    w_first = _pad2d(ws[0], in_features, hp)                     # (in, HP)
    if num_hidden > 0:
        w_hidden = jnp.stack([_pad2d(w, hp, hp)
                              for w in ws[1:1 + num_hidden]])    # (L, HP, HP)
    else:
        w_hidden = jnp.zeros((1, hp, hp), ws[0].dtype)           # unused dummy
    w_last = _pad2d(ws[-1], hp, op)                              # (HP, OP)
    biases = jnp.stack([jnp.pad(b, (0, bp - b.shape[0])) for b in bs])  # (L+2, BP)

    return (jax.device_put(w_first), jax.device_put(w_hidden),
            jax.device_put(w_last), jax.device_put(biases))


if __name__ == "__main__":
    # Small shapes consistent with the module: a batch of feature vectors.
    N = 64
    IN_FEATURES = 16
    HIDDEN = 32
    HIDDEN_DEPTH = 2
    OUT = 8

    key = jax.random.PRNGKey(0)
    key_x, key_p = jax.random.split(key)
    x = jax.random.normal(key_x, (N, IN_FEATURES), jnp.float32)

    params = init_model_params(key_p, IN_FEATURES, HIDDEN, HIDDEN_DEPTH, OUT)
    packed = pack_params(params, IN_FEATURES, HIDDEN, HIDDEN_DEPTH, OUT)
    config = (IN_FEATURES, HIDDEN, HIDDEN_DEPTH, OUT)

    y = fused_mlp_forward(x, *packed, config=config)
    jax.block_until_ready(y)
    assert y.shape == (N, OUT), y.shape

    # Sanity check against a plain-JAX reference of the same forward pass.
    y_ref = x
    for (w, b, relu) in params:
        y_ref = jnp.dot(y_ref, w, precision=jax.lax.Precision.HIGHEST) + b
        if relu:
            y_ref = jnp.maximum(y_ref, 0.0)
    assert jnp.allclose(y, y_ref, atol=1e-4, rtol=1e-4)

    print("KERNEL_OK")
</pallas_src>

<mosaic_0001>
module attributes {stable_mosaic.version = 11 : i64} {
  func.func @_fused_mlp_kernel(%arg0: memref<64x16xf32, #tpu.memory_space<vmem>>, %arg1: memref<16x128xf32, #tpu.memory_space<vmem>>, %arg2: memref<4x128x128xf32, #tpu.memory_space<vmem>>, %arg3: memref<128x128xf32, #tpu.memory_space<vmem>>, %arg4: memref<6x128xf32, #tpu.memory_space<vmem>>, %arg5: memref<64x128xf32, #tpu.memory_space<vmem>>) attributes {dimension_semantics = [], scalar_prefetch = 0 : i64, scratch_operands = 0 : i64, tpu.core_type = #tpu.core_type<tc>} {
    %c0 = arith.constant 0 : index
    %c0_0 = arith.constant 0 : index
    %0 = vector.load %arg4[%c0, %c0_0] : memref<6x128xf32, #tpu.memory_space<vmem>>, vector<6x128xf32>
    %c0_1 = arith.constant 0 : index
    %c0_2 = arith.constant 0 : index
    %1 = vector.load %arg0[%c0_1, %c0_2] : memref<64x16xf32, #tpu.memory_space<vmem>>, vector<64x16xf32>
    %c0_3 = arith.constant 0 : index
    %c0_4 = arith.constant 0 : index
    %2 = vector.load %arg1[%c0_3, %c0_4] : memref<16x128xf32, #tpu.memory_space<vmem>>, vector<16x128xf32>
    %cst = arith.constant dense<0.000000e+00> : vector<64x128xf32>
    %3 = tpu.matmul %1, %2, %cst {dimension_numbers = #tpu.dot_dimension_numbers<[1], [0], [0], [1], [0, 0, 1, 1], [], []>, precision = #tpu.contract_precision<fp32>} : vector<64x16xf32>, vector<16x128xf32>, vector<64x128xf32> -> vector<64x128xf32>
    %4 = vector.extract_strided_slice %0 {offsets = [0, 0], sizes = [1, 128], strides = [1, 1]} : vector<6x128xf32> to vector<1x128xf32>
    %5 = vector.broadcast %4 : vector<1x128xf32> to vector<64x128xf32>
    %6 = arith.addf %3, %5 : vector<64x128xf32>
    %cst_5 = arith.constant 0.000000e+00 : f32
    %7 = vector.broadcast %cst_5 : f32 to vector<64x128xf32>
    %8 = arith.maximumf %6, %7 : vector<64x128xf32>
    %c0_6 = arith.constant 0 : index
    %c0_7 = arith.constant 0 : index
    %c0_8 = arith.constant 0 : index
    %9 = vector.load %arg2[%c0_6, %c0_7, %c0_8] : memref<4x128x128xf32, #tpu.memory_space<vmem>>, vector<1x128x128xf32>
    %10 = vector.shape_cast %9 : vector<1x128x128xf32> to vector<128x128xf32>
    %cst_9 = arith.constant dense<0.000000e+00> : vector<64x128xf32>
    %11 = tpu.matmul %8, %10, %cst_9 {dimension_numbers = #tpu.dot_dimension_numbers<[1], [0], [0], [1], [0, 0, 1, 1], [], []>, precision = #tpu.contract_precision<fp32>} : vector<64x128xf32>, vector<128x128xf32>, vector<64x128xf32> -> vector<64x128xf32>
    %12 = vector.extract_strided_slice %0 {offsets = [1, 0], sizes = [1, 128], strides = [1, 1]} : vector<6x128xf32> to vector<1x128xf32>
    %13 = vector.broadcast %12 : vector<1x128xf32> to vector<64x128xf32>
    %14 = arith.addf %11, %13 : vector<64x128xf32>
    %cst_10 = arith.constant 0.000000e+00 : f32
    %15 = vector.broadcast %cst_10 : f32 to vector<64x128xf32>
    %16 = arith.maximumf %14, %15 : vector<64x128xf32>
    %c1 = arith.constant 1 : index
    %c0_11 = arith.constant 0 : index
    %c0_12 = arith.constant 0 : index
    %17 = vector.load %arg2[%c1, %c0_11, %c0_12] : memref<4x128x128xf32, #tpu.memory_space<vmem>>, vector<1x128x128xf32>
    %18 = vector.shape_cast %17 : vector<1x128x128xf32> to vector<128x128xf32>
    %cst_13 = arith.constant dense<0.000000e+00> : vector<64x128xf32>
    %19 = tpu.matmul %16, %18, %cst_13 {dimension_numbers = #tpu.dot_dimension_numbers<[1], [0], [0], [1], [0, 0, 1, 1], [], []>, precision = #tpu.contract_precision<fp32>} : vector<64x128xf32>, vector<128x128xf32>, vector<64x128xf32> -> vector<64x128xf32>
    %20 = vector.extract_strided_slice %0 {offsets = [2, 0], sizes = [1, 128], strides = [1, 1]} : vector<6x128xf32> to vector<1x128xf32>
    %21 = vector.broadcast %20 : vector<1x128xf32> to vector<64x128xf32>
    %22 = arith.addf %19, %21 : vector<64x128xf32>
    %cst_14 = arith.constant 0.000000e+00 : f32
    %23 = vector.broadcast %cst_14 : f32 to vector<64x128xf32>
    %24 = arith.maximumf %22, %23 : vector<64x128xf32>
    %c2 = arith.constant 2 : index
    %c0_15 = arith.constant 0 : index
    %c0_16 = arith.constant 0 : index
    %25 = vector.load %arg2[%c2, %c0_15, %c0_16] : memref<4x128x128xf32, #tpu.memory_space<vmem>>, vector<1x128x128xf32>
    %26 = vector.shape_cast %25 : vector<1x128x128xf32> to vector<128x128xf32>
    %cst_17 = arith.constant dense<0.000000e+00> : vector<64x128xf32>
    %27 = tpu.matmul %24, %26, %cst_17 {dimension_numbers = #tpu.dot_dimension_numbers<[1], [0], [0], [1], [0, 0, 1, 1], [], []>, precision = #tpu.contract_precision<fp32>} : vector<64x128xf32>, vector<128x128xf32>, vector<64x128xf32> -> vector<64x128xf32>
    %28 = vector.extract_strided_slice %0 {offsets = [3, 0], sizes = [1, 128], strides = [1, 1]} : vector<6x128xf32> to vector<1x128xf32>
    %29 = vector.broadcast %28 : vector<1x128xf32> to vector<64x128xf32>
    %30 = arith.addf %27, %29 : vector<64x128xf32>
    %cst_18 = arith.constant 0.000000e+00 : f32
    %31 = vector.broadcast %cst_18 : f32 to vector<64x128xf32>
    %32 = arith.maximumf %30, %31 : vector<64x128xf32>
    %c3 = arith.constant 3 : index
    %c0_19 = arith.constant 0 : index
    %c0_20 = arith.constant 0 : index
    %33 = vector.load %arg2[%c3, %c0_19, %c0_20] : memref<4x128x128xf32, #tpu.memory_space<vmem>>, vector<1x128x128xf32>
    %34 = vector.shape_cast %33 : vector<1x128x128xf32> to vector<128x128xf32>
    %cst_21 = arith.constant dense<0.000000e+00> : vector<64x128xf32>
    %35 = tpu.matmul %32, %34, %cst_21 {dimension_numbers = #tpu.dot_dimension_numbers<[1], [0], [0], [1], [0, 0, 1, 1], [], []>, precision = #tpu.contract_precision<fp32>} : vector<64x128xf32>, vector<128x128xf32>, vector<64x128xf32> -> vector<64x128xf32>
    %36 = vector.extract_strided_slice %0 {offsets = [4, 0], sizes = [1, 128], strides = [1, 1]} : vector<6x128xf32> to vector<1x128xf32>
    %37 = vector.broadcast %36 : vector<1x128xf32> to vector<64x128xf32>
    %38 = arith.addf %35, %37 : vector<64x128xf32>
    %cst_22 = arith.constant 0.000000e+00 : f32
    %39 = vector.broadcast %cst_22 : f32 to vector<64x128xf32>
    %40 = arith.maximumf %38, %39 : vector<64x128xf32>
    %c0_23 = arith.constant 0 : index
    %c0_24 = arith.constant 0 : index
    %41 = vector.load %arg3[%c0_23, %c0_24] : memref<128x128xf32, #tpu.memory_space<vmem>>, vector<128x128xf32>
    %cst_25 = arith.constant dense<0.000000e+00> : vector<64x128xf32>
    %42 = tpu.matmul %40, %41, %cst_25 {dimension_numbers = #tpu.dot_dimension_numbers<[1], [0], [0], [1], [0, 0, 1, 1], [], []>, precision = #tpu.contract_precision<fp32>} : vector<64x128xf32>, vector<128x128xf32>, vector<64x128xf32> -> vector<64x128xf32>
    %43 = vector.extract_strided_slice %0 {offsets = [5, 0], sizes = [1, 128], strides = [1, 1]} : vector<6x128xf32> to vector<1x128xf32>
    %44 = vector.broadcast %43 : vector<1x128xf32> to vector<64x128xf32>
    %45 = arith.addf %42, %44 : vector<64x128xf32>
    %c0_26 = arith.constant 0 : index
    %c0_27 = arith.constant 0 : index
    %46 = vector.load %arg5[%c0_26, %c0_27] : memref<64x128xf32, #tpu.memory_space<vmem>>, vector<64x128xf32>
    tpu.vector_store %arg5[%c0_26, %c0_27], %45 {strides = array<i32>} : memref<64x128xf32, #tpu.memory_space<vmem>>, vector<64x128xf32>,
    return
  }
}

</mosaic_0001>

<bundles_post_ra>
// kernel: fused_mlp_forward.1
= control target key start
LH: loop header
LB: loop body
LE: loop exit
PB: predicated region body
PF: predicated region fallthrough
CT: control target
= control target key end

     0   :  { %10 = vsyncpa [#allocation3], 0  ;;  %s10434_s0 = inlined_call_operand.vmem [shape: f32[64,16], index: 0, kind: input, shape index: {}]   ;;  %s10435_s1 = inlined_call_operand.vmem [shape: f32[16,128], index: 1, kind: input, shape index: {}]   ;;  %s10436_s2 = inlined_call_operand.hbm [shape: f32[4,128,128], index: 2, kind: input, shape index: {}]   ;;  %s10437_s3 = inlined_call_operand.hbm [shape: f32[128,128], index: 3, kind: input, shape index: {}]   ;;  %s10438_s4 = inlined_call_operand.vmem [shape: f32[6,128], index: 4, kind: input, shape index: {}]   ;;  %s10439_s5 = inlined_call_operand.vmem [shape: f32[64,128], index: 5, kind: output, shape index: {}]  }
   0x1   :  { %11 = vsyncpa [#allocation5], 0  ;;  %s7961_s18 = smov [#allocation2]  }
   0x2   :  { %s21_s19 = sshll.u32 %s7961_s18, 4  ;;  %s22_s19 = int_to_ptr.vmem [resolvable:$true] %s21_s19 }
   0x3   :  { %s7925_s20 = scalar_lea.vmem %s22_s19, 8192  ;;  %p7930_p1 = scmp.lt.s32.totalorder %s22_s19, %s22_s19 }
   0x4   :  { %p7926_p0 = scmp.ne.s32.totalorder %s22_s19, %s7925_s20  ;;  %p7931_p2 = scmp.lt.s32.totalorder %s7925_s20, %s7925_s20 }
   0x6   :  { %p7932_p3 = por %p7931_p2, %p7930_p1 }
   0x8   :  { %p7933_p4 = pnand %p7932_p3, %p7926_p0 }
   0xa   :  { %7936 = shalt.err (!%p7933_p4)
}
   0xb   :  { %s7962_s21 = smov 128   ;;  %s7963_s22 = smov 8  }
   0xc   :  { %27 = dma.hbm_to_vmem [thread:$0]  %s10436_s2, 8192, %s22_s19, [#allocation3], %s7962_s21, %s7962_s21, %s7963_s22  }
   0xd   :  { %s7964_s25 = smov [#allocation4]  }
   0xe   :  { %s33_s26 = sshll.u32 %s7964_s25, 4  ;;  %s34_s26 = int_to_ptr.vmem [resolvable:$true] %s33_s26 }
   0xf   :  { %s7945_s27 = scalar_lea.vmem %s34_s26, 2048  ;;  %p7950_p6 = scmp.lt.s32.totalorder %s34_s26, %s34_s26 }
  0x10   :  { %p7946_p5 = scmp.ne.s32.totalorder %s34_s26, %s7945_s27  ;;  %p7951_p7 = scmp.lt.s32.totalorder %s7945_s27, %s7945_s27 }
  0x12   :  { %p7952_p8 = por %p7951_p7, %p7950_p6 }
  0x14   :  { %p7953_p9 = pnand %p7952_p8, %p7946_p5 }
  0x16   :  { %7956 = shalt.err (!%p7953_p9)
}
  0x17   :  { %39 = dma.hbm_to_vmem [thread:$0]  %s10437_s3, 2048, %s34_s26, [#allocation5], %s7962_s21, %s7962_s21, %s7963_s22  }
  0x18   :  { %7957 = dma.done.wait [#allocation3], 8192  }
  0x19   :  { %7958 = vsyncadd [#allocation3], 4294959104 }
  0x1a   :  { %7959 = dma.done.wait [#allocation5], 2048  }
  0x1b   :  { %7960 = vsyncadd [#allocation5], 4294965248  ;;  %vm63_vm0 = vcmask 130048   ;;  %v58_v0 = vld [vmem:[%s10435_s1 + $0x8] sm:$0xff]  ;;  %v57_v1 = vld [vmem:[%s10435_s1] sm:$0xff] }
  0x1c   :  { %v49_v2 = vld [vmem:[%s10434_s0] sm:$0xff]  ;;  %v8010_v3 = vand.u32 4294901760, %v58_v0  ;;  %v8012_v4 = vand.u32 4294901760, %v57_v1  ;;  %v50_v6 = vld [vmem:[%s10434_s0 + $0x8] sm:$0xff]  ;;  %v51_v7 = vld [vmem:[%s10434_s0 + $0x10] sm:$0xff] }
  0x1d   :  { %v65_v5 = vsel %vm63_vm0, %v49_v2, 0  ;;  %v52_v8 = vld [vmem:[%s10434_s0 + $0x18] sm:$0xff]  ;;  %v68_v10 = vsel %vm63_vm0, %v50_v6, 0  ;;  %v71_v11 = vsel %vm63_vm0, %v51_v7, 0  ;;  %v53_v13 = vld [vmem:[%s10434_s0 + $0x20] sm:$0xff]  ;;  %v54_v14 = vld [vmem:[%s10434_s0 + $0x28] sm:$0xff] }
  0x1e   :  { %v8024_v9 = vand.u32 4294901760, %v65_v5  ;;  %v74_v12 = vsel %vm63_vm0, %v52_v8, 0  ;;  %6495 = vmatprep.subr.mxu0 %v8010_v3  ;;  %v265_v15 = vsub.f32 %v58_v0, %v8010_v3  ;;  %v8037_v16 = vand.u32 4294901760, %v68_v10  ;;  %v55_v39 = vld [vmem:[%s10434_s0 + $0x30] sm:$0xff]  ;;  %v56_v40 = vld [vmem:[%s10434_s0 + $0x38] sm:$0xff] }
  0x1f   :  { %v8040_v17 = vsub.f32 %v57_v1, %v8012_v4  ;;  %v8042_v18 = vand.u32 4294901760, %v71_v11  ;;  %6496 = vmatpush3.msra.mxu0 %v8010_v3  ;;  %v8049_v20 = vand.u32 4294901760, %v74_v12  ;;  %v77_v21 = vsel %vm63_vm0, %v53_v13, 0  ;;  %v870_v6 = vld [vmem:[#allocation2 + $0x70] sm:$0xff]  ;;  %v868_v13 = vld [vmem:[#allocation2 + $0x60] sm:$0xff] }
  0x20   :  { %v8046_v19 = vsub.f32 %v65_v5, %v8024_v9  ;;  %6515 = vmatprep.mubr.f32.mxu1 %v8024_v9  ;;  %v80_v22 = vsel %vm63_vm0, %v54_v14, 0  ;;  %6497 = vmatprep.subr.mxu0 %v8012_v4  ;;  %v8054_v23 = vand.u32 4294901760, %v265_v15  ;;  %v8057_v24 = vsub.f32 %v68_v10, %v8037_v16 }
  0x21   :  { %v8060_v25 = vand.u32 4294901760, %v8040_v17  ;;  %v8063_v26 = vsub.f32 %v71_v11, %v8042_v18  ;;  %6498 = vmatpush3.msra.mxu0 %v8012_v4  ;;  %v8068_v28 = vsub.f32 %v74_v12, %v8049_v20  ;;  %v8070_v29 = vand.u32 4294901760, %v77_v21 }
  0x22   :  { %v157_v27 = vand.u32 4294901760, %v8046_v19  ;;  %v8072_v30 = vand.u32 4294901760, %v80_v22  ;;  %v267_v31 = vsub.f32 %v265_v15, %v8054_v23  ;;  %v167_v32 = vand.u32 4294901760, %v8057_v24  ;;  %6527 = vmatprep.subr.mxu0 %v265_v15 }
  0x23   :  { %v274_v33 = vsub.f32 %v8040_v17, %v8060_v25  ;;  %v177_v34 = vand.u32 4294901760, %v8063_v26  ;;  %v187_v36 = vand.u32 4294901760, %v8068_v28  ;;  %v8084_v37 = vsub.f32 %v77_v21, %v8070_v29 }
  0x24   :  { %v158_v35 = vsub.f32 %v8046_v19, %v157_v27  ;;  %v8087_v38 = vsub.f32 %v80_v22, %v8072_v30  ;;  %v268_v41 = vand.u32 4294901760, %v267_v31  ;;  %v168_v42 = vsub.f32 %v8057_v24, %v167_v32 }
  0x25   :  { %v275_v43 = vand.u32 4294901760, %v274_v33  ;;  %v178_v44 = vsub.f32 %v8063_v26, %v177_v34  ;;  %v188_v46 = vsub.f32 %v8068_v28, %v187_v36  ;;  %v197_v47 = vand.u32 4294901760, %v8084_v37 }
  0x26   :  { %v159_v45 = vand.u32 4294901760, %v158_v35  ;;  %v207_v48 = vand.u32 4294901760, %v8087_v38  ;;  %6511 = vmatprep.subr.mxu1 %v268_v41  ;;  %v169_v49 = vand.u32 4294901760, %v168_v42  ;;  %v83_v50 = vsel %vm63_vm0, %v55_v39, 0  ;;  %v863_v42 = vld [vmem:[#allocation2 + $0x38] sm:$0xff] }
  0x27   :  { %v86_v51 = vsel %vm63_vm0, %v56_v40, 0  ;;  %6512 = vmatpush3.msra.mxu1 %v268_v41  ;;  %v179_v52 = vand.u32 4294901760, %v178_v44  ;;  %v198_v53 = vsub.f32 %v8084_v37, %v197_v47  ;;  %v8109_v54 = vand.u32 4294901760, %v83_v50 }
  0x28   :  { %6499 = vmatprep.mubr.f32.mxu0 %v159_v45  ;;  %6513 = vmatprep.subr.mxu1 %v275_v43  ;;  %v189_v55 = vand.u32 4294901760, %v188_v46  ;;  %v208_v56 = vsub.f32 %v8087_v38, %v207_v48  ;;  %v8114_v57 = vand.u32 4294901760, %v86_v51  ;;  %v8176_v8 = vand.u32 4294901760, %v870_v6 }
  0x29   :  { %6500 = vmatmul.mubr.f32.vlgmr.msra.gmra.mxu0 %v169_v49  ;;  %6514 = vmatpush3.msra.mxu1 %v275_v43  ;;  %v199_v58 = vand.u32 4294901760, %v198_v53  ;;  %v216_v59 = vsub.f32 %v83_v50, %v8109_v54  ;;  %v8257_v46 = vand.u32 4294901760, %v863_v42 }
  0x2a   :  { %6528 = vmatpush3.msra.mxu0 %v265_v15  ;;  %6516 = vmatmul.mubr.f32.vlgmr.msra.gmra.mxu1 %v8037_v16  ;;  %v226_v60 = vsub.f32 %v86_v51, %v8114_v57  ;;  %v209_v62 = vand.u32 4294901760, %v208_v56  ;;  %v8184_v11 = vsub.f32 %v870_v6, %v8176_v8 }
  0x2b   :  { %6543 = vmatprep.subr.mxu1 %v8010_v3  ;;  %6502 = vmatprep.mubr.f32.mxu0 %v179_v52  ;;  %v217_v61 = vand.u32 4294901760, %v216_v59  ;;  %v8267_v52 = vsub.f32 %v863_v42, %v8257_v46 }
  0x2c   :  { %6544 = vmatpush3.msra.mxu1 %v8010_v3  ;;  %6518 = vmatprep.mubr.f32.mxu1 %v8042_v18  ;;  %v227_v63 = vand.u32 4294901760, %v226_v60  ;;  %v8193_v15 = vand.u32 4294901760, %v8184_v11 }
  0x2d   :  { %6503 = vmatmul.mubr.f32.gmra.mxu0 %v189_v55  ;;  %6529 = vmatprep.subr.mxu0 %v8040_v17  ;;  %v218_v0 = vsub.f32 %v216_v59, %v217_v61  ;;  %10804 = vst [vmem:[#allocation17_spill] sm:$0xff] %v8267_v52 }
  0x2e   :  { %6505 = vmatprep.mubr.f32.mxu0 %v199_v58  ;;  %6519 = vmatmul.mubr.f32.gmra.mxu1 %v8049_v20  ;;  %v228_v1 = vsub.f32 %v226_v60, %v227_v63  ;;  %10796 = vst [vmem:[#allocation9_spill] sm:$0xff] %v8193_v15 }
  0x2f   :  { %6530 = vmatpush3.msra.mxu0 %v8040_v17  ;;  %6521 = vmatprep.mubr.f32.mxu1 %v8070_v29  ;;  %v219_v2 = vand.u32 4294901760, %v218_v0  ;;  %v8198_v17 = vand.u32 4294901760, %v868_v13 }
  0x30   :  { %6545 = vmatprep.subr.mxu1 %v8012_v4  ;;  %v229_v5 = vand.u32 4294901760, %v228_v1  ;;  %6559 = vmatprep.subr.mxu0 %v8054_v23 }
  0x31   :  { %6506 = vmatmul.mubr.f32.gmra.mxu0 %v209_v62  ;;  %6546 = vmatpush3.msra.mxu1 %v8012_v4  ;;  %v8208_v22 = vsub.f32 %v868_v13, %v8198_v17 }
  0x32   :  { %6508 = vmatprep.mubr.f32.mxu0 %v219_v2  ;;  %6522 = vmatmul.mubr.f32.gmra.mxu1 %v8072_v30  ;;  %v859_v2 = vld [vmem:[#allocation2 + $0x18] sm:$0xff] }
  0x33   :  { %6575 = vmatprep.subr.mxu1 %v8010_v3  ;;  %6524 = vmatprep.mubr.f32.mxu1 %v8109_v54 }
  0x35   :  { %6509 = vmatmul.mubr.f32.gmra.mxu0 %v229_v5 }
  0x36   :  { %6531 = vmatprep.mubr.f32.mxu0 %v8046_v19  ;;  %6525 = vmatmul.mubr.f32.gmra.mxu1 %v8114_v57 }
  0x37   :  { %6547 = vmatprep.mubr.f32.mxu1 %v157_v27  ;;  %v8217_v27 = vand.u32 4294901760, %v8208_v22 }
  0x39   :  { %6532 = vmatmul.mubr.f32.vlgmr.msra.gmra.mxu0 %v8057_v24  ;;  %v866_v24 = vld [vmem:[#allocation2 + $0x50] sm:$0xff]  ;;  %10798 = vst [vmem:[#allocation11_spill] sm:$0xff] %v8217_v27 }
  0x3a   :  { %6560 = vmatpush3.msra.mxu0 %v8054_v23  ;;  %6534 = vmatprep.mubr.f32.mxu0 %v8063_v26 }
  0x3b   :  { %6548 = vmatmul.mubr.f32.vlgmr.msra.gmra.mxu1 %v167_v32  ;;  %6561 = vmatprep.subr.mxu0 %v8060_v25  ;;  %v1062_v32 = vsub.f32 %v8208_v22, %v8217_v27 }
  0x3c   :  { %6576 = vmatpush3.msra.mxu1 %v8010_v3  ;;  %6550 = vmatprep.mubr.f32.mxu1 %v177_v34  ;;  %v871_v3 = vld [vmem:[#allocation2 + $0x78] sm:$0xff] }
  0x3d   :  { %6535 = vmatmul.mubr.f32.gmra.mxu0 %v8068_v28  ;;  %6577 = vmatprep.subr.mxu1 %v8012_v4  ;;  %v8219_v28 = vand.u32 4294901760, %v866_v24 }
  0x3e   :  { %6537 = vmatprep.mubr.f32.mxu0 %v8084_v37  ;;  %6562 = vmatpush3.msra.mxu0 %v8060_v25  ;;  %v1063_v37 = vand.u32 4294901760, %v1062_v32 }
  0x3f   :  { %6551 = vmatmul.mubr.f32.gmra.mxu1 %v187_v36  ;;  %v8228_v33 = vsub.f32 %v866_v24, %v8219_v28  ;;  %v864_v36 = vld [vmem:[#allocation2 + $0x40] sm:$0xff] }
  0x40   :  { %6553 = vmatprep.mubr.f32.mxu1 %v197_v47  ;;  %6578 = vmatpush3.msra.mxu1 %v8012_v4  ;;  %v8171_v4 = vand.u32 4294901760, %v871_v3  ;;  %v8243_v40 = vand.u32 4294901760, %v864_v36 }
  0x41   :  { %6538 = vmatmul.mubr.f32.gmra.mxu0 %v8087_v38  ;;  %v8238_v38 = vand.u32 4294901760, %v8228_v33 }
  0x42   :  { %6540 = vmatprep.mubr.f32.mxu0 %v216_v59  ;;  %v8174_v7 = vsub.f32 %v871_v3, %v8171_v4  ;;  %6591 = vmatprep.subr.mxu0 %v8171_v4  ;;  %v8255_v45 = vsub.f32 %v864_v36, %v8243_v40 }
  0x43   :  { %6554 = vmatmul.mubr.f32.gmra.mxu1 %v207_v48  ;;  %10800 = vst [vmem:[#allocation13_spill] sm:$0xff] %v8238_v38  ;;  %v1076_v43 = vsub.f32 %v8228_v33, %v8238_v38  ;;  %v862_v48 = vld [vmem:[#allocation2 + $0x30] sm:$0xff] }
  0x44   :  { %6556 = vmatprep.mubr.f32.mxu1 %v217_v61  ;;  %v8181_v10 = vand.u32 4294901760, %v8174_v7  ;;  %10802 = vst [vmem:[#allocation15_spill] sm:$0xff] %v8255_v45  ;;  %v8264_v51 = vand.u32 4294901760, %v8255_v45  ;;  %v8270_v53 = vand.u32 4294901760, %v862_v48 }
  0x45   :  { %6541 = vmatmul.mubr.f32.gmra.mxu0 %v226_v60  ;;  %v1077_v49 = vand.u32 4294901760, %v1076_v43  ;;  %v860_v60 = vld [vmem:[#allocation2 + $0x20] sm:$0xff] }
  0x46   :  { %6563 = vmatprep.mubr.f32.mxu0 %v8024_v9  ;;  %10795 = vst [vmem:[#allocation8_spill] sm:$0xff] %v8181_v10  ;;  %v1041_v14 = vsub.f32 %v8174_v7, %v8181_v10  ;;  %10803 = vst [vmem:[#allocation16_spill] sm:$0xff] %v8264_v51  ;;  %v1090_v56 = vsub.f32 %v8255_v45, %v8264_v51  ;;  %v8282_v59 = vsub.f32 %v862_v48, %v8270_v53 }
  0x47   :  { %6557 = vmatmul.mubr.f32.gmra.mxu1 %v227_v63  ;;  %v8290_v0 = vand.u32 4294901760, %v860_v60 }
  0x48   :  { %6579 = vmatprep.mubr.f32.mxu1 %v8024_v9  ;;  %v869_v9 = vld [vmem:[#allocation2 + $0x68] sm:$0xff]  ;;  %v1042_v19 = vand.u32 4294901760, %v1041_v14  ;;  %10807 = vst [vmem:[#allocation20_spill] sm:$0xff] %v8282_v59  ;;  %v1091_v61 = vand.u32 4294901760, %v1090_v56  ;;  %v8294_v1 = vand.u32 4294901760, %v8282_v59  ;;  %v858_v14 = vld [vmem:[#allocation2 + $0x10] sm:$0xff] }
  0x49   :  { %6564 = vmatmul.mubr.f32.vlgmr.msra.gmra.mxu0 %v8037_v16  ;;  %v8186_v12 = vand.u32 4294901760, %v869_v9  ;;  %10809 = vst [vmem:[#allocation22_spill] sm:$0xff] %v8290_v0  ;;  %v8301_v6 = vsub.f32 %v860_v60, %v8290_v0  ;;  %v8317_v24 = vand.u32 4294901760, %v858_v14 }
  0x4a   :  { %6566 = vmatprep.mubr.f32.mxu0 %v8042_v18  ;;  %6592 = vmatpush3.msra.mxu0 %v8171_v4  ;;  %10810 = vst [vmem:[#allocation23_spill] sm:$0xff] %v8294_v1  ;;  %v1104_v13 = vsub.f32 %v8282_v59, %v8294_v1 }
  0x4b   :  { %6580 = vmatmul.mubr.f32.vlgmr.msra.gmra.mxu1 %v8037_v16  ;;  %6593 = vmatprep.subr.mxu0 %v8176_v8  ;;  %v8196_v16 = vsub.f32 %v869_v9, %v8186_v12  ;;  %10812 = vst [vmem:[#allocation25_spill] sm:$0xff] %v8301_v6  ;;  %v8303_v9 = vand.u32 4294901760, %v859_v2  ;;  %10816 = vst [vmem:[#allocation29_spill] sm:$0xff] %v8317_v24  ;;  %v8327_v36 = vsub.f32 %v858_v14, %v8317_v24 }
  0x4c   :  { %6582 = vmatprep.mubr.f32.mxu1 %v8042_v18  ;;  %6594 = vmatpush3.msra.mxu0 %v8176_v8  ;;  %v867_v18 = vld [vmem:[#allocation2 + $0x58] sm:$0xff] }
  0x4d   :  { %6567 = vmatmul.mubr.f32.gmra.mxu0 %v8049_v20  ;;  %6595 = vmatprep.subr.mxu0 %v8186_v12  ;;  %v8205_v21 = vand.u32 4294901760, %v8196_v16  ;;  %v8211_v23 = vand.u32 4294901760, %v867_v18  ;;  %10813 = vst [vmem:[#allocation26_spill] sm:$0xff] %v8303_v9  ;;  %10818 = vst [vmem:[#allocation31_spill] sm:$0xff] %v8327_v36  ;;  %v8336_v43 = vand.u32 4294901760, %v8327_v36 }
  0x4e   :  { %6569 = vmatprep.mubr.f32.mxu0 %v8070_v29  ;;  %6596 = vmatpush3.msra.mxu0 %v8186_v12 }
  0x4f   :  { %6583 = vmatmul.mubr.f32.gmra.mxu1 %v8049_v20  ;;  %v1048_v20 = vsub.f32 %v8184_v11, %v8193_v15  ;;  %10797 = vst [vmem:[#allocation10_spill] sm:$0xff] %v8205_v21  ;;  %6597 = vmatprep.subr.mxu0 %v8198_v17  ;;  %v1055_v26 = vsub.f32 %v8196_v16, %v8205_v21  ;;  %10820 = vst [vmem:[#allocation33_spill] sm:$0xff] %v8336_v43 }
  0x50   :  { %6585 = vmatprep.mubr.f32.mxu1 %v8070_v29  ;;  %6598 = vmatpush3.msra.mxu0 %v8198_v17  ;;  %v8222_v29 = vsub.f32 %v867_v18, %v8211_v23 }
  0x51   :  { %6570 = vmatmul.mubr.f32.gmra.mxu0 %v8072_v30  ;;  %6635 = vmatprep.subr.mxu1 %v1042_v19  ;;  %v1049_v25 = vand.u32 4294901760, %v1048_v20  ;;  %v1056_v31 = vand.u32 4294901760, %v1055_v26  ;;  %v8315_v20 = vsub.f32 %v859_v2, %v8303_v9  ;;  %v857_v26 = vld [vmem:[#allocation2 + $0x8] sm:$0xff] }
  0x52   :  { %6572 = vmatprep.mubr.f32.mxu0 %v8109_v54  ;;  %6636 = vmatpush3.msra.mxu1 %v1042_v19  ;;  %v8234_v35 = vand.u32 4294901760, %v8222_v29  ;;  %v8312_v19 = vand.u32 4294901760, %v8301_v6 }
  0x53   :  { %6586 = vmatmul.mubr.f32.gmra.mxu1 %v8072_v30  ;;  %v865_v30 = vld [vmem:[#allocation2 + $0x48] sm:$0xff]  ;;  %6599 = vmatprep.subr.mxu0 %v8211_v23  ;;  %10815 = vst [vmem:[#allocation28_spill] sm:$0xff] %v8315_v20  ;;  %v8324_v32 = vand.u32 4294901760, %v8315_v20 }
  0x54   :  { %6588 = vmatprep.mubr.f32.mxu1 %v8109_v54  ;;  %6637 = vmatprep.subr.mxu1 %v1049_v25  ;;  %v8230_v34 = vand.u32 4294901760, %v865_v30  ;;  %10799 = vst [vmem:[#allocation12_spill] sm:$0xff] %v8234_v35  ;;  %v1069_v41 = vsub.f32 %v8222_v29, %v8234_v35  ;;  %v861_v54 = vld [vmem:[#allocation2 + $0x28] sm:$0xff]  ;;  %10814 = vst [vmem:[#allocation27_spill] sm:$0xff] %v8312_v19 }
  0x55   :  { %6573 = vmatmul.mubr.f32.gmra.mxu0 %v8114_v57  ;;  %6638 = vmatpush3.msra.mxu1 %v1049_v25  ;;  %v8278_v58 = vand.u32 4294901760, %v861_v54  ;;  %v1105_v25 = vand.u32 4294901760, %v1104_v13  ;;  %10817 = vst [vmem:[#allocation30_spill] sm:$0xff] %v8324_v32  ;;  %v1125_v42 = vsub.f32 %v8315_v20, %v8324_v32 }
  0x56   :  { %6600 = vmatpush3.msra.mxu0 %v8211_v23  ;;  %6639 = vmatprep.subr.mxu1 %v1056_v31  ;;  %v8241_v39 = vsub.f32 %v865_v30, %v8230_v34  ;;  %v1070_v47 = vand.u32 4294901760, %v1069_v41 }
  0x57   :  { %6589 = vmatmul.mubr.f32.gmra.mxu1 %v8114_v57  ;;  %6601 = vmatprep.subr.mxu0 %v8219_v28  ;;  %v8276_v57 = vand.u32 4294901760, %v8267_v52  ;;  %10806 = vst [vmem:[#allocation19_spill] sm:$0xff] %v8278_v58  ;;  %v8288_v63 = vsub.f32 %v861_v54, %v8278_v58  ;;  %v1132_v54 = vsub.f32 %v8327_v36, %v8336_v43 }
  0x58   :  { %6602 = vmatpush3.msra.mxu0 %v8219_v28  ;;  %6640 = vmatpush3.msra.mxu1 %v1056_v31  ;;  %v8252_v44 = vand.u32 4294901760, %v8241_v39  ;;  %v1118_v31 = vsub.f32 %v8301_v6, %v8312_v19 }
  0x59   :  { %6603 = vmatprep.subr.mxu0 %v8230_v34  ;;  %6641 = vmatprep.subr.mxu1 %v1063_v37  ;;  %10805 = vst [vmem:[#allocation18_spill] sm:$0xff] %v8276_v57  ;;  %v1097_v62 = vsub.f32 %v8267_v52, %v8276_v57  ;;  %10808 = vst [vmem:[#allocation21_spill] sm:$0xff] %v8288_v63  ;;  %v8298_v3 = vand.u32 4294901760, %v8288_v63  ;;  %v1133_v60 = vand.u32 4294901760, %v1132_v54 }
  0x5a   :  { %10801 = vst [vmem:[#allocation14_spill] sm:$0xff] %v8252_v44  ;;  %6604 = vmatpush3.msra.mxu0 %v8230_v34  ;;  %6642 = vmatpush3.msra.mxu1 %v1063_v37  ;;  %v1083_v50 = vsub.f32 %v8241_v39, %v8252_v44  ;;  %v8330_v37 = vand.u32 4294901760, %v857_v26  ;;  %v1119_v41 = vand.u32 4294901760, %v1118_v31  ;;  %v59_v31 = vlaneseq }
  0x5b   :  { %6605 = vmatprep.subr.mxu0 %v8243_v40  ;;  %6643 = vmatprep.subr.mxu1 %v1070_v47  ;;  %v1098_v5 = vand.u32 4294901760, %v1097_v62  ;;  %10811 = vst [vmem:[#allocation24_spill] sm:$0xff] %v8298_v3  ;;  %v1111_v18 = vsub.f32 %v8288_v63, %v8298_v3 }
  0x5c   :  { %6606 = vmatpush3.msra.mxu0 %v8243_v40  ;;  %6644 = vmatpush3.msra.mxu1 %v1070_v47  ;;  %v1084_v55 = vand.u32 4294901760, %v1083_v50  ;;  %10819 = vst [vmem:[#allocation32_spill] sm:$0xff] %v8330_v37  ;;  %v856_v47 = vld [vmem:[#allocation2] sm:$0xff]  ;;  %v8340_v48 = vsub.f32 %v857_v26, %v8330_v37  ;;  %v1126_v50 = vand.u32 4294901760, %v1125_v42  ;;  %v8365_v54 = vshrl.u32 %v59_v31, 7 }
  0x5d   :  { %6607 = vmatprep.subr.mxu0 %v8257_v46  ;;  %6645 = vmatprep.subr.mxu1 %v1077_v49  ;;  %v1112_v30 = vand.u32 4294901760, %v1111_v18 }
  0x5e   :  { %6608 = vmatpush3.msra.mxu0 %v8257_v46  ;;  %6646 = vmatpush3.msra.mxu1 %v1077_v49  ;;  %10821 = vst [vmem:[#allocation34_spill] sm:$0xff] %v8340_v48  ;;  %v8342_v49 = vand.u32 4294901760, %v856_v47  ;;  %10826 = vst [vmem:[#allocation39_spill] sm:$0xff] %v8365_v54 }
  0x5f   :  { %6609 = vmatprep.subr.mxu0 %v8270_v53  ;;  %6647 = vmatprep.subr.mxu1 %v1084_v55 }
  0x60   :  { %6610 = vmatpush3.msra.mxu0 %v8270_v53  ;;  %6648 = vmatpush3.msra.mxu1 %v1084_v55  ;;  %10822 = vst [vmem:[#allocation35_spill] sm:$0xff] %v8342_v49  ;;  %v8349_v55 = vand.u32 4294901760, %v8340_v48  ;;  %v8352_v56 = vsub.f32 %v856_v47, %v8342_v49 }
  0x61   :  { %6611 = vmatprep.subr.mxu0 %v8278_v58  ;;  %6649 = vmatprep.subr.mxu1 %v1091_v61 }
  0x62   :  { %6612 = vmatpush3.msra.mxu0 %v8278_v58  ;;  %6650 = vmatpush3.msra.mxu1 %v1091_v61  ;;  %10823 = vst [vmem:[#allocation36_spill] sm:$0xff] %v8349_v55  ;;  %10824 = vst [vmem:[#allocation37_spill] sm:$0xff] %v8352_v56  ;;  %v1139_v61 = vsub.f32 %v8340_v48, %v8349_v55  ;;  %v8359_v62 = vand.u32 4294901760, %v8352_v56 }
  0x63   :  { %6613 = vmatprep.subr.mxu0 %v8290_v0  ;;  %6651 = vmatprep.subr.mxu1 %v1098_v5 }
  0x64   :  { %6614 = vmatpush3.msra.mxu0 %v8290_v0  ;;  %6652 = vmatpush3.msra.mxu1 %v1098_v5  ;;  %10825 = vst [vmem:[#allocation38_spill] sm:$0xff] %v8359_v62  ;;  %v1140_v2 = vand.u32 4294901760, %v1139_v61  ;;  %v1146_v5 = vsub.f32 %v8352_v56, %v8359_v62  ;;  %v8371_v62 = vld [vmem:[%s10438_s4] sm:$0x3f] }
  0x65   :  { %6615 = vmatprep.subr.mxu0 %v8303_v9  ;;  %6653 = vmatprep.subr.mxu1 %v1105_v25  ;;  %10827 = vst [vmem:[#allocation40_spill] sm:$0xff] %v8371_v62 }
  0x66   :  { %6616 = vmatpush3.msra.mxu0 %v8303_v9  ;;  %6654 = vmatpush3.msra.mxu1 %v1105_v25  ;;  %v1147_v13 = vand.u32 4294901760, %v1146_v5 }
  0x67   :  { %6617 = vmatprep.subr.mxu0 %v8317_v24  ;;  %6655 = vmatprep.subr.mxu1 %v1112_v30 }
  0x68   :  { %6618 = vmatpush3.msra.mxu0 %v8317_v24  ;;  %6656 = vmatpush3.msra.mxu1 %v1112_v30 }
  0x69   :  { %6619 = vmatprep.subr.mxu0 %v8330_v37  ;;  %6657 = vmatprep.subr.mxu1 %v1119_v41 }
  0x6a   :  { %6620 = vmatpush3.msra.mxu0 %v8330_v37  ;;  %6658 = vmatpush3.msra.mxu1 %v1119_v41 }
  0x6b   :  { %6621 = vmatprep.subr.mxu0 %v8342_v49  ;;  %6659 = vmatprep.subr.mxu1 %v1126_v50 }
  0x6c   :  { %6622 = vmatpush3.msra.mxu0 %v8342_v49  ;;  %6660 = vmatpush3.msra.mxu1 %v1126_v50 }
  0x6d   :  { %6679 = vmatprep.subr.mxu0 %v8174_v7  ;;  %6661 = vmatprep.subr.mxu1 %v1133_v60 }
  0x6e   :  { %6662 = vmatpush3.msra.mxu1 %v1133_v60 }
  0x6f   :  { %6663 = vmatprep.subr.mxu1 %v1140_v2 }
  0x70   :  { %6664 = vmatpush3.msra.mxu1 %v1140_v2 }
  0x71   :  { %6665 = vmatprep.subr.mxu1 %v1147_v13 }
  0x72   :  { %6666 = vmatpush3.msra.mxu1 %v1147_v13  ;;  %v61_v13 = vsub.s32 0, %v8365_v54 }
  0x73   :  { %6723 = vmatprep.subr.mxu1 %v8171_v4 }
  0x74   :  { %v62_v3 = vrot.slane %v8371_v62, %v61_v13 }
  0xe9   :  { %v6501_v14 = vpop.f32.mrf.mxu0 }
  0xea   :  { %v6517_v25 = vpop.f32.mrf.mxu1  ;;  %v172_v44 = vadd.f32 %v6501_v14, %v62_v3 }
  0xeb   :  { %v161_v18 = vpop.f32.mrf.mxu0 }
  0xec   :  { %v312_v30 = vpop.f32.mrf.mxu1  ;;  %v162_v27 = vadd.f32 %v161_v18, %v62_v3  ;;  %v319_v15 = vadd.f32 %v6517_v25, %v172_v44 }
  0xed   :  { %v6504_v26 = vpop.f32.mrf.mxu0 }
  0xee   :  { %v6520_v42 = vpop.f32.mrf.mxu1  ;;  %v192_v10 = vadd.f32 %v6504_v26, %v62_v3  ;;  %v313_v36 = vadd.f32 %v312_v30, %v162_v27 }
  0xef   :  { %v181_v41 = vpop.f32.mrf.mxu0 }
  0xf0   :  { %v324_v50 = vpop.f32.mrf.mxu1  ;;  %v182_v20 = vadd.f32 %v181_v41, %v62_v3  ;;  %v331_v62 = vadd.f32 %v6520_v42, %v192_v10 }
  0xf1   :  { %v6507_v47 = vpop.f32.mrf.mxu0 }
  0xf2   :  { %v6523_v61 = vpop.f32.mrf.mxu1  ;;  %v212_v6 = vadd.f32 %v6507_v47, %v62_v3  ;;  %v325_v9 = vadd.f32 %v324_v50, %v182_v20 }
  0xf3   :  { %v201_v60 = vpop.f32.mrf.mxu0 }
  0xf4   :  { %v336_v2 = vpop.f32.mrf.mxu1  ;;  %v202_v24 = vadd.f32 %v201_v60, %v62_v3  ;;  %v343_v0 = vadd.f32 %v6523_v61, %v212_v6 }
  0xf5   :  { %v6510_v5 = vpop.f32.mrf.mxu0 }
  0xf6   :  { %v6526_v43 = vpop.f32.mrf.mxu1  ;;  %v232_v45 = vadd.f32 %v6510_v5, %v62_v3  ;;  %v337_v30 = vadd.f32 %v336_v2, %v202_v24 }
  0xf7   :  { %v221_v55 = vpop.f32.mrf.mxu0 }
  0xf8   :  { %v348_v32 = vpop.f32.mrf.mxu1  ;;  %v355_v42 = vadd.f32 %v6526_v43, %v232_v45 }
  0xf9   :  { %v6533_v19 = vpop.f32.mrf.mxu0 }
  0xfa   :  { %v438_v49 = vadd.f32 %v6533_v19, %v319_v15  ;;  %v222_v15 = vadd.f32 %v221_v55, %v62_v3 }
  0xfb   :  { %v430_v1 = vpop.f32.mrf.mxu0  ;;  %v6549_v31 = vpop.f32.mrf.mxu1 }
  0xfc   :  { %v431_v63 = vadd.f32 %v430_v1, %v313_v36  ;;  %v563_v52 = vadd.f32 %v6549_v31, %v438_v49  ;;  %v349_v61 = vadd.f32 %v348_v32, %v222_v15 }
  0xfd   :  { %v6536_v57 = vpop.f32.mrf.mxu0  ;;  %v554_v51 = vpop.f32.mrf.mxu1 }
  0xfe   :  { %v452_v18 = vadd.f32 %v6536_v57, %v331_v62  ;;  %v555_v26 = vadd.f32 %v554_v51, %v431_v63 }
  0xff   :  { %v444_v38 = vpop.f32.mrf.mxu0  ;;  %v6552_v35 = vpop.f32.mrf.mxu1 }
 0x100   :  { %v445_v58 = vadd.f32 %v444_v38, %v325_v9  ;;  %v579_v10 = vadd.f32 %v6552_v35, %v452_v18 }
 0x101   :  { %v6539_v54 = vpop.f32.mrf.mxu0  ;;  %v570_v21 = vpop.f32.mrf.mxu1 }
 0x102   :  { %v466_v19 = vadd.f32 %v6539_v54, %v343_v0  ;;  %v571_v57 = vadd.f32 %v570_v21, %v445_v58 }
 0x103   :  { %v458_v56 = vpop.f32.mrf.mxu0  ;;  %v6555_v48 = vpop.f32.mrf.mxu1 }
 0x104   :  { %v459_v60 = vadd.f32 %v458_v56, %v337_v30  ;;  %v595_v51 = vadd.f32 %v6555_v48, %v466_v19 }
 0x105   :  { %v6542_v37 = vpop.f32.mrf.mxu0  ;;  %v586_v13 = vpop.f32.mrf.mxu1 }
 0x106   :  { %v480_v38 = vadd.f32 %v6542_v37, %v355_v42  ;;  %v587_v24 = vadd.f32 %v586_v13, %v459_v60 }
 0x107   :  { %v472_v59 = vpop.f32.mrf.mxu0  ;;  %v6558_v14 = vpop.f32.mrf.mxu1 }
 0x108   :  { %v473_v55 = vadd.f32 %v472_v59, %v349_v61  ;;  %v611_v48 = vadd.f32 %v6558_v14, %v480_v38 }
 0x109   :  { %v602_v44 = vpop.f32.mrf.mxu1  ;;  %v6565_v25 = vpop.f32.mrf.mxu0 }
 0x10a   :  { %v694_v27 = vadd.f32 %v6565_v25, %v563_v52  ;;  %v603_v14 = vadd.f32 %v602_v44, %v473_v55 }
 0x10b   :  { %v687_v41 = vpop.f32.mrf.mxu0  ;;  %v6581_v47 = vpop.f32.mrf.mxu1 }
 0x10c   :  { %v688_v1 = vadd.f32 %v687_v41, %v555_v26  ;;  %v809_v36 = vadd.f32 %v6581_v47, %v694_v27 }
 0x10d   :  { %v6568_v20 = vpop.f32.mrf.mxu0  ;;  %v802_v49 = vpop.f32.mrf.mxu1 }
 0x10e   :  { %v849_v6 = vmax.f32 %v809_v36, 0.0  ;;  %v706_v62 = vadd.f32 %v6568_v20, %v579_v10  ;;  %v803_v50 = vadd.f32 %v802_v49, %v688_v1 }
 0x10f   :  { %v699_v52 = vpop.f32.mrf.mxu0  ;;  %v6584_v63 = vpop.f32.mrf.mxu1 }
 0x110   :  { %v8374_v3 = vand.u32 4294901760, %v849_v6  ;;  %v848_v0 = vmax.f32 %v803_v50, 0.0  ;;  %v700_v9 = vadd.f32 %v699_v52, %v571_v57  ;;  %v821_v35 = vadd.f32 %v6584_v63, %v706_v62 }
 0x111   :  { %v6571_v45 = vpop.f32.mrf.mxu0  ;;  %v814_v43 = vpop.f32.mrf.mxu1 }
 0x112   :  { %v8377_v56 = vsub.f32 %v849_v6, %v8374_v3  ;;  %v8379_v21 = vand.u32 4294901760, %v848_v0  ;;  %v851_v58 = vmax.f32 %v821_v35, 0.0  ;;  %v718_v32 = vadd.f32 %v6571_v45, %v595_v51 }
 0x113   :  { %v815_v37 = vadd.f32 %v814_v43, %v700_v9  ;;  %v711_v54 = vpop.f32.mrf.mxu0  ;;  %v6587_v5 = vpop.f32.mrf.mxu1 }
 0x114   :  { %v969_v2 = vand.u32 4294901760, %v8377_v56  ;;  %v8383_v31 = vsub.f32 %v848_v0, %v8379_v21  ;;  %v8385_v13 = vand.u32 4294901760, %v851_v58  ;;  %v712_v59 = vadd.f32 %v711_v54, %v587_v24  ;;  %6667 = vmatprep.mubr.f32.mxu1 %v8379_v21 }
 0x115   :  { %v850_v18 = vmax.f32 %v815_v37, 0.0  ;;  %v833_v25 = vadd.f32 %v6587_v5, %v718_v32  ;;  %v6574_v26 = vpop.f32.mrf.mxu0  ;;  %v826_v27 = vpop.f32.mrf.mxu1  ;;  %6668 = vmatmul.mubr.f32.vlgmr.msra.gmra.mxu1 %v8374_v3 }
 0x116   :  { %v8390_v30 = vsub.f32 %v851_v58, %v8385_v13  ;;  %v730_v15 = vadd.f32 %v6574_v26, %v611_v48  ;;  %v827_v19 = vadd.f32 %v826_v27, %v712_v59  ;;  %6724 = vmatpush3.msra.mxu1 %v8171_v4  ;;  %v959_v36 = vand.u32 4294901760, %v8383_v31 }
 0x117   :  { %v8393_v41 = vand.u32 4294901760, %v850_v18  ;;  %v853_v47 = vmax.f32 %v833_v25, 0.0  ;;  %6725 = vmatprep.subr.mxu1 %v8176_v8  ;;  %v723_v10 = vpop.f32.mrf.mxu0  ;;  %v6590_v1 = vpop.f32.mrf.mxu1  ;;  %v970_v44 = vsub.f32 %v8377_v56, %v969_v2 }
 0x118   :  { %v852_v42 = vmax.f32 %v827_v19, 0.0  ;;  %v724_v60 = vadd.f32 %v723_v10, %v603_v14  ;;  %v845_v20 = vadd.f32 %v6590_v1, %v730_v15  ;;  %6726 = vmatpush3.msra.mxu1 %v8176_v8  ;;  %v960_v62 = vsub.f32 %v8383_v31, %v959_v36  ;;  %v10828_v19 = vld [vmem:[#allocation19_spill] sm:$0xff]  ;;  %v10832_v10 = vld [vmem:[#allocation26_spill] sm:$0xff]  ;;  %v10834_v1 = vld [vmem:[#allocation29_spill] sm:$0xff] }
 0x119   :  { %v8402_v49 = vsub.f32 %v850_v18, %v8393_v41  ;;  %v8404_v57 = vand.u32 4294901760, %v853_v47  ;;  %6670 = vmatprep.mubr.f32.mxu1 %v8393_v41  ;;  %6727 = vmatprep.subr.mxu1 %v8186_v12  ;;  %v838_v6 = vpop.f32.mrf.mxu1  ;;  %v989_v38 = vand.u32 4294901760, %v8390_v30  ;;  %v971_v0 = vand.u32 4294901760, %v970_v44  ;;  %v10837_v44 = vld [vmem:[#allocation25_spill] sm:$0xff] }
 0x11a   :  { %v8409_v50 = vand.u32 4294901760, %v852_v42  ;;  %v855_v61 = vmax.f32 %v845_v20, 0.0  ;;  %v839_v51 = vadd.f32 %v838_v6, %v724_v60  ;;  %6671 = vmatmul.mubr.f32.gmra.mxu1 %v8385_v13  ;;  %v961_v52 = vand.u32 4294901760, %v960_v62  ;;  %v10839_v60 = vld [vmem:[#allocation28_spill] sm:$0xff]  ;;  %v10840_v20 = vld [vmem:[#allocation31_spill] sm:$0xff]  ;;  %v10841_v6 = vld [vmem:[#allocation34_spill] sm:$0xff] }
 0x11b   :  { %6728 = vmatpush3.msra.mxu1 %v8186_v12  ;;  %v979_v63 = vand.u32 4294901760, %v8402_v49  ;;  %v8416_v9 = vsub.f32 %v853_v47, %v8404_v57  ;;  %v990_v58 = vsub.f32 %v8390_v30, %v989_v38  ;;  %v10830_v47 = vld [vmem:[#allocation22_spill] sm:$0xff]  ;;  %v10857_v62 = vld [vmem:[#allocation36_spill] sm:$0xff] }
 0x11c   :  { %v8419_v35 = vsub.f32 %v852_v42, %v8409_v50  ;;  %v854_v24 = vmax.f32 %v839_v51, 0.0  ;;  %6729 = vmatprep.subr.mxu1 %v8198_v17  ;;  %6673 = vmatprep.mubr.f32.mxu1 %v8409_v50  ;;  %v8423_v55 = vand.u32 4294901760, %v855_v61  ;;  %v10838_v42 = vld [vmem:[#allocation35_spill] sm:$0xff] }
 0x11d   :  { %6730 = vmatpush3.msra.mxu1 %v8198_v17  ;;  %6623 = vmatprep.mubr.f32.mxu0 %v961_v52  ;;  %v980_v45 = vsub.f32 %v8402_v49, %v979_v63  ;;  %v1009_v54 = vand.u32 4294901760, %v8416_v9  ;;  %v991_v59 = vand.u32 4294901760, %v990_v58  ;;  %v1842_v51 = vld [vmem:[#allocation2 + $0xf8] sm:$0xff] }
 0x11e   :  { %v8429_v43 = vand.u32 4294901760, %v854_v24  ;;  %6731 = vmatprep.subr.mxu1 %v8211_v23  ;;  %6624 = vmatmul.mubr.f32.vlgmr.msra.gmra.mxu0 %v971_v0  ;;  %v999_v32 = vand.u32 4294901760, %v8419_v35  ;;  %v8445_v5 = vsub.f32 %v855_v61, %v8423_v55  ;;  %v10858_v61 = vld [vmem:[#allocation38_spill] sm:$0xff]  ;;  %v1839_v0 = vld [vmem:[#allocation2 + $0xe0] sm:$0xff] }
 0x11f   :  { %6674 = vmatmul.mubr.f32.gmra.mxu1 %v8404_v57  ;;  %6680 = vmatpush3.msra.mxu0 %v8174_v7  ;;  %v981_v48 = vand.u32 4294901760, %v980_v45  ;;  %v1838_v45 = vld [vmem:[#allocation2 + $0xd8] sm:$0xff] }
 0x120   :  { %v8439_v37 = vsub.f32 %v854_v24, %v8429_v43  ;;  %6732 = vmatpush3.msra.mxu1 %v8211_v23  ;;  %6681 = vmatprep.subr.mxu0 %v8184_v11  ;;  %v1000_v7 = vsub.f32 %v8419_v35, %v999_v32  ;;  %v1029_v26 = vand.u32 4294901760, %v8445_v5 }
 0x121   :  { %6733 = vmatprep.subr.mxu1 %v8219_v28  ;;  %6682 = vmatpush3.msra.mxu0 %v8184_v11  ;;  %v1010_v11 = vsub.f32 %v8416_v9, %v1009_v54 }
 0x122   :  { %6734 = vmatpush3.msra.mxu1 %v8219_v28  ;;  %6626 = vmatprep.mubr.f32.mxu0 %v981_v48  ;;  %v1019_v18 = vand.u32 4294901760, %v8439_v37  ;;  %v1001_v25 = vand.u32 4294901760, %v1000_v7 }
 0x123   :  { %6676 = vmatprep.mubr.f32.mxu1 %v8429_v43  ;;  %6683 = vmatprep.subr.mxu0 %v8196_v16  ;;  %v1011_v14 = vand.u32 4294901760, %v1010_v11 }
 0x124   :  { %6735 = vmatprep.subr.mxu1 %v8230_v34  ;;  %6627 = vmatmul.mubr.f32.gmra.mxu0 %v991_v59  ;;  %v1020_v27 = vsub.f32 %v8439_v37, %v1019_v18 }
 0x125   :  { %6677 = vmatmul.mubr.f32.gmra.mxu1 %v8423_v55  ;;  %6684 = vmatpush3.msra.mxu0 %v8196_v16  ;;  %v1030_v16 = vsub.f32 %v8445_v5, %v1029_v26 }
 0x126   :  { %6736 = vmatpush3.msra.mxu1 %v8230_v34  ;;  %6685 = vmatprep.subr.mxu0 %v8208_v22  ;;  %v1021_v15 = vand.u32 4294901760, %v1020_v27 }
 0x127   :  { %6737 = vmatprep.subr.mxu1 %v8243_v40  ;;  %6755 = vmatprep.mubr.f32.mxu1 %v959_v36  ;;  %v10836_v36 = vld [vmem:[#allocation32_spill] sm:$0xff] }
 0x128   :  { %6686 = vmatpush3.msra.mxu0 %v8208_v22  ;;  %6738 = vmatpush3.msra.mxu1 %v8243_v40  ;;  %v1031_v22 = vand.u32 4294901760, %v1030_v16 }
 0x129   :  { %6629 = vmatprep.mubr.f32.mxu0 %v1001_v25  ;;  %6687 = vmatprep.subr.mxu0 %v8222_v29  ;;  %v1836_v25 = vld [vmem:[#allocation2 + $0xc8] sm:$0xff] }
 0x12a   :  { %6739 = vmatprep.subr.mxu1 %v8257_v46  ;;  %6630 = vmatmul.mubr.f32.gmra.mxu0 %v1011_v14  ;;  %v8675_v16 = vand.u32 4294901760, %v1836_v25 }
 0x12b   :  { %6688 = vmatpush3.msra.mxu0 %v8222_v29  ;;  %6740 = vmatpush3.msra.mxu1 %v8257_v46  ;;  %v10829_v29 = vld [vmem:[#allocation15_spill] sm:$0xff] }
 0x12c   :  { %6689 = vmatprep.subr.mxu0 %v8228_v33  ;;  %6741 = vmatprep.subr.mxu1 %v8270_v53 }
 0x12d   :  { %6690 = vmatpush3.msra.mxu0 %v8228_v33  ;;  %6742 = vmatpush3.msra.mxu1 %v8270_v53  ;;  %v10831_v33 = vld [vmem:[#allocation17_spill] sm:$0xff] }
 0x12e   :  { %6632 = vmatprep.mubr.f32.mxu0 %v1021_v15  ;;  %6691 = vmatprep.subr.mxu0 %v8241_v39 }
 0x12f   :  { %6743 = vmatprep.subr.mxu1 %v10828_v19  ;;  %6633 = vmatmul.mubr.f32.gmra.mxu0 %v1031_v22  ;;  %v1835_v22 = vld [vmem:[#allocation2 + $0xc0] sm:$0xff] }
 0x130   :  { %6692 = vmatpush3.msra.mxu0 %v8241_v39  ;;  %6744 = vmatpush3.msra.mxu1 %v10828_v19  ;;  %v10833_v39 = vld [vmem:[#allocation20_spill] sm:$0xff] }
 0x131   :  { %6693 = vmatprep.subr.mxu0 %v10829_v29  ;;  %6711 = vmatprep.mubr.f32.mxu0 %v8383_v31  ;;  %v10835_v31 = vld [vmem:[#allocation21_spill] sm:$0xff] }
 0x132   :  { %6745 = vmatprep.subr.mxu1 %v10830_v47  ;;  %6694 = vmatpush3.msra.mxu0 %v10829_v29 }
 0x133   :  { %6746 = vmatpush3.msra.mxu1 %v10830_v47  ;;  %6695 = vmatprep.subr.mxu0 %v10831_v33 }
 0x134   :  { %6747 = vmatprep.subr.mxu1 %v10832_v10  ;;  %6696 = vmatpush3.msra.mxu0 %v10831_v33  ;;  %v8688_v33 = vand.u32 4294901760, %v1835_v22 }
 0x135   :  { %6748 = vmatpush3.msra.mxu1 %v10832_v10  ;;  %6697 = vmatprep.subr.mxu0 %v10833_v39 }
 0x136   :  { %6749 = vmatprep.subr.mxu1 %v10834_v1  ;;  %6698 = vmatpush3.msra.mxu0 %v10833_v39  ;;  %v1834_v39 = vld [vmem:[#allocation2 + $0xb8] sm:$0xff] }
 0x137   :  { %6750 = vmatpush3.msra.mxu1 %v10834_v1  ;;  %6699 = vmatprep.subr.mxu0 %v10835_v31 }
 0x138   :  { %6751 = vmatprep.subr.mxu1 %v10836_v36  ;;  %6700 = vmatpush3.msra.mxu0 %v10835_v31 }
 0x139   :  { %6752 = vmatpush3.msra.mxu1 %v10836_v36  ;;  %6701 = vmatprep.subr.mxu0 %v10837_v44 }
 0x13a   :  { %6753 = vmatprep.subr.mxu1 %v10838_v42  ;;  %6702 = vmatpush3.msra.mxu0 %v10837_v44  ;;  %v8702_v44 = vand.u32 4294901760, %v1834_v39 }
 0x13b   :  { %6754 = vmatpush3.msra.mxu1 %v10838_v42  ;;  %6703 = vmatprep.subr.mxu0 %v10839_v60 }
 0x13c   :  { %6756 = vmatmul.mubr.f32.vlgmr.msra.gmra.mxu1 %v969_v2  ;;  %6811 = vmatprep.subr.mxu1 %v8171_v4  ;;  %v10854_v2 = vld [vmem:[#allocation27_spill] sm:$0xff]  ;;  %10870 = vst [vmem:[#allocation28_spill] sm:$0xff] %v8702_v44 }
 0x13d   :  { %6704 = vmatpush3.msra.mxu0 %v10839_v60  ;;  %6758 = vmatprep.mubr.f32.mxu1 %v979_v63  ;;  %v1833_v60 = vld [vmem:[#allocation2 + $0xb0] sm:$0xff] }
 0x13e   :  { %6812 = vmatpush3.msra.mxu1 %v8171_v4  ;;  %6705 = vmatprep.subr.mxu0 %v10840_v20  ;;  %v10842_v4 = vld [vmem:[#allocation37_spill] sm:$0xff] }
 0x13f   :  { %6813 = vmatprep.subr.mxu1 %v8176_v8  ;;  %6706 = vmatpush3.msra.mxu0 %v10840_v20 }
 0x140   :  { %6814 = vmatpush3.msra.mxu1 %v8176_v8  ;;  %6707 = vmatprep.subr.mxu0 %v10841_v6  ;;  %v10843_v8 = vld [vmem:[#allocation8_spill] sm:$0xff] }
 0x141   :  { %6759 = vmatmul.mubr.f32.gmra.mxu1 %v989_v38  ;;  %6815 = vmatprep.subr.mxu1 %v8186_v12  ;;  %v1841_v38 = vld [vmem:[#allocation2 + $0xf0] sm:$0xff] }
 0x142   :  { %6708 = vmatpush3.msra.mxu0 %v10841_v6  ;;  %6761 = vmatprep.mubr.f32.mxu1 %v999_v32  ;;  %v8621_v52 = vand.u32 4294901760, %v1841_v38 }
 0x143   :  { %6816 = vmatpush3.msra.mxu1 %v8186_v12  ;;  %6709 = vmatprep.subr.mxu0 %v10842_v4  ;;  %v10844_v12 = vld [vmem:[#allocation9_spill] sm:$0xff] }
 0x144   :  { %6817 = vmatprep.subr.mxu1 %v8198_v17  ;;  %6710 = vmatpush3.msra.mxu0 %v10842_v4 }
 0x145   :  { %6818 = vmatpush3.msra.mxu1 %v8198_v17  ;;  %6712 = vmatmul.mubr.f32.vlgmr.msra.gmra.mxu0 %v8377_v56  ;;  %v10845_v17 = vld [vmem:[#allocation10_spill] sm:$0xff]  ;;  %v10852_v56 = vld [vmem:[#allocation23_spill] sm:$0xff] }
 0x146   :  { %6762 = vmatmul.mubr.f32.gmra.mxu1 %v1009_v54  ;;  %6767 = vmatprep.subr.mxu0 %v10843_v8  ;;  %v1837_v54 = vld [vmem:[#allocation2 + $0xd0] sm:$0xff] }
 0x147   :  { %6819 = vmatprep.subr.mxu1 %v8211_v23  ;;  %6714 = vmatprep.mubr.f32.mxu0 %v8402_v49  ;;  %v10856_v49 = vld [vmem:[#allocation33_spill] sm:$0xff] }
 0x148   :  { %6764 = vmatprep.mubr.f32.mxu1 %v1019_v18  ;;  %6768 = vmatpush3.msra.mxu0 %v10843_v8  ;;  %v8664_v18 = vand.u32 4294901760, %v1837_v54  ;;  %v8712_v8 = vsub.f32 %v1834_v39, %v8702_v44 }
 0x149   :  { %6820 = vmatpush3.msra.mxu1 %v8211_v23  ;;  %6769 = vmatprep.subr.mxu0 %v10844_v12  ;;  %v10846_v23 = vld [vmem:[#allocation11_spill] sm:$0xff] }
 0x14a   :  { %6821 = vmatprep.subr.mxu1 %v8219_v28  ;;  %6770 = vmatpush3.msra.mxu0 %v10844_v12  ;;  %v8673_v14 = vsub.f32 %v1837_v54, %v8664_v18  ;;  %10872 = vst [vmem:[#allocation34_spill] sm:$0xff] %v8712_v8  ;;  %v8715_v12 = vand.u32 4294901760, %v1833_v60 }
 0x14b   :  { %6822 = vmatpush3.msra.mxu1 %v8219_v28  ;;  %6715 = vmatmul.mubr.f32.gmra.mxu0 %v8390_v30  ;;  %v10847_v28 = vld [vmem:[#allocation12_spill] sm:$0xff]  ;;  %v10855_v30 = vld [vmem:[#allocation30_spill] sm:$0xff] }
 0x14c   :  { %6765 = vmatmul.mubr.f32.gmra.mxu1 %v1029_v26  ;;  %6771 = vmatprep.subr.mxu0 %v10845_v17  ;;  %10864 = vst [vmem:[#allocation20_spill] sm:$0xff] %v8673_v14  ;;  %v8683_v29 = vand.u32 4294901760, %v8673_v14  ;;  %10873 = vst [vmem:[#allocation37_spill] sm:$0xff] %v8715_v12 }
 0x14d   :  { %6823 = vmatprep.subr.mxu1 %v8230_v34  ;;  %6717 = vmatprep.mubr.f32.mxu0 %v8419_v35 }
 0x14e   :  { %6772 = vmatpush3.msra.mxu0 %v10845_v17  ;;  %6824 = vmatpush3.msra.mxu1 %v8230_v34  ;;  %v10848_v34 = vld [vmem:[#allocation13_spill] sm:$0xff]  ;;  %10866 = vst [vmem:[#allocation21_spill] sm:$0xff] %v8683_v29 }
 0x14f   :  { %6843 = vmatprep.mubr.f32.mxu1 %v8379_v21  ;;  %6773 = vmatprep.subr.mxu0 %v10846_v23  ;;  %v1832_v17 = vld [vmem:[#allocation2 + $0xa8] sm:$0xff] }
 0x150   :  { %6825 = vmatprep.subr.mxu1 %v8243_v40  ;;  %6774 = vmatpush3.msra.mxu0 %v10846_v23 }
 0x151   :  { %6826 = vmatpush3.msra.mxu1 %v8243_v40  ;;  %6718 = vmatmul.mubr.f32.gmra.mxu0 %v8416_v9  ;;  %v10849_v40 = vld [vmem:[#allocation14_spill] sm:$0xff] }
 0x152   :  { %6775 = vmatprep.subr.mxu0 %v10847_v28  ;;  %6827 = vmatprep.subr.mxu1 %v8257_v46 }
 0x153   :  { %6720 = vmatprep.mubr.f32.mxu0 %v8439_v37  ;;  %6776 = vmatpush3.msra.mxu0 %v10847_v28  ;;  %v8656_v37 = vand.u32 4294901760, %v1838_v45 }
 0x154   :  { %6828 = vmatpush3.msra.mxu1 %v8257_v46  ;;  %6777 = vmatprep.subr.mxu0 %v10848_v34  ;;  %v10850_v46 = vld [vmem:[#allocation16_spill] sm:$0xff] }
 0x155   :  { %6829 = vmatprep.subr.mxu1 %v8270_v53  ;;  %6778 = vmatpush3.msra.mxu0 %v10848_v34  ;;  %v8667_v11 = vsub.f32 %v1838_v45, %v8656_v37  ;;  %v8721_v34 = vand.u32 4294901760, %v8712_v8 }
 0x156   :  { %6830 = vmatpush3.msra.mxu1 %v8270_v53  ;;  %6721 = vmatmul.mubr.f32.gmra.mxu0 %v8445_v5  ;;  %v10851_v53 = vld [vmem:[#allocation18_spill] sm:$0xff] }
 0x157   :  { %6779 = vmatprep.subr.mxu0 %v10849_v40  ;;  %6831 = vmatprep.subr.mxu1 %v10828_v19  ;;  %10863 = vst [vmem:[#allocation26_spill] sm:$0xff] %v8667_v11  ;;  %v8679_v15 = vand.u32 4294901760, %v8667_v11  ;;  %10874 = vst [vmem:[#allocation8_spill] sm:$0xff] %v8721_v34 }
 0x158   :  { %6780 = vmatpush3.msra.mxu0 %v10849_v40  ;;  %6799 = vmatprep.mubr.f32.mxu0 %v8379_v21  ;;  %v10853_v21 = vld [vmem:[#allocation24_spill] sm:$0xff]  ;;  %v8723_v40 = vand.u32 4294901760, %v1832_v17 }
 0x159   :  { %6832 = vmatpush3.msra.mxu1 %v10828_v19  ;;  %6781 = vmatprep.subr.mxu0 %v10850_v46  ;;  %10865 = vst [vmem:[#allocation29_spill] sm:$0xff] %v8679_v15 }
 0x15a   :  { %6833 = vmatprep.subr.mxu1 %v10830_v47  ;;  %6782 = vmatpush3.msra.mxu0 %v10850_v46  ;;  %10875 = vst [vmem:[#allocation9_spill] sm:$0xff] %v8723_v40  ;;  %v8727_v46 = vsub.f32 %v1833_v60, %v8715_v12 }
 0x15b   :  { %6834 = vmatpush3.msra.mxu1 %v10830_v47  ;;  %6783 = vmatprep.subr.mxu0 %v10851_v53  ;;  %v8686_v47 = vsub.f32 %v1836_v25, %v8675_v16 }
 0x15c   :  { %6835 = vmatprep.subr.mxu1 %v10832_v10  ;;  %6784 = vmatpush3.msra.mxu0 %v10851_v53  ;;  %10876 = vst [vmem:[#allocation10_spill] sm:$0xff] %v8727_v46  ;;  %v1831_v53 = vld [vmem:[#allocation2 + $0xa0] sm:$0xff] }
 0x15d   :  { %6836 = vmatpush3.msra.mxu1 %v10832_v10  ;;  %6785 = vmatprep.subr.mxu0 %v10852_v56  ;;  %10867 = vst [vmem:[#allocation32_spill] sm:$0xff] %v8686_v47  ;;  %v2040_v10 = vsub.f32 %v8667_v11, %v8679_v15  ;;  %v8697_v31 = vand.u32 4294901760, %v8686_v47 }
 0x15e   :  { %6837 = vmatprep.subr.mxu1 %v10834_v1  ;;  %6786 = vmatpush3.msra.mxu0 %v10852_v56 }
 0x15f   :  { %6838 = vmatpush3.msra.mxu1 %v10834_v1  ;;  %6787 = vmatprep.subr.mxu0 %v10853_v21  ;;  %v2047_v1 = vsub.f32 %v8673_v14, %v8683_v29  ;;  %10868 = vst [vmem:[#allocation25_spill] sm:$0xff] %v8697_v31  ;;  %v2054_v6 = vsub.f32 %v8686_v47, %v8697_v31 }
 0x160   :  { %6839 = vmatprep.subr.mxu1 %v10836_v36  ;;  %6788 = vmatpush3.msra.mxu0 %v10853_v21  ;;  %v2068_v21 = vsub.f32 %v8712_v8, %v8721_v34 }
 0x161   :  { %6840 = vmatpush3.msra.mxu1 %v10836_v36  ;;  %6789 = vmatprep.subr.mxu0 %v10854_v2  ;;  %v8700_v36 = vsub.f32 %v1835_v22, %v8688_v33  ;;  %v2048_v20 = vand.u32 4294901760, %v2047_v1  ;;  %v2055_v23 = vand.u32 4294901760, %v2054_v6 }
 0x162   :  { %6841 = vmatprep.subr.mxu1 %v10838_v42  ;;  %6790 = vmatpush3.msra.mxu0 %v10854_v2  ;;  %v8733_v2 = vsub.f32 %v1832_v17, %v8723_v40 }
 0x163   :  { %6842 = vmatpush3.msra.mxu1 %v10838_v42  ;;  %6791 = vmatprep.subr.mxu0 %v10855_v30  ;;  %10869 = vst [vmem:[#allocation35_spill] sm:$0xff] %v8700_v36  ;;  %v2041_v42 = vand.u32 4294901760, %v2040_v10  ;;  %v8709_v4 = vand.u32 4294901760, %v8700_v36  ;;  %v1827_v10 = vld [vmem:[#allocation2 + $0x80] sm:$0xff] }
 0x164   :  { %6844 = vmatmul.mubr.f32.vlgmr.msra.gmra.mxu1 %v8374_v3  ;;  %6792 = vmatpush3.msra.mxu0 %v10855_v30  ;;  %10877 = vst [vmem:[#allocation11_spill] sm:$0xff] %v8733_v2  ;;  %v8735_v30 = vand.u32 4294901760, %v1831_v53  ;;  %v8783_v60 = vand.u32 4294901760, %v1827_v10 }
 0x165   :  { %6846 = vmatprep.mubr.f32.mxu1 %v8393_v41  ;;  %6793 = vmatprep.subr.mxu0 %v10856_v49  ;;  %10871 = vst [vmem:[#allocation31_spill] sm:$0xff] %v8709_v4  ;;  %v2061_v28 = vsub.f32 %v8700_v36, %v8709_v4  ;;  %v10895_v4 = vld [vmem:[#allocation39_spill] sm:$0xff] }
 0x166   :  { %6794 = vmatpush3.msra.mxu0 %v10856_v49  ;;  %10878 = vst [vmem:[#allocation12_spill] sm:$0xff] %v8735_v30  ;;  %v8739_v49 = vand.u32 4294901760, %v8727_v46  ;;  %10890 = vst [vmem:[#allocation41_spill] sm:$0xff] %v8783_v60  ;;  %v874_v31 = vsub.s32 1, %v10895_v4 }
 0x167   :  { %6795 = vmatprep.subr.mxu0 %v10857_v62  ;;  %v2062_v56 = vand.u32 4294901760, %v2061_v28 }
 0x168   :  { %6847 = vmatmul.mubr.f32.gmra.mxu1 %v8385_v13  ;;  %6796 = vmatpush3.msra.mxu0 %v10857_v62  ;;  %10879 = vst [vmem:[#allocation13_spill] sm:$0xff] %v8739_v49  ;;  %v1830_v62 = vld [vmem:[#allocation2 + $0x98] sm:$0xff] }
 0x169   :  { %6849 = vmatprep.mubr.f32.mxu1 %v8409_v50  ;;  %6797 = vmatprep.subr.mxu0 %v10858_v61 }
 0x16a   :  { %6798 = vmatpush3.msra.mxu0 %v10858_v61  ;;  %v2069_v61 = vand.u32 4294901760, %v2068_v21 }
 0x16b   :  { %6800 = vmatmul.mubr.f32.vlgmr.msra.gmra.mxu0 %v8374_v3  ;;  %v8616_v3 = vand.u32 4294901760, %v1842_v51 }
 0x16c   :  { %6850 = vmatmul.mubr.f32.gmra.mxu1 %v8404_v57  ;;  %6802 = vmatprep.mubr.f32.mxu0 %v8393_v41 }
 0x16d   :  { %6852 = vmatprep.mubr.f32.mxu1 %v8429_v43  ;;  %v8619_v41 = vsub.f32 %v1842_v51, %v8616_v3  ;;  %6855 = vmatprep.subr.mxu0 %v8616_v3  ;;  %v8743_v51 = vand.u32 4294901760, %v8733_v2 }
 0x16e   :  { %6856 = vmatpush3.msra.mxu0 %v8616_v3 }
 0x16f   :  { %6803 = vmatmul.mubr.f32.gmra.mxu0 %v8385_v13  ;;  %v1840_v13 = vld [vmem:[#allocation2 + $0xe8] sm:$0xff]  ;;  %6857 = vmatprep.subr.mxu0 %v8621_v52  ;;  %10880 = vst [vmem:[#allocation14_spill] sm:$0xff] %v8743_v51  ;;  %v2082_v45 = vsub.f32 %v8733_v2, %v8743_v51 }
 0x170   :  { %6853 = vmatmul.mubr.f32.gmra.mxu1 %v8423_v55  ;;  %6805 = vmatprep.mubr.f32.mxu0 %v8409_v50  ;;  %v8629_v50 = vsub.f32 %v1841_v38, %v8621_v52  ;;  %v8631_v63 = vand.u32 4294901760, %v1840_v13  ;;  %v8746_v38 = vsub.f32 %v1831_v53, %v8735_v30 }
 0x171   :  { %6858 = vmatpush3.msra.mxu0 %v8621_v52  ;;  %v2083_v25 = vand.u32 4294901760, %v2082_v45 }
 0x172   :  { %v8638_v35 = vand.u32 4294901760, %v8629_v50  ;;  %v8641_v24 = vsub.f32 %v1840_v13, %v8631_v63  ;;  %6859 = vmatprep.subr.mxu0 %v8631_v63  ;;  %10881 = vst [vmem:[#allocation16_spill] sm:$0xff] %v8746_v38  ;;  %v8748_v13 = vand.u32 4294901760, %v1830_v62 }
 0x173   :  { %6806 = vmatmul.mubr.f32.gmra.mxu0 %v8404_v57  ;;  %v8626_v57 = vand.u32 4294901760, %v8619_v41 }
 0x174   :  { %6808 = vmatprep.mubr.f32.mxu0 %v8429_v43  ;;  %10860 = vst [vmem:[#allocation15_spill] sm:$0xff] %v8638_v35  ;;  %6860 = vmatpush3.msra.mxu0 %v8631_v63  ;;  %v2019_v58 = vsub.f32 %v8629_v50, %v8638_v35  ;;  %v8650_v32 = vand.u32 4294901760, %v8641_v24  ;;  %10882 = vst [vmem:[#allocation18_spill] sm:$0xff] %v8748_v13 }
 0x175   :  { %10859 = vst [vmem:[#allocation19_spill] sm:$0xff] %v8626_v57  ;;  %v2012_v9 = vsub.f32 %v8619_v41, %v8626_v57 }
 0x176   :  { %10861 = vst [vmem:[#allocation22_spill] sm:$0xff] %v8650_v32  ;;  %v2020_v5 = vand.u32 4294901760, %v2019_v58  ;;  %v2026_v7 = vsub.f32 %v8641_v24, %v8650_v32  ;;  %v8760_v58 = vsub.f32 %v1830_v62, %v8748_v13 }
 0x177   :  { %6809 = vmatmul.mubr.f32.gmra.mxu0 %v8423_v55  ;;  %v8643_v55 = vand.u32 4294901760, %v1839_v0  ;;  %v2013_v43 = vand.u32 4294901760, %v2012_v9  ;;  %v1829_v9 = vld [vmem:[#allocation2 + $0x90] sm:$0xff] }
 0x178   :  { %v2027_v26 = vand.u32 4294901760, %v2026_v7  ;;  %10884 = vst [vmem:[#allocation24_spill] sm:$0xff] %v8760_v58  ;;  %v8762_v54 = vand.u32 4294901760, %v1829_v9  ;;  %v1828_v7 = vld [vmem:[#allocation2 + $0x88] sm:$0xff] }
 0x179   :  { %v8653_v48 = vsub.f32 %v1839_v0, %v8643_v55  ;;  %6861 = vmatprep.subr.mxu0 %v8643_v55  ;;  %6899 = vmatprep.subr.mxu1 %v2013_v43  ;;  %v2075_v0 = vsub.f32 %v8727_v46, %v8739_v49 }
 0x17a   :  { %6862 = vmatpush3.msra.mxu0 %v8643_v55  ;;  %6900 = vmatpush3.msra.mxu1 %v2013_v43  ;;  %v8757_v43 = vand.u32 4294901760, %v8746_v38  ;;  %10885 = vst [vmem:[#allocation27_spill] sm:$0xff] %v8762_v54  ;;  %v8772_v22 = vsub.f32 %v1829_v9, %v8762_v54 }
 0x17b   :  { %v8662_v59 = vand.u32 4294901760, %v8653_v48  ;;  %6863 = vmatprep.subr.mxu0 %v8656_v37  ;;  %6901 = vmatprep.subr.mxu1 %v2020_v5 }
 0x17c   :  { %6864 = vmatpush3.msra.mxu0 %v8656_v37  ;;  %6902 = vmatpush3.msra.mxu1 %v2020_v5  ;;  %10883 = vst [vmem:[#allocation23_spill] sm:$0xff] %v8757_v43  ;;  %v2076_v5 = vand.u32 4294901760, %v2075_v0  ;;  %10887 = vst [vmem:[#allocation33_spill] sm:$0xff] %v8772_v22 }
 0x17d   :  { %10862 = vst [vmem:[#allocation17_spill] sm:$0xff] %v8662_v59  ;;  %v2033_v27 = vsub.f32 %v8653_v48, %v8662_v59  ;;  %6865 = vmatprep.subr.mxu0 %v8664_v18  ;;  %6903 = vmatprep.subr.mxu1 %v2027_v26  ;;  %v10896_v59 = vld [vmem:[#allocation40_spill] sm:$0xff] }
 0x17e   :  { %6866 = vmatpush3.msra.mxu0 %v8664_v18  ;;  %6904 = vmatpush3.msra.mxu1 %v2027_v26  ;;  %v2089_v26 = vsub.f32 %v8746_v38, %v8757_v43  ;;  %v875_v32 = vrot.slane %v10896_v59, %v874_v31 }
 0x17f   :  { %v2034_v19 = vand.u32 4294901760, %v2033_v27  ;;  %6867 = vmatprep.subr.mxu0 %v8675_v16  ;;  %v8769_v27 = vand.u32 4294901760, %v8760_v58 }
 0x180   :  { %6868 = vmatpush3.msra.mxu0 %v8675_v16  ;;  %v2090_v39 = vand.u32 4294901760, %v2089_v26 }
 0x181   :  { %6905 = vmatprep.subr.mxu1 %v2034_v19  ;;  %6869 = vmatprep.subr.mxu0 %v8688_v33  ;;  %10886 = vst [vmem:[#allocation30_spill] sm:$0xff] %v8769_v27  ;;  %v2096_v1 = vsub.f32 %v8760_v58, %v8769_v27 }
 0x182   :  { %6906 = vmatpush3.msra.mxu1 %v2034_v19  ;;  %6870 = vmatpush3.msra.mxu0 %v8688_v33  ;;  %v8775_v19 = vand.u32 4294901760, %v1828_v7 }
 0x183   :  { %6907 = vmatprep.subr.mxu1 %v2041_v42  ;;  %6871 = vmatprep.subr.mxu0 %v8702_v44  ;;  %v2097_v6 = vand.u32 4294901760, %v2096_v1 }
 0x184   :  { %6908 = vmatpush3.msra.mxu1 %v2041_v42  ;;  %6872 = vmatpush3.msra.mxu0 %v8702_v44  ;;  %10888 = vst [vmem:[#allocation36_spill] sm:$0xff] %v8775_v19  ;;  %v8781_v42 = vand.u32 4294901760, %v8772_v22 }
 0x185   :  { %6909 = vmatprep.subr.mxu1 %v2048_v20  ;;  %6873 = vmatprep.subr.mxu0 %v8715_v12 }
 0x186   :  { %6910 = vmatpush3.msra.mxu1 %v2048_v20  ;;  %6874 = vmatpush3.msra.mxu0 %v8715_v12  ;;  %10889 = vst [vmem:[#allocation38_spill] sm:$0xff] %v8781_v42  ;;  %v8787_v20 = vsub.f32 %v1828_v7, %v8775_v19  ;;  %v2103_v17 = vsub.f32 %v8772_v22, %v8781_v42 }
 0x187   :  { %6911 = vmatprep.subr.mxu1 %v2055_v23  ;;  %6875 = vmatprep.subr.mxu0 %v8723_v40 }
 0x188   :  { %6912 = vmatpush3.msra.mxu1 %v2055_v23  ;;  %6876 = vmatpush3.msra.mxu0 %v8723_v40  ;;  %10891 = vst [vmem:[#allocation42_spill] sm:$0xff] %v8787_v20  ;;  %v8793_v23 = vsub.f32 %v1827_v10, %v8783_v60  ;;  %v8797_v28 = vand.u32 4294901760, %v8787_v20  ;;  %v2104_v53 = vand.u32 4294901760, %v2103_v17 }
 0x189   :  { %6913 = vmatprep.subr.mxu1 %v2062_v56  ;;  %6877 = vmatprep.subr.mxu0 %v8735_v30 }
 0x18a   :  { %6914 = vmatpush3.msra.mxu1 %v2062_v56  ;;  %6878 = vmatpush3.msra.mxu0 %v8735_v30  ;;  %10892 = vst [vmem:[#allocation43_spill] sm:$0xff] %v8793_v23  ;;  %10893 = vst [vmem:[#allocation44_spill] sm:$0xff] %v8797_v28  ;;  %v8801_v56 = vand.u32 4294901760, %v8793_v23  ;;  %v2110_v21 = vsub.f32 %v8787_v20, %v8797_v28 }
 0x18b   :  { %6915 = vmatprep.subr.mxu1 %v2069_v61  ;;  %6879 = vmatprep.subr.mxu0 %v8748_v13 }
 0x18c   :  { %6916 = vmatpush3.msra.mxu1 %v2069_v61  ;;  %6880 = vmatpush3.msra.mxu0 %v8748_v13  ;;  %10894 = vst [vmem:[#allocation45_spill] sm:$0xff] %v8801_v56  ;;  %v2117_v62 = vsub.f32 %v8793_v23, %v8801_v56  ;;  %v2111_v61 = vand.u32 4294901760, %v2110_v21 }
 0x18d   :  { %6917 = vmatprep.subr.mxu1 %v2076_v5  ;;  %6881 = vmatprep.subr.mxu0 %v8762_v54 }
 0x18e   :  { %6918 = vmatpush3.msra.mxu1 %v2076_v5  ;;  %6882 = vmatpush3.msra.mxu0 %v8762_v54  ;;  %v2118_v0 = vand.u32 4294901760, %v2117_v62 }
 0x18f   :  { %6919 = vmatprep.subr.mxu1 %v2083_v25  ;;  %6883 = vmatprep.subr.mxu0 %v8775_v19 }
 0x190   :  { %6920 = vmatpush3.msra.mxu1 %v2083_v25  ;;  %6884 = vmatpush3.msra.mxu0 %v8775_v19 }
 0x191   :  { %6921 = vmatprep.subr.mxu1 %v2090_v39  ;;  %6885 = vmatprep.subr.mxu0 %v8783_v60 }
 0x192   :  { %6922 = vmatpush3.msra.mxu1 %v2090_v39  ;;  %6886 = vmatpush3.msra.mxu0 %v8783_v60 }
 0x193   :  { %6923 = vmatprep.subr.mxu1 %v2097_v6  ;;  %6943 = vmatprep.subr.mxu0 %v8619_v41 }
 0x194   :  { %6924 = vmatpush3.msra.mxu1 %v2097_v6 }
 0x195   :  { %6925 = vmatprep.subr.mxu1 %v2104_v53 }
 0x196   :  { %6926 = vmatpush3.msra.mxu1 %v2104_v53 }
 0x197   :  { %6927 = vmatprep.subr.mxu1 %v2111_v61 }
 0x198   :  { %6928 = vmatpush3.msra.mxu1 %v2111_v61 }
 0x199   :  { %6929 = vmatprep.subr.mxu1 %v2118_v0 }
 0x19a   :  { %6930 = vmatpush3.msra.mxu1 %v2118_v0 }
 0x19b   :  { %6987 = vmatprep.subr.mxu1 %v8616_v3 }
 0x1d5   :  { %v6669_v9 = vpop.f32.mrf.mxu1 }
 0x1d7   :  { %v1184_v45 = vpop.f32.mrf.mxu1 }
 0x1da   :  { %v6672_v7 = vpop.f32.mrf.mxu1 }
 0x1dc   :  { %v1196_v26 = vpop.f32.mrf.mxu1 }
 0x1de   :  { %v6625_v5 = vpop.f32.mrf.mxu0 }
 0x1df   :  { %v6675_v39 = vpop.f32.mrf.mxu1  ;;  %v974_v23 = vadd.f32 %v6625_v5, %v875_v32 }
 0x1e0   :  { %v963_v25 = vpop.f32.mrf.mxu0 }
 0x1e1   :  { %v1208_v6 = vpop.f32.mrf.mxu1  ;;  %v964_v22 = vadd.f32 %v963_v25, %v875_v32  ;;  %v1191_v38 = vadd.f32 %v6669_v9, %v974_v23 }
 0x1e3   :  { %v1185_v13 = vadd.f32 %v1184_v45, %v964_v22 }
 0x1e4   :  { %v6628_v10 = vpop.f32.mrf.mxu0 }
 0x1e5   :  { %v6678_v21 = vpop.f32.mrf.mxu1  ;;  %v994_v60 = vadd.f32 %v6628_v10, %v875_v32 }
 0x1e6   :  { %v983_v1 = vpop.f32.mrf.mxu0 }
 0x1e7   :  { %v1220_v62 = vpop.f32.mrf.mxu1  ;;  %v984_v54 = vadd.f32 %v983_v1, %v875_v32  ;;  %v1203_v30 = vadd.f32 %v6672_v7, %v994_v60 }
 0x1e9   :  { %v1197_v47 = vadd.f32 %v1196_v26, %v984_v54 }
 0x1ea   :  { %v6631_v17 = vpop.f32.mrf.mxu0 }
 0x1eb   :  { %v1014_v40 = vadd.f32 %v6631_v17, %v875_v32 }
 0x1ec   :  { %v1003_v53 = vpop.f32.mrf.mxu0 }
 0x1ed   :  { %v1004_v12 = vadd.f32 %v1003_v53, %v875_v32  ;;  %v1215_v1 = vadd.f32 %v6675_v39, %v1014_v40 }
 0x1ef   :  { %v6634_v61 = vpop.f32.mrf.mxu0  ;;  %v1209_v60 = vadd.f32 %v1208_v6, %v1004_v12 }
 0x1f0   :  { %v1034_v25 = vadd.f32 %v6634_v61, %v875_v32 }
 0x1f1   :  { %v1023_v0 = vpop.f32.mrf.mxu0 }
 0x1f2   :  { %v1024_v11 = vadd.f32 %v1023_v0, %v875_v32  ;;  %v1227_v45 = vadd.f32 %v6678_v21, %v1034_v25 }
 0x1fc   :  { %v6757_v56 = vpop.f32.mrf.mxu1 }
 0x1fe   :  { %v1468_v28 = vpop.f32.mrf.mxu1 }
 0x201   :  { %v6760_v27 = vpop.f32.mrf.mxu1 }
 0x203   :  { %v1484_v51 = vpop.f32.mrf.mxu1 }
 0x205   :  { %v6713_v42 = vpop.f32.mrf.mxu0 }
 0x206   :  { %v6763_v34 = vpop.f32.mrf.mxu1  ;;  %v1338_v46 = vadd.f32 %v6713_v42, %v1191_v38 }
 0x207   :  { %v1330_v43 = vpop.f32.mrf.mxu0 }
 0x208   :  { %v8811_v15 = vpop.f32.mrf.mxu1  ;;  %v1331_v8 = vadd.f32 %v1330_v43, %v1185_v13  ;;  %v1477_v5 = vadd.f32 %v6757_v56, %v1338_v46 }
 0x20a   :  { %v1469_v9 = vadd.f32 %v1468_v28, %v1331_v8 }
 0x20b   :  { %v6716_v49 = vpop.f32.mrf.mxu0 }
 0x20c   :  { %v6766_v57 = vpop.f32.mrf.mxu1  ;;  %v1352_v31 = vadd.f32 %v6716_v49, %v1203_v30 }
 0x20d   :  { %v1344_v29 = vpop.f32.mrf.mxu0 }
 0x20e   :  { %v8814_v58 = vpop.f32.mrf.mxu1  ;;  %v1345_v10 = vadd.f32 %v1344_v29, %v1197_v47  ;;  %v1493_v13 = vadd.f32 %v6760_v27, %v1352_v31  ;;  %v1221_v29 = vadd.f32 %v1220_v62, %v1024_v11 }
 0x210   :  { %v1485_v56 = vadd.f32 %v1484_v51, %v1345_v10 }
 0x211   :  { %v6719_v35 = vpop.f32.mrf.mxu0 }
 0x212   :  { %v1366_v43 = vadd.f32 %v6719_v35, %v1215_v1 }
 0x213   :  { %v1358_v20 = vpop.f32.mrf.mxu0 }
 0x214   :  { %v1359_v26 = vadd.f32 %v1358_v20, %v1209_v60  ;;  %v1509_v35 = vadd.f32 %v6763_v34, %v1366_v43 }
 0x216   :  { %v6722_v2 = vpop.f32.mrf.mxu0  ;;  %v1501_v11 = vadd.f32 %v8811_v15, %v1359_v26 }
 0x217   :  { %v1380_v17 = vadd.f32 %v6722_v2, %v1227_v45 }
 0x218   :  { %v1372_v59 = vpop.f32.mrf.mxu0 }
 0x219   :  { %v1525_v6 = vadd.f32 %v6766_v57, %v1380_v17 }
 0x224   :  { %v6845_v19 = vpop.f32.mrf.mxu1 }
 0x226   :  { %v1772_v4 = vpop.f32.mrf.mxu1 }
 0x228   :  { %v6848_v36 = vpop.f32.mrf.mxu1 }
 0x22a   :  { %v1784_v14 = vpop.f32.mrf.mxu1 }
 0x22b   :  { %v6801_v44 = vpop.f32.mrf.mxu0 }
 0x22c   :  { %v1650_v23 = vadd.f32 %v6801_v44, %v1477_v5  ;;  %v6851_v7 = vpop.f32.mrf.mxu1 }
 0x22d   :  { %v1643_v38 = vpop.f32.mrf.mxu0 }
 0x22e   :  { %v1779_v22 = vadd.f32 %v6845_v19, %v1650_v23  ;;  %v1644_v42 = vadd.f32 %v1643_v38, %v1469_v9  ;;  %v1373_v19 = vadd.f32 %v1372_v59, %v1221_v29  ;;  %v1796_v27 = vpop.f32.mrf.mxu1 }
 0x22f   :  { %v6804_v30 = vpop.f32.mrf.mxu0 }
 0x230   :  { %v1819_v49 = vmax.f32 %v1779_v22, 0.0  ;;  %v1773_v46 = vadd.f32 %v1772_v4, %v1644_v42  ;;  %v1662_v54 = vadd.f32 %v6804_v30, %v1493_v13  ;;  %v6854_v62 = vpop.f32.mrf.mxu1  ;;  %v1517_v31 = vadd.f32 %v8814_v58, %v1373_v19 }
 0x231   :  { %v1655_v47 = vpop.f32.mrf.mxu0 }
 0x232   :  { %v8816_v44 = vand.u32 4294901760, %v1819_v49  ;;  %v1818_v32 = vmax.f32 %v1773_v46, 0.0  ;;  %v1791_v8 = vadd.f32 %v6848_v36, %v1662_v54  ;;  %v1656_v40 = vadd.f32 %v1655_v47, %v1485_v56  ;;  %v1808_v58 = vpop.f32.mrf.mxu1 }
 0x233   :  { %v6807_v12 = vpop.f32.mrf.mxu0 }
 0x234   :  { %v8819_v28 = vsub.f32 %v1819_v49, %v8816_v44  ;;  %v8821_v39 = vand.u32 4294901760, %v1818_v32  ;;  %v1821_v4 = vmax.f32 %v1791_v8, 0.0  ;;  %v1785_v51 = vadd.f32 %v1784_v14, %v1656_v40 }
 0x235   :  { %v1674_v20 = vadd.f32 %v6807_v12, %v1509_v35  ;;  %v1667_v2 = vpop.f32.mrf.mxu0 }
 0x236   :  { %v1940_v21 = vand.u32 4294901760, %v8819_v28  ;;  %v8826_v36 = vsub.f32 %v1818_v32, %v8821_v39  ;;  %v8828_v53 = vand.u32 4294901760, %v1821_v4  ;;  %v1820_v34 = vmax.f32 %v1785_v51, 0.0  ;;  %6931 = vmatprep.mubr.f32.mxu1 %v8821_v39 }
 0x237   :  { %v1803_v61 = vadd.f32 %v6851_v7, %v1674_v20  ;;  %v1668_v0 = vadd.f32 %v1667_v2, %v1501_v11  ;;  %v6810_v59 = vpop.f32.mrf.mxu0  ;;  %6932 = vmatmul.mubr.f32.vlgmr.msra.gmra.mxu1 %v8816_v44 }
 0x238   :  { %v8833_v14 = vsub.f32 %v1821_v4, %v8828_v53  ;;  %v8835_v57 = vand.u32 4294901760, %v1820_v34  ;;  %v1686_v15 = vadd.f32 %v6810_v59, %v1525_v6  ;;  %6988 = vmatpush3.msra.mxu1 %v8616_v3  ;;  %v1941_v5 = vsub.f32 %v8819_v28, %v1940_v21 }
 0x239   :  { %v1823_v25 = vmax.f32 %v1803_v61, 0.0  ;;  %v1797_v10 = vadd.f32 %v1796_v27, %v1668_v0  ;;  %6989 = vmatprep.subr.mxu1 %v8621_v52  ;;  %v1679_v23 = vpop.f32.mrf.mxu0  ;;  %v1930_v9 = vand.u32 4294901760, %v8826_v36  ;;  %v10899_v0 = vld [vmem:[#allocation20_spill] sm:$0xff] }
 0x23a   :  { %v8845_v1 = vsub.f32 %v1820_v34, %v8835_v57  ;;  %v1815_v38 = vadd.f32 %v6854_v62, %v1686_v15  ;;  %v1680_v22 = vadd.f32 %v1679_v23, %v1517_v31  ;;  %6990 = vmatpush3.msra.mxu1 %v8621_v52  ;;  %6934 = vmatprep.mubr.f32.mxu1 %v8835_v57  ;;  %v1960_v30 = vand.u32 4294901760, %v8833_v14  ;;  %v10898_v62 = vld [vmem:[#allocation28_spill] sm:$0xff]  ;;  %v10902_v31 = vld [vmem:[#allocation9_spill] sm:$0xff]  ;;  %v10906_v23 = vld [vmem:[#allocation18_spill] sm:$0xff] }
 0x23b   :  { %v8849_v42 = vand.u32 4294901760, %v1823_v25  ;;  %v1822_v13 = vmax.f32 %v1797_v10, 0.0  ;;  %6991 = vmatprep.subr.mxu1 %v8631_v63  ;;  %6935 = vmatmul.mubr.f32.gmra.mxu1 %v8828_v53  ;;  %v1931_v43 = vsub.f32 %v8826_v36, %v1930_v9  ;;  %v1942_v54 = vand.u32 4294901760, %v1941_v5  ;;  %v10901_v15 = vld [vmem:[#allocation32_spill] sm:$0xff]  ;;  %v10903_v5 = vld [vmem:[#allocation35_spill] sm:$0xff]  ;;  %v10905_v10 = vld [vmem:[#allocation34_spill] sm:$0xff] }
 0x23c   :  { %v1825_v60 = vmax.f32 %v1815_v38, 0.0  ;;  %v1809_v45 = vadd.f32 %v1808_v58, %v1680_v22  ;;  %6992 = vmatpush3.msra.mxu1 %v8631_v63  ;;  %v1950_v7 = vand.u32 4294901760, %v8845_v1  ;;  %v1961_v40 = vsub.f32 %v8833_v14, %v1960_v30  ;;  %v10908_v38 = vld [vmem:[#allocation27_spill] sm:$0xff]  ;;  %v10910_v22 = vld [vmem:[#allocation36_spill] sm:$0xff] }
 0x23d   :  { %v8857_v49 = vand.u32 4294901760, %v1822_v13  ;;  %6993 = vmatprep.subr.mxu1 %v8643_v55  ;;  %v1932_v46 = vand.u32 4294901760, %v1931_v43  ;;  %v8861_v56 = vsub.f32 %v1823_v25, %v8849_v42  ;;  %v10904_v25 = vld [vmem:[#allocation12_spill] sm:$0xff] }
 0x23e   :  { %v1824_v26 = vmax.f32 %v1809_v45, 0.0  ;;  %6994 = vmatpush3.msra.mxu1 %v8643_v55  ;;  %v1951_v17 = vsub.f32 %v8845_v1, %v1950_v7  ;;  %v8870_v47 = vand.u32 4294901760, %v1825_v60  ;;  %v1962_v4 = vand.u32 4294901760, %v1961_v40  ;;  %v10911_v58 = vld [vmem:[#allocation16_spill] sm:$0xff]  ;;  %v10915_v45 = vld [vmem:[#allocation42_spill] sm:$0xff] }
 0x23f   :  { %v8868_v29 = vsub.f32 %v1822_v13, %v8857_v49  ;;  %6887 = vmatprep.mubr.f32.mxu0 %v1932_v46  ;;  %6937 = vmatprep.mubr.f32.mxu1 %v8857_v49  ;;  %v1980_v35 = vand.u32 4294901760, %v8861_v56  ;;  %v10912_v13 = vld [vmem:[#allocation41_spill] sm:$0xff]  ;;  %v10913_v43 = vld [vmem:[#allocation24_spill] sm:$0xff] }
 0x240   :  { %v8873_v32 = vand.u32 4294901760, %v1824_v26  ;;  %6995 = vmatprep.subr.mxu1 %v8656_v37  ;;  %6888 = vmatmul.mubr.f32.vlgmr.msra.gmra.mxu0 %v1942_v54  ;;  %v1952_v8 = vand.u32 4294901760, %v1951_v17  ;;  %v8889_v12 = vsub.f32 %v1825_v60, %v8870_v47  ;;  %v10914_v60 = vld [vmem:[#allocation33_spill] sm:$0xff]  ;;  %v10931_v46 = vld [vmem:[#allocation44_spill] sm:$0xff] }
 0x241   :  { %6938 = vmatmul.mubr.f32.gmra.mxu1 %v8849_v42  ;;  %6944 = vmatpush3.msra.mxu0 %v8619_v41  ;;  %v1970_v19 = vand.u32 4294901760, %v8868_v29  ;;  %v10932_v54 = vld [vmem:[#allocation45_spill] sm:$0xff] }
 0x242   :  { %v8883_v27 = vsub.f32 %v1824_v26, %v8873_v32  ;;  %6996 = vmatpush3.msra.mxu1 %v8656_v37  ;;  %6945 = vmatprep.subr.mxu0 %v8629_v50  ;;  %v2000_v11 = vand.u32 4294901760, %v8889_v12  ;;  %v2812_v26 = vld [vmem:[#allocation2 + $0x170] sm:$0xff] }
 0x243   :  { %6997 = vmatprep.subr.mxu1 %v8664_v18  ;;  %6946 = vmatpush3.msra.mxu0 %v8629_v50  ;;  %v1971_v41 = vsub.f32 %v8868_v29, %v1970_v19  ;;  %v1981_v50 = vsub.f32 %v8861_v56, %v1980_v35  ;;  %v9065_v17 = vand.u32 4294901760, %v2812_v26 }
 0x244   :  { %6998 = vmatpush3.msra.mxu1 %v8664_v18  ;;  %6890 = vmatprep.mubr.f32.mxu0 %v1952_v8  ;;  %v1990_v51 = vand.u32 4294901760, %v8883_v27  ;;  %v2001_v34 = vsub.f32 %v8889_v12, %v2000_v11 }
 0x245   :  { %6940 = vmatprep.mubr.f32.mxu1 %v8873_v32  ;;  %6947 = vmatprep.subr.mxu0 %v8641_v24  ;;  %v1972_v20 = vand.u32 4294901760, %v1971_v41  ;;  %v1982_v6 = vand.u32 4294901760, %v1981_v50  ;;  %v2808_v50 = vld [vmem:[#allocation2 + $0x150] sm:$0xff] }
 0x246   :  { %6999 = vmatprep.subr.mxu1 %v8675_v16  ;;  %6891 = vmatmul.mubr.f32.gmra.mxu0 %v1962_v4  ;;  %v1991_v2 = vsub.f32 %v8883_v27, %v1990_v51  ;;  %v2002_v59 = vand.u32 4294901760, %v2001_v34  ;;  %v2807_v34 = vld [vmem:[#allocation2 + $0x148] sm:$0xff] }
 0x247   :  { %6941 = vmatmul.mubr.f32.gmra.mxu1 %v8870_v47  ;;  %6948 = vmatpush3.msra.mxu0 %v8641_v24  ;;  %v10897_v24 = vld [vmem:[#allocation26_spill] sm:$0xff] }
 0x248   :  { %7000 = vmatpush3.msra.mxu1 %v8675_v16  ;;  %6949 = vmatprep.subr.mxu0 %v8653_v48  ;;  %v1992_v61 = vand.u32 4294901760, %v1991_v2 }
 0x249   :  { %7001 = vmatprep.subr.mxu1 %v8688_v33  ;;  %7019 = vmatprep.mubr.f32.mxu1 %v1930_v9  ;;  %v10907_v9 = vld [vmem:[#allocation10_spill] sm:$0xff] }
 0x24a   :  { %6950 = vmatpush3.msra.mxu0 %v8653_v48  ;;  %7002 = vmatpush3.msra.mxu1 %v8688_v33  ;;  %v10900_v48 = vld [vmem:[#allocation37_spill] sm:$0xff] }
 0x24b   :  { %6893 = vmatprep.mubr.f32.mxu0 %v1972_v20  ;;  %6951 = vmatprep.subr.mxu0 %v10897_v24 }
 0x24c   :  { %7003 = vmatprep.subr.mxu1 %v10898_v62  ;;  %6894 = vmatmul.mubr.f32.gmra.mxu0 %v1982_v6  ;;  %v9108_v6 = vand.u32 4294901760, %v2808_v50 }
 0x24d   :  { %6952 = vmatpush3.msra.mxu0 %v10897_v24  ;;  %7004 = vmatpush3.msra.mxu1 %v10898_v62 }
 0x24e   :  { %6953 = vmatprep.subr.mxu0 %v10899_v0  ;;  %7005 = vmatprep.subr.mxu1 %v10900_v48 }
 0x24f   :  { %6954 = vmatpush3.msra.mxu0 %v10899_v0  ;;  %7006 = vmatpush3.msra.mxu1 %v10900_v48  ;;  %v9117_v0 = vsub.f32 %v2808_v50, %v9108_v6 }
 0x250   :  { %6896 = vmatprep.mubr.f32.mxu0 %v1992_v61  ;;  %6955 = vmatprep.subr.mxu0 %v10901_v15 }
 0x251   :  { %7007 = vmatprep.subr.mxu1 %v10902_v31  ;;  %6897 = vmatmul.mubr.f32.gmra.mxu0 %v2002_v59  ;;  %10938 = vst [vmem:[#allocation32_spill] sm:$0xff] %v9117_v0 }
 0x252   :  { %6956 = vmatpush3.msra.mxu0 %v10901_v15  ;;  %7008 = vmatpush3.msra.mxu1 %v10902_v31  ;;  %v2806_v15 = vld [vmem:[#allocation2 + $0x140] sm:$0xff] }
 0x253   :  { %6957 = vmatprep.subr.mxu0 %v10903_v5  ;;  %6975 = vmatprep.mubr.f32.mxu0 %v8826_v36  ;;  %v10909_v36 = vld [vmem:[#allocation11_spill] sm:$0xff] }
 0x254   :  { %7009 = vmatprep.subr.mxu1 %v10904_v25  ;;  %6958 = vmatpush3.msra.mxu0 %v10903_v5  ;;  %v9127_v5 = vand.u32 4294901760, %v9117_v0 }
 0x255   :  { %7010 = vmatpush3.msra.mxu1 %v10904_v25  ;;  %6959 = vmatprep.subr.mxu0 %v10905_v10 }
 0x256   :  { %7011 = vmatprep.subr.mxu1 %v10906_v23  ;;  %6960 = vmatpush3.msra.mxu0 %v10905_v10  ;;  %10940 = vst [vmem:[#allocation35_spill] sm:$0xff] %v9127_v5  ;;  %v9132_v10 = vand.u32 4294901760, %v2806_v15 }
 0x257   :  { %7012 = vmatpush3.msra.mxu1 %v10906_v23  ;;  %6961 = vmatprep.subr.mxu0 %v10907_v9 }
 0x258   :  { %7013 = vmatprep.subr.mxu1 %v10908_v38  ;;  %6962 = vmatpush3.msra.mxu0 %v10907_v9  ;;  %v2805_v9 = vld [vmem:[#allocation2 + $0x138] sm:$0xff] }
 0x259   :  { %7014 = vmatpush3.msra.mxu1 %v10908_v38  ;;  %6963 = vmatprep.subr.mxu0 %v10909_v36 }
 0x25a   :  { %7015 = vmatprep.subr.mxu1 %v10910_v22  ;;  %6964 = vmatpush3.msra.mxu0 %v10909_v36 }
 0x25b   :  { %7016 = vmatpush3.msra.mxu1 %v10910_v22  ;;  %6965 = vmatprep.subr.mxu0 %v10911_v58 }
 0x25c   :  { %7017 = vmatprep.subr.mxu1 %v10912_v13  ;;  %6966 = vmatpush3.msra.mxu0 %v10911_v58  ;;  %v9146_v58 = vand.u32 4294901760, %v2805_v9 }
 0x25d   :  { %7018 = vmatpush3.msra.mxu1 %v10912_v13  ;;  %6967 = vmatprep.subr.mxu0 %v10913_v43 }
 0x25e   :  { %7020 = vmatmul.mubr.f32.vlgmr.msra.gmra.mxu1 %v1940_v21  ;;  %7075 = vmatprep.subr.mxu1 %v8616_v3  ;;  %v10925_v21 = vld [vmem:[#allocation8_spill] sm:$0xff]  ;;  %10944 = vst [vmem:[#allocation10_spill] sm:$0xff] %v9146_v58 }
 0x25f   :  { %6968 = vmatpush3.msra.mxu0 %v10913_v43  ;;  %7022 = vmatprep.mubr.f32.mxu1 %v1950_v7  ;;  %v10929_v7 = vld [vmem:[#allocation30_spill] sm:$0xff] }
 0x260   :  { %7076 = vmatpush3.msra.mxu1 %v8616_v3  ;;  %6969 = vmatprep.subr.mxu0 %v10914_v60  ;;  %v10916_v3 = vld [vmem:[#allocation43_spill] sm:$0xff]  ;;  %v2804_v43 = vld [vmem:[#allocation2 + $0x130] sm:$0xff] }
 0x261   :  { %7077 = vmatprep.subr.mxu1 %v8621_v52  ;;  %6970 = vmatpush3.msra.mxu0 %v10914_v60 }
 0x262   :  { %7078 = vmatpush3.msra.mxu1 %v8621_v52  ;;  %6971 = vmatprep.subr.mxu0 %v10915_v45  ;;  %v10917_v52 = vld [vmem:[#allocation19_spill] sm:$0xff] }
 0x263   :  { %7023 = vmatmul.mubr.f32.gmra.mxu1 %v1960_v30  ;;  %7079 = vmatprep.subr.mxu1 %v8631_v63  ;;  %v10930_v30 = vld [vmem:[#allocation38_spill] sm:$0xff] }
 0x264   :  { %6972 = vmatpush3.msra.mxu0 %v10915_v45  ;;  %7025 = vmatprep.mubr.f32.mxu1 %v1970_v19 }
 0x265   :  { %7080 = vmatpush3.msra.mxu1 %v8631_v63  ;;  %6973 = vmatprep.subr.mxu0 %v10916_v3  ;;  %v10918_v63 = vld [vmem:[#allocation15_spill] sm:$0xff] }
 0x266   :  { %7081 = vmatprep.subr.mxu1 %v8643_v55  ;;  %6974 = vmatpush3.msra.mxu0 %v10916_v3 }
 0x267   :  { %7082 = vmatpush3.msra.mxu1 %v8643_v55  ;;  %6976 = vmatmul.mubr.f32.vlgmr.msra.gmra.mxu0 %v8819_v28  ;;  %v10919_v55 = vld [vmem:[#allocation22_spill] sm:$0xff]  ;;  %v10924_v28 = vld [vmem:[#allocation31_spill] sm:$0xff] }
 0x268   :  { %7026 = vmatmul.mubr.f32.gmra.mxu1 %v1980_v35  ;;  %7031 = vmatprep.subr.mxu0 %v10917_v52 }
 0x269   :  { %7083 = vmatprep.subr.mxu1 %v8656_v37  ;;  %6978 = vmatprep.mubr.f32.mxu0 %v8845_v1  ;;  %v10928_v1 = vld [vmem:[#allocation23_spill] sm:$0xff] }
 0x26a   :  { %7028 = vmatprep.mubr.f32.mxu1 %v1990_v51  ;;  %7032 = vmatpush3.msra.mxu0 %v10917_v52  ;;  %v9156_v52 = vsub.f32 %v2805_v9, %v9146_v58 }
 0x26b   :  { %7084 = vmatpush3.msra.mxu1 %v8656_v37  ;;  %7033 = vmatprep.subr.mxu0 %v10918_v63  ;;  %v10920_v37 = vld [vmem:[#allocation17_spill] sm:$0xff] }
 0x26c   :  { %7085 = vmatprep.subr.mxu1 %v8664_v18  ;;  %7034 = vmatpush3.msra.mxu0 %v10918_v63  ;;  %10946 = vst [vmem:[#allocation11_spill] sm:$0xff] %v9156_v52  ;;  %v9159_v63 = vand.u32 4294901760, %v2804_v43 }
 0x26d   :  { %7086 = vmatpush3.msra.mxu1 %v8664_v18  ;;  %6979 = vmatmul.mubr.f32.gmra.mxu0 %v8833_v14  ;;  %v10921_v18 = vld [vmem:[#allocation29_spill] sm:$0xff] }
 0x26e   :  { %7029 = vmatmul.mubr.f32.gmra.mxu1 %v2000_v11  ;;  %7035 = vmatprep.subr.mxu0 %v10919_v55  ;;  %v10926_v14 = vld [vmem:[#allocation13_spill] sm:$0xff]  ;;  %10947 = vst [vmem:[#allocation36_spill] sm:$0xff] %v9159_v63 }
 0x26f   :  { %7087 = vmatprep.subr.mxu1 %v8675_v16  ;;  %6981 = vmatprep.mubr.f32.mxu0 %v8868_v29 }
 0x270   :  { %7036 = vmatpush3.msra.mxu0 %v10919_v55  ;;  %7088 = vmatpush3.msra.mxu1 %v8675_v16  ;;  %v10922_v16 = vld [vmem:[#allocation21_spill] sm:$0xff] }
 0x271   :  { %7107 = vmatprep.mubr.f32.mxu1 %v8821_v39  ;;  %7037 = vmatprep.subr.mxu0 %v10920_v37  ;;  %v2803_v55 = vld [vmem:[#allocation2 + $0x128] sm:$0xff] }
 0x272   :  { %7089 = vmatprep.subr.mxu1 %v8688_v33  ;;  %7038 = vmatpush3.msra.mxu0 %v10920_v37 }
 0x273   :  { %7090 = vmatpush3.msra.mxu1 %v8688_v33  ;;  %6982 = vmatmul.mubr.f32.gmra.mxu0 %v8861_v56  ;;  %v10923_v33 = vld [vmem:[#allocation25_spill] sm:$0xff]  ;;  %v2813_v56 = vld [vmem:[#allocation2 + $0x178] sm:$0xff] }
 0x274   :  { %7039 = vmatprep.subr.mxu0 %v10921_v18  ;;  %7091 = vmatprep.subr.mxu1 %v10898_v62 }
 0x275   :  { %6984 = vmatprep.mubr.f32.mxu0 %v8883_v27  ;;  %7040 = vmatpush3.msra.mxu0 %v10921_v18  ;;  %v2809_v27 = vld [vmem:[#allocation2 + $0x158] sm:$0xff] }
 0x276   :  { %7092 = vmatpush3.msra.mxu1 %v10898_v62  ;;  %7041 = vmatprep.subr.mxu0 %v10922_v16  ;;  %v9100_v51 = vand.u32 4294901760, %v2809_v27 }
 0x277   :  { %7093 = vmatprep.subr.mxu1 %v10900_v48  ;;  %7042 = vmatpush3.msra.mxu0 %v10922_v16  ;;  %v9165_v16 = vand.u32 4294901760, %v9156_v52 }
 0x278   :  { %7094 = vmatpush3.msra.mxu1 %v10900_v48  ;;  %6985 = vmatmul.mubr.f32.gmra.mxu0 %v8889_v12  ;;  %v9111_v24 = vsub.f32 %v2809_v27, %v9100_v51  ;;  %v9119_v48 = vand.u32 4294901760, %v2807_v34 }
 0x279   :  { %7043 = vmatprep.subr.mxu0 %v10923_v33  ;;  %7095 = vmatprep.subr.mxu1 %v10902_v31  ;;  %10948 = vst [vmem:[#allocation16_spill] sm:$0xff] %v9165_v16 }
 0x27a   :  { %7044 = vmatpush3.msra.mxu0 %v10923_v33  ;;  %7063 = vmatprep.mubr.f32.mxu0 %v8821_v39  ;;  %v10927_v39 = vld [vmem:[#allocation14_spill] sm:$0xff]  ;;  %10937 = vst [vmem:[#allocation37_spill] sm:$0xff] %v9111_v24  ;;  %v9123_v59 = vand.u32 4294901760, %v9111_v24  ;;  %v9167_v33 = vand.u32 4294901760, %v2803_v55 }
 0x27b   :  { %7096 = vmatpush3.msra.mxu1 %v10902_v31  ;;  %7045 = vmatprep.subr.mxu0 %v10924_v28 }
 0x27c   :  { %7097 = vmatprep.subr.mxu1 %v10904_v25  ;;  %7046 = vmatpush3.msra.mxu0 %v10924_v28  ;;  %10939 = vst [vmem:[#allocation9_spill] sm:$0xff] %v9123_v59  ;;  %10949 = vst [vmem:[#allocation41_spill] sm:$0xff] %v9167_v33  ;;  %v9171_v28 = vsub.f32 %v2804_v43, %v9159_v63 }
 0x27d   :  { %7098 = vmatpush3.msra.mxu1 %v10904_v25  ;;  %7047 = vmatprep.subr.mxu0 %v10925_v21  ;;  %v9130_v25 = vsub.f32 %v2807_v34, %v9119_v48 }
 0x27e   :  { %7099 = vmatprep.subr.mxu1 %v10906_v23  ;;  %7048 = vmatpush3.msra.mxu0 %v10925_v21  ;;  %10950 = vst [vmem:[#allocation24_spill] sm:$0xff] %v9171_v28  ;;  %v2802_v21 = vld [vmem:[#allocation2 + $0x120] sm:$0xff] }
 0x27f   :  { %7100 = vmatpush3.msra.mxu1 %v10906_v23  ;;  %7049 = vmatprep.subr.mxu0 %v10926_v14  ;;  %10941 = vst [vmem:[#allocation12_spill] sm:$0xff] %v9130_v25  ;;  %v3011_v23 = vsub.f32 %v9111_v24, %v9123_v59  ;;  %v9141_v36 = vand.u32 4294901760, %v9130_v25 }
 0x280   :  { %7101 = vmatprep.subr.mxu1 %v10908_v38  ;;  %7050 = vmatpush3.msra.mxu0 %v10926_v14 }
 0x281   :  { %7102 = vmatpush3.msra.mxu1 %v10908_v38  ;;  %7051 = vmatprep.subr.mxu0 %v10927_v39  ;;  %v3018_v38 = vsub.f32 %v9117_v0, %v9127_v5  ;;  %10942 = vst [vmem:[#allocation34_spill] sm:$0xff] %v9141_v36  ;;  %v3025_v45 = vsub.f32 %v9130_v25, %v9141_v36 }
 0x282   :  { %7103 = vmatprep.subr.mxu1 %v10910_v22  ;;  %7052 = vmatpush3.msra.mxu0 %v10927_v39  ;;  %v3039_v39 = vsub.f32 %v9156_v52, %v9165_v16 }
 0x283   :  { %7104 = vmatpush3.msra.mxu1 %v10910_v22  ;;  %7053 = vmatprep.subr.mxu0 %v10928_v1  ;;  %v9144_v22 = vsub.f32 %v2806_v15, %v9132_v10  ;;  %v3019_v60 = vand.u32 4294901760, %v3018_v38  ;;  %v3026_v37 = vand.u32 4294901760, %v3025_v45 }
 0x284   :  { %7105 = vmatprep.subr.mxu1 %v10912_v13  ;;  %7054 = vmatpush3.msra.mxu0 %v10928_v1  ;;  %v9177_v1 = vsub.f32 %v2803_v55, %v9167_v33 }
 0x285   :  { %7106 = vmatpush3.msra.mxu1 %v10912_v13  ;;  %7055 = vmatprep.subr.mxu0 %v10929_v7  ;;  %10943 = vst [vmem:[#allocation18_spill] sm:$0xff] %v9144_v22  ;;  %v3012_v13 = vand.u32 4294901760, %v3011_v23  ;;  %v9153_v3 = vand.u32 4294901760, %v9144_v22  ;;  %v2798_v23 = vld [vmem:[#allocation2 + $0x100] sm:$0xff] }
 0x286   :  { %7108 = vmatmul.mubr.f32.vlgmr.msra.gmra.mxu1 %v8816_v44  ;;  %7056 = vmatpush3.msra.mxu0 %v10929_v7  ;;  %10951 = vst [vmem:[#allocation33_spill] sm:$0xff] %v9177_v1  ;;  %v9179_v7 = vand.u32 4294901760, %v2802_v21  ;;  %v9227_v43 = vand.u32 4294901760, %v2798_v23 }
 0x287   :  { %7110 = vmatprep.mubr.f32.mxu1 %v8835_v57  ;;  %7057 = vmatprep.subr.mxu0 %v10930_v30  ;;  %10945 = vst [vmem:[#allocation27_spill] sm:$0xff] %v9153_v3  ;;  %v3032_v18 = vsub.f32 %v9144_v22, %v9153_v3  ;;  %v10969_v3 = vld [vmem:[#allocation39_spill] sm:$0xff] }
 0x288   :  { %7058 = vmatpush3.msra.mxu0 %v10930_v30  ;;  %10952 = vst [vmem:[#allocation42_spill] sm:$0xff] %v9179_v7  ;;  %v9183_v30 = vand.u32 4294901760, %v9171_v28  ;;  %10964 = vst [vmem:[#allocation14_spill] sm:$0xff] %v9227_v43  ;;  %v1845_v36 = vsub.s32 2, %v10969_v3 }
 0x289   :  { %7059 = vmatprep.subr.mxu0 %v10931_v46  ;;  %v3033_v14 = vand.u32 4294901760, %v3032_v18 }
 0x28a   :  { %7111 = vmatmul.mubr.f32.gmra.mxu1 %v8828_v53  ;;  %7060 = vmatpush3.msra.mxu0 %v10931_v46  ;;  %10953 = vst [vmem:[#allocation43_spill] sm:$0xff] %v9183_v30  ;;  %v2801_v46 = vld [vmem:[#allocation2 + $0x118] sm:$0xff] }
 0x28b   :  { %7113 = vmatprep.mubr.f32.mxu1 %v8857_v49  ;;  %7061 = vmatprep.subr.mxu0 %v10932_v54 }
 0x28c   :  { %7062 = vmatpush3.msra.mxu0 %v10932_v54  ;;  %v3040_v54 = vand.u32 4294901760, %v3039_v39 }
 0x28d   :  { %7064 = vmatmul.mubr.f32.vlgmr.msra.gmra.mxu0 %v8816_v44  ;;  %v9060_v44 = vand.u32 4294901760, %v2813_v56 }
 0x28e   :  { %7114 = vmatmul.mubr.f32.gmra.mxu1 %v8849_v42  ;;  %7066 = vmatprep.mubr.f32.mxu0 %v8835_v57 }
 0x28f   :  { %7116 = vmatprep.mubr.f32.mxu1 %v8873_v32  ;;  %v9063_v57 = vsub.f32 %v2813_v56, %v9060_v44  ;;  %7119 = vmatprep.subr.mxu0 %v9060_v44  ;;  %v9187_v56 = vand.u32 4294901760, %v9177_v1 }
 0x290   :  { %7120 = vmatpush3.msra.mxu0 %v9060_v44 }
 0x291   :  { %7067 = vmatmul.mubr.f32.gmra.mxu0 %v8828_v53  ;;  %v2811_v53 = vld [vmem:[#allocation2 + $0x168] sm:$0xff]  ;;  %7121 = vmatprep.subr.mxu0 %v9065_v17  ;;  %10954 = vst [vmem:[#allocation19_spill] sm:$0xff] %v9187_v56  ;;  %v3053_v27 = vsub.f32 %v9177_v1, %v9187_v56 }
 0x292   :  { %7117 = vmatmul.mubr.f32.gmra.mxu1 %v8870_v47  ;;  %7069 = vmatprep.mubr.f32.mxu0 %v8857_v49  ;;  %v9073_v49 = vsub.f32 %v2812_v26, %v9065_v17  ;;  %v9075_v29 = vand.u32 4294901760, %v2811_v53  ;;  %v9190_v26 = vsub.f32 %v2802_v21, %v9179_v7 }
 0x293   :  { %7122 = vmatpush3.msra.mxu0 %v9065_v17  ;;  %v3054_v34 = vand.u32 4294901760, %v3053_v27 }
 0x294   :  { %v9082_v8 = vand.u32 4294901760, %v9073_v49  ;;  %v9085_v40 = vsub.f32 %v2811_v53, %v9075_v29  ;;  %7123 = vmatprep.subr.mxu0 %v9075_v29  ;;  %10955 = vst [vmem:[#allocation15_spill] sm:$0xff] %v9190_v26  ;;  %v9192_v53 = vand.u32 4294901760, %v2801_v46 }
 0x295   :  { %7070 = vmatmul.mubr.f32.gmra.mxu0 %v8849_v42  ;;  %v9070_v42 = vand.u32 4294901760, %v9063_v57 }
 0x296   :  { %7072 = vmatprep.mubr.f32.mxu0 %v8873_v32  ;;  %10934 = vst [vmem:[#allocation26_spill] sm:$0xff] %v9082_v8  ;;  %7124 = vmatpush3.msra.mxu0 %v9075_v29  ;;  %v2990_v12 = vsub.f32 %v9073_v49, %v9082_v8  ;;  %v9094_v41 = vand.u32 4294901760, %v9085_v40  ;;  %10956 = vst [vmem:[#allocation22_spill] sm:$0xff] %v9192_v53 }
 0x297   :  { %10933 = vst [vmem:[#allocation40_spill] sm:$0xff] %v9070_v42  ;;  %v2983_v32 = vsub.f32 %v9063_v57, %v9070_v42 }
 0x298   :  { %10935 = vst [vmem:[#allocation28_spill] sm:$0xff] %v9094_v41  ;;  %v2991_v20 = vand.u32 4294901760, %v2990_v12  ;;  %v2997_v11 = vsub.f32 %v9085_v40, %v9094_v41  ;;  %v9204_v12 = vsub.f32 %v2801_v46, %v9192_v53 }
 0x299   :  { %7073 = vmatmul.mubr.f32.gmra.mxu0 %v8870_v47  ;;  %v2810_v47 = vld [vmem:[#allocation2 + $0x160] sm:$0xff]  ;;  %v2984_v35 = vand.u32 4294901760, %v2983_v32  ;;  %v2800_v32 = vld [vmem:[#allocation2 + $0x110] sm:$0xff] }
 0x29a   :  { %v9087_v19 = vand.u32 4294901760, %v2810_v47  ;;  %v2998_v62 = vand.u32 4294901760, %v2997_v11  ;;  %10958 = vst [vmem:[#allocation29_spill] sm:$0xff] %v9204_v12  ;;  %v9206_v50 = vand.u32 4294901760, %v2800_v32  ;;  %v2799_v11 = vld [vmem:[#allocation2 + $0x108] sm:$0xff] }
 0x29b   :  { %7163 = vmatprep.subr.mxu1 %v2984_v35 }
 0x29c   :  { %v9097_v4 = vsub.f32 %v2810_v47, %v9087_v19  ;;  %7125 = vmatprep.subr.mxu0 %v9087_v19  ;;  %7164 = vmatpush3.msra.mxu1 %v2984_v35  ;;  %v3046_v47 = vsub.f32 %v9171_v28, %v9183_v30  ;;  %v9201_v35 = vand.u32 4294901760, %v9190_v26  ;;  %10959 = vst [vmem:[#allocation21_spill] sm:$0xff] %v9206_v50 }
 0x29d   :  { %7126 = vmatpush3.msra.mxu0 %v9087_v19  ;;  %7165 = vmatprep.subr.mxu1 %v2991_v20  ;;  %v9216_v15 = vsub.f32 %v2800_v32, %v9206_v50 }
 0x29e   :  { %v9106_v2 = vand.u32 4294901760, %v9097_v4  ;;  %7127 = vmatprep.subr.mxu0 %v9100_v51  ;;  %7166 = vmatpush3.msra.mxu1 %v2991_v20  ;;  %10957 = vst [vmem:[#allocation17_spill] sm:$0xff] %v9201_v35  ;;  %v3047_v20 = vand.u32 4294901760, %v3046_v47 }
 0x29f   :  { %7128 = vmatpush3.msra.mxu0 %v9100_v51  ;;  %7167 = vmatprep.subr.mxu1 %v2998_v62  ;;  %10961 = vst [vmem:[#allocation31_spill] sm:$0xff] %v9216_v15 }
 0x2a0   :  { %10936 = vst [vmem:[#allocation20_spill] sm:$0xff] %v9106_v2  ;;  %v3004_v61 = vsub.f32 %v9097_v4, %v9106_v2  ;;  %7129 = vmatprep.subr.mxu0 %v9108_v6  ;;  %7168 = vmatpush3.msra.mxu1 %v2998_v62  ;;  %v3060_v62 = vsub.f32 %v9190_v26, %v9201_v35  ;;  %v9260_v2 = vld [vmem:[%s10438_s4] sm:$0x3f] }
 0x2a1   :  { %7130 = vmatpush3.msra.mxu0 %v9108_v6  ;;  %10970 = vst [vmem:[#allocation45_spill] sm:$0xff] %v9260_v2  ;;  %v1846_v41 = vrot.slane %v9260_v2, %v1845_v36 }
 0x2a2   :  { %v3005_v31 = vand.u32 4294901760, %v3004_v61  ;;  %7131 = vmatprep.subr.mxu0 %v9119_v48  ;;  %v9213_v61 = vand.u32 4294901760, %v9204_v12  ;;  %v3061_v9 = vand.u32 4294901760, %v3060_v62 }
 0x2a3   :  { %7132 = vmatpush3.msra.mxu0 %v9119_v48 }
 0x2a4   :  { %7169 = vmatprep.subr.mxu1 %v3005_v31  ;;  %7133 = vmatprep.subr.mxu0 %v9132_v10  ;;  %10960 = vst [vmem:[#allocation25_spill] sm:$0xff] %v9213_v61  ;;  %v3067_v38 = vsub.f32 %v9204_v12, %v9213_v61 }
 0x2a5   :  { %7170 = vmatpush3.msra.mxu1 %v3005_v31  ;;  %7134 = vmatpush3.msra.mxu0 %v9132_v10  ;;  %v9219_v31 = vand.u32 4294901760, %v2799_v11 }
 0x2a6   :  { %7171 = vmatprep.subr.mxu1 %v3012_v13  ;;  %7135 = vmatprep.subr.mxu0 %v9146_v58  ;;  %v3068_v45 = vand.u32 4294901760, %v3067_v38 }
 0x2a7   :  { %7172 = vmatpush3.msra.mxu1 %v3012_v13  ;;  %7136 = vmatpush3.msra.mxu0 %v9146_v58  ;;  %10962 = vst [vmem:[#allocation8_spill] sm:$0xff] %v9219_v31  ;;  %v9225_v13 = vand.u32 4294901760, %v9216_v15 }
 0x2a8   :  { %7173 = vmatprep.subr.mxu1 %v3019_v60  ;;  %7137 = vmatprep.subr.mxu0 %v9159_v63 }
 0x2a9   :  { %7174 = vmatpush3.msra.mxu1 %v3019_v60  ;;  %7138 = vmatpush3.msra.mxu0 %v9159_v63  ;;  %10963 = vst [vmem:[#allocation13_spill] sm:$0xff] %v9225_v13  ;;  %v9231_v60 = vsub.f32 %v2799_v11, %v9219_v31  ;;  %v3074_v55 = vsub.f32 %v9216_v15, %v9225_v13 }
 0x2aa   :  { %7175 = vmatprep.subr.mxu1 %v3026_v37  ;;  %7139 = vmatprep.subr.mxu0 %v9167_v33 }
 0x2ab   :  { %7176 = vmatpush3.msra.mxu1 %v3026_v37  ;;  %7140 = vmatpush3.msra.mxu0 %v9167_v33  ;;  %10965 = vst [vmem:[#allocation23_spill] sm:$0xff] %v9231_v60  ;;  %v9237_v37 = vsub.f32 %v2798_v23, %v9227_v43  ;;  %v9241_v18 = vand.u32 4294901760, %v9231_v60  ;;  %v3075_v21 = vand.u32 4294901760, %v3074_v55 }
 0x2ac   :  { %7177 = vmatprep.subr.mxu1 %v3033_v14  ;;  %7141 = vmatprep.subr.mxu0 %v9179_v7 }
 0x2ad   :  { %7178 = vmatpush3.msra.mxu1 %v3033_v14  ;;  %7142 = vmatpush3.msra.mxu0 %v9179_v7  ;;  %10966 = vst [vmem:[#allocation30_spill] sm:$0xff] %v9237_v37  ;;  %10967 = vst [vmem:[#allocation38_spill] sm:$0xff] %v9241_v18  ;;  %v9245_v14 = vand.u32 4294901760, %v9237_v37  ;;  %v3081_v39 = vsub.f32 %v9231_v60, %v9241_v18 }
 0x2ae   :  { %7179 = vmatprep.subr.mxu1 %v3040_v54  ;;  %7143 = vmatprep.subr.mxu0 %v9192_v53 }
 0x2af   :  { %7180 = vmatpush3.msra.mxu1 %v3040_v54  ;;  %7144 = vmatpush3.msra.mxu0 %v9192_v53  ;;  %10968 = vst [vmem:[#allocation44_spill] sm:$0xff] %v9245_v14  ;;  %v3088_v46 = vsub.f32 %v9237_v37, %v9245_v14  ;;  %v3082_v54 = vand.u32 4294901760, %v3081_v39 }
 0x2b0   :  { %7181 = vmatprep.subr.mxu1 %v3047_v20  ;;  %7145 = vmatprep.subr.mxu0 %v9206_v50 }
 0x2b1   :  { %7182 = vmatpush3.msra.mxu1 %v3047_v20  ;;  %7146 = vmatpush3.msra.mxu0 %v9206_v50  ;;  %v3089_v47 = vand.u32 4294901760, %v3088_v46 }
 0x2b2   :  { %7183 = vmatprep.subr.mxu1 %v3054_v34  ;;  %7147 = vmatprep.subr.mxu0 %v9219_v31 }
 0x2b3   :  { %7184 = vmatpush3.msra.mxu1 %v3054_v34  ;;  %7148 = vmatpush3.msra.mxu0 %v9219_v31 }
 0x2b4   :  { %7185 = vmatprep.subr.mxu1 %v3061_v9  ;;  %7149 = vmatprep.subr.mxu0 %v9227_v43 }
 0x2b5   :  { %7186 = vmatpush3.msra.mxu1 %v3061_v9  ;;  %7150 = vmatpush3.msra.mxu0 %v9227_v43 }
 0x2b6   :  { %7187 = vmatprep.subr.mxu1 %v3068_v45  ;;  %7207 = vmatprep.subr.mxu0 %v9063_v57 }
 0x2b7   :  { %7188 = vmatpush3.msra.mxu1 %v3068_v45 }
 0x2b8   :  { %7189 = vmatprep.subr.mxu1 %v3075_v21 }
 0x2b9   :  { %7190 = vmatpush3.msra.mxu1 %v3075_v21 }
 0x2ba   :  { %7191 = vmatprep.subr.mxu1 %v3082_v54 }
 0x2bb   :  { %7192 = vmatpush3.msra.mxu1 %v3082_v54 }
 0x2bc   :  { %7193 = vmatprep.subr.mxu1 %v3089_v47 }
 0x2bd   :  { %7194 = vmatpush3.msra.mxu1 %v3089_v47 }
 0x2be   :  { %7251 = vmatprep.subr.mxu1 %v9060_v44 }
 0x2f7   :  { %v6933_v32 = vpop.f32.mrf.mxu1 }
 0x2f9   :  { %v2155_v27 = vpop.f32.mrf.mxu1 }
 0x2fb   :  { %v6936_v11 = vpop.f32.mrf.mxu1 }
 0x2fd   :  { %v2167_v62 = vpop.f32.mrf.mxu1 }
 0x300   :  { %v6889_v20 = vpop.f32.mrf.mxu0 }
 0x301   :  { %v6939_v9 = vpop.f32.mrf.mxu1  ;;  %v1945_v37 = vadd.f32 %v6889_v20, %v1846_v41 }
 0x302   :  { %v1934_v34 = vpop.f32.mrf.mxu0 }
 0x303   :  { %v2179_v45 = vpop.f32.mrf.mxu1  ;;  %v1935_v15 = vadd.f32 %v1934_v34, %v1846_v41  ;;  %v2162_v26 = vadd.f32 %v6933_v32, %v1945_v37 }
 0x305   :  { %v2156_v28 = vadd.f32 %v2155_v27, %v1935_v15 }
 0x306   :  { %v6892_v23 = vpop.f32.mrf.mxu0 }
 0x307   :  { %v6942_v39 = vpop.f32.mrf.mxu1  ;;  %v1965_v43 = vadd.f32 %v6892_v23, %v1846_v41 }
 0x308   :  { %v1954_v38 = vpop.f32.mrf.mxu0 }
 0x309   :  { %v2191_v46 = vpop.f32.mrf.mxu1  ;;  %v1955_v1 = vadd.f32 %v1954_v38, %v1846_v41  ;;  %v2174_v7 = vadd.f32 %v6936_v11, %v1965_v43 }
 0x30b   :  { %v2168_v25 = vadd.f32 %v2167_v62, %v1955_v1 }
 0x30c   :  { %v6895_v55 = vpop.f32.mrf.mxu0 }
 0x30d   :  { %v1985_v33 = vadd.f32 %v6895_v55, %v1846_v41 }
 0x30e   :  { %v1974_v21 = vpop.f32.mrf.mxu0 }
 0x30f   :  { %v1975_v63 = vadd.f32 %v1974_v21, %v1846_v41  ;;  %v2186_v38 = vadd.f32 %v6939_v9, %v1985_v33 }
 0x311   :  { %v6898_v54 = vpop.f32.mrf.mxu0  ;;  %v2180_v43 = vadd.f32 %v2179_v45, %v1975_v63 }
 0x312   :  { %v2005_v34 = vadd.f32 %v6898_v54, %v1846_v41 }
 0x313   :  { %v1994_v47 = vpop.f32.mrf.mxu0 }
 0x314   :  { %v1995_v24 = vadd.f32 %v1994_v47, %v1846_v41  ;;  %v2198_v27 = vadd.f32 %v6942_v39, %v2005_v34 }
 0x31e   :  { %v7021_v14 = vpop.f32.mrf.mxu1 }
 0x320   :  { %v2439_v18 = vpop.f32.mrf.mxu1 }
 0x323   :  { %v7024_v61 = vpop.f32.mrf.mxu1 }
 0x325   :  { %v2455_v56 = vpop.f32.mrf.mxu1 }
 0x327   :  { %v6977_v13 = vpop.f32.mrf.mxu0 }
 0x328   :  { %v7027_v16 = vpop.f32.mrf.mxu1  ;;  %v2309_v50 = vadd.f32 %v6977_v13, %v2162_v26 }
 0x329   :  { %v2301_v35 = vpop.f32.mrf.mxu0 }
 0x32a   :  { %v9255_v59 = vpop.f32.mrf.mxu1  ;;  %v2302_v52 = vadd.f32 %v2301_v35, %v2156_v28  ;;  %v2448_v20 = vadd.f32 %v7021_v14, %v2309_v50 }
 0x32c   :  { %v2440_v32 = vadd.f32 %v2439_v18, %v2302_v52 }
 0x32d   :  { %v6980_v30 = vpop.f32.mrf.mxu0 }
 0x32e   :  { %v7030_v42 = vpop.f32.mrf.mxu1  ;;  %v2323_v2 = vadd.f32 %v6980_v30, %v2174_v7 }
 0x32f   :  { %v2315_v5 = vpop.f32.mrf.mxu0 }
 0x330   :  { %v9263_v12 = vpop.f32.mrf.mxu1  ;;  %v2316_v23 = vadd.f32 %v2315_v5, %v2168_v25  ;;  %v2464_v28 = vadd.f32 %v7024_v61, %v2323_v2  ;;  %v2192_v5 = vadd.f32 %v2191_v46, %v1995_v24 }
 0x332   :  { %v2456_v14 = vadd.f32 %v2455_v56, %v2316_v23 }
 0x333   :  { %v6983_v8 = vpop.f32.mrf.mxu0 }
 0x334   :  { %v2337_v35 = vadd.f32 %v6983_v8, %v2186_v38 }
 0x335   :  { %v2329_v60 = vpop.f32.mrf.mxu0 }
 0x336   :  { %v2330_v62 = vadd.f32 %v2329_v60, %v2180_v43  ;;  %v2480_v8 = vadd.f32 %v7027_v16, %v2337_v35 }
 0x338   :  { %v6986_v31 = vpop.f32.mrf.mxu0  ;;  %v2472_v24 = vadd.f32 %v9255_v59, %v2330_v62 }
 0x339   :  { %v2351_v55 = vadd.f32 %v6986_v31, %v2198_v27 }
 0x33a   :  { %v2343_v36 = vpop.f32.mrf.mxu0 }
 0x33b   :  { %v2344_v33 = vadd.f32 %v2343_v36, %v2192_v5  ;;  %v2496_v9 = vadd.f32 %v7030_v42, %v2351_v55 }
 0x33d   :  { %v2488_v36 = vadd.f32 %v9263_v12, %v2344_v33 }
 0x346   :  { %v7109_v3 = vpop.f32.mrf.mxu1 }
 0x348   :  { %v2743_v53 = vpop.f32.mrf.mxu1 }
 0x34a   :  { %v7112_v22 = vpop.f32.mrf.mxu1 }
 0x34c   :  { %v2755_v0 = vpop.f32.mrf.mxu1 }
 0x34d   :  { %v7065_v58 = vpop.f32.mrf.mxu0 }
 0x34e   :  { %v2621_v37 = vadd.f32 %v7065_v58, %v2448_v20  ;;  %v7115_v11 = vpop.f32.mrf.mxu1 }
 0x34f   :  { %v2614_v26 = vpop.f32.mrf.mxu0 }
 0x350   :  { %v2750_v15 = vadd.f32 %v7109_v3, %v2621_v37  ;;  %v2615_v13 = vadd.f32 %v2614_v26, %v2440_v32  ;;  %v2767_v2 = vpop.f32.mrf.mxu1 }
 0x351   :  { %v7068_v7 = vpop.f32.mrf.mxu0 }
 0x352   :  { %v2790_v1 = vmax.f32 %v2750_v15, 0.0  ;;  %v2744_v30 = vadd.f32 %v2743_v53, %v2615_v13  ;;  %v2633_v50 = vadd.f32 %v7068_v7, %v2464_v28  ;;  %v7118_v21 = vpop.f32.mrf.mxu1 }
 0x353   :  { %v2626_v25 = vpop.f32.mrf.mxu0 }
 0x354   :  { %v9265_v58 = vand.u32 4294901760, %v2790_v1  ;;  %v2789_v41 = vmax.f32 %v2744_v30, 0.0  ;;  %v2762_v52 = vadd.f32 %v7112_v22, %v2633_v50  ;;  %v2627_v3 = vadd.f32 %v2626_v25, %v2456_v14  ;;  %v2779_v12 = vpop.f32.mrf.mxu1 }
 0x355   :  { %v7071_v63 = vpop.f32.mrf.mxu0 }
 0x356   :  { %v9268_v61 = vsub.f32 %v2790_v1, %v9265_v58  ;;  %v9270_v18 = vand.u32 4294901760, %v2789_v41  ;;  %v2792_v53 = vmax.f32 %v2762_v52, 0.0  ;;  %v2756_v56 = vadd.f32 %v2755_v0, %v2627_v3 }
 0x357   :  { %v2645_v60 = vadd.f32 %v7071_v63, %v2480_v8  ;;  %v2638_v31 = vpop.f32.mrf.mxu0 }
 0x358   :  { %v2911_v45 = vand.u32 4294901760, %v9268_v61  ;;  %v9275_v22 = vsub.f32 %v2789_v41, %v9270_v18  ;;  %v9277_v39 = vand.u32 4294901760, %v2792_v53  ;;  %v2791_v16 = vmax.f32 %v2756_v56, 0.0  ;;  %7195 = vmatprep.mubr.f32.mxu1 %v9270_v18 }
 0x359   :  { %v2774_v46 = vadd.f32 %v7115_v11, %v2645_v60  ;;  %v2639_v54 = vadd.f32 %v2638_v31, %v2472_v24  ;;  %v7074_v47 = vpop.f32.mrf.mxu0  ;;  %7196 = vmatmul.mubr.f32.vlgmr.msra.gmra.mxu1 %v9265_v58 }
 0x35a   :  { %v9282_v0 = vsub.f32 %v2792_v53, %v9277_v39  ;;  %v9284_v42 = vand.u32 4294901760, %v2791_v16  ;;  %v2657_v59 = vadd.f32 %v7074_v47, %v2496_v9  ;;  %7252 = vmatpush3.msra.mxu1 %v9060_v44  ;;  %v2912_v20 = vsub.f32 %v9268_v61, %v2911_v45 }
 0x35b   :  { %v2794_v34 = vmax.f32 %v2774_v46, 0.0  ;;  %v2768_v23 = vadd.f32 %v2767_v2, %v2639_v54  ;;  %7253 = vmatprep.subr.mxu1 %v9065_v17  ;;  %v2650_v37 = vpop.f32.mrf.mxu0  ;;  %v2901_v32 = vand.u32 4294901760, %v9275_v22  ;;  %v10973_v54 = vld [vmem:[#allocation32_spill] sm:$0xff] }
 0x35c   :  { %v9294_v38 = vsub.f32 %v2791_v16, %v9284_v42  ;;  %v2786_v26 = vadd.f32 %v7118_v21, %v2657_v59  ;;  %v2651_v15 = vadd.f32 %v2650_v37, %v2488_v36  ;;  %7254 = vmatpush3.msra.mxu1 %v9065_v17  ;;  %7198 = vmatprep.mubr.f32.mxu1 %v9284_v42  ;;  %v2931_v7 = vand.u32 4294901760, %v9282_v0  ;;  %v10972_v21 = vld [vmem:[#allocation10_spill] sm:$0xff]  ;;  %v10975_v59 = vld [vmem:[#allocation12_spill] sm:$0xff]  ;;  %v10976_v36 = vld [vmem:[#allocation41_spill] sm:$0xff] }
 0x35d   :  { %v9298_v13 = vand.u32 4294901760, %v2794_v34  ;;  %v2793_v28 = vmax.f32 %v2768_v23, 0.0  ;;  %7255 = vmatprep.subr.mxu1 %v9075_v29  ;;  %7199 = vmatmul.mubr.f32.gmra.mxu1 %v9277_v39  ;;  %v2902_v35 = vsub.f32 %v9275_v22, %v2901_v32  ;;  %v2913_v50 = vand.u32 4294901760, %v2912_v20  ;;  %v10977_v20 = vld [vmem:[#allocation18_spill] sm:$0xff]  ;;  %v10979_v23 = vld [vmem:[#allocation11_spill] sm:$0xff] }
 0x35e   :  { %v2796_v43 = vmax.f32 %v2786_v26, 0.0  ;;  %v2780_v27 = vadd.f32 %v2779_v12, %v2651_v15  ;;  %7256 = vmatpush3.msra.mxu1 %v9075_v29  ;;  %v2921_v11 = vand.u32 4294901760, %v9294_v38  ;;  %v2932_v3 = vsub.f32 %v9282_v0, %v2931_v7  ;;  %v10980_v37 = vld [vmem:[#allocation22_spill] sm:$0xff]  ;;  %v10982_v26 = vld [vmem:[#allocation21_spill] sm:$0xff]  ;;  %v10984_v15 = vld [vmem:[#allocation8_spill] sm:$0xff] }
 0x35f   :  { %v9306_v1 = vand.u32 4294901760, %v2793_v28  ;;  %7257 = vmatprep.subr.mxu1 %v9087_v19  ;;  %v2903_v30 = vand.u32 4294901760, %v2902_v35  ;;  %v9310_v14 = vsub.f32 %v2794_v34, %v9298_v13  ;;  %v10978_v34 = vld [vmem:[#allocation42_spill] sm:$0xff]  ;;  %v10985_v12 = vld [vmem:[#allocation15_spill] sm:$0xff]  ;;  %v10987_v35 = vld [vmem:[#allocation29_spill] sm:$0xff] }
 0x360   :  { %v2795_v62 = vmax.f32 %v2780_v27, 0.0  ;;  %7258 = vmatpush3.msra.mxu1 %v9087_v19  ;;  %v2922_v55 = vsub.f32 %v9294_v38, %v2921_v11  ;;  %v9319_v25 = vand.u32 4294901760, %v2796_v43  ;;  %v2933_v53 = vand.u32 4294901760, %v2932_v3  ;;  %v10989_v27 = vld [vmem:[#allocation23_spill] sm:$0xff] }
 0x361   :  { %v9317_v5 = vsub.f32 %v2793_v28, %v9306_v1  ;;  %7151 = vmatprep.mubr.f32.mxu0 %v2903_v30  ;;  %7201 = vmatprep.mubr.f32.mxu1 %v9306_v1  ;;  %v2951_v8 = vand.u32 4294901760, %v9310_v14  ;;  %v10986_v28 = vld [vmem:[#allocation14_spill] sm:$0xff] }
 0x362   :  { %v9322_v41 = vand.u32 4294901760, %v2795_v62  ;;  %7259 = vmatprep.subr.mxu1 %v9100_v51  ;;  %7152 = vmatmul.mubr.f32.vlgmr.msra.gmra.mxu0 %v2913_v50  ;;  %v2923_v52 = vand.u32 4294901760, %v2922_v55  ;;  %v9338_v63 = vsub.f32 %v2796_v43, %v9319_v25  ;;  %v10988_v43 = vld [vmem:[#allocation31_spill] sm:$0xff]  ;;  %v11005_v30 = vld [vmem:[#allocation38_spill] sm:$0xff]  ;;  %v11006_v50 = vld [vmem:[#allocation44_spill] sm:$0xff] }
 0x363   :  { %7202 = vmatmul.mubr.f32.gmra.mxu1 %v9298_v13  ;;  %7208 = vmatpush3.msra.mxu0 %v9063_v57  ;;  %v2941_v33 = vand.u32 4294901760, %v9317_v5 }
 0x364   :  { %v9332_v2 = vsub.f32 %v2795_v62, %v9322_v41  ;;  %7260 = vmatpush3.msra.mxu1 %v9100_v51  ;;  %7209 = vmatprep.subr.mxu0 %v9073_v49  ;;  %v2971_v24 = vand.u32 4294901760, %v9338_v63  ;;  %v3783_v62 = vld [vmem:[#allocation2 + $0x1f0] sm:$0xff] }
 0x365   :  { %7261 = vmatprep.subr.mxu1 %v9108_v6  ;;  %7210 = vmatpush3.msra.mxu0 %v9073_v49  ;;  %v2942_v57 = vsub.f32 %v9317_v5, %v2941_v33  ;;  %v2952_v49 = vsub.f32 %v9310_v14, %v2951_v8  ;;  %v9514_v55 = vand.u32 4294901760, %v3783_v62 }
 0x366   :  { %7262 = vmatpush3.msra.mxu1 %v9108_v6  ;;  %7154 = vmatprep.mubr.f32.mxu0 %v2923_v52  ;;  %v2961_v56 = vand.u32 4294901760, %v9332_v2  ;;  %v2972_v16 = vsub.f32 %v9338_v63, %v2971_v24 }
 0x367   :  { %7204 = vmatprep.mubr.f32.mxu1 %v9322_v41  ;;  %7211 = vmatprep.subr.mxu0 %v9085_v40  ;;  %v2943_v60 = vand.u32 4294901760, %v2942_v57  ;;  %v2953_v9 = vand.u32 4294901760, %v2952_v49  ;;  %v3779_v49 = vld [vmem:[#allocation2 + $0x1d0] sm:$0xff] }
 0x368   :  { %7263 = vmatprep.subr.mxu1 %v9119_v48  ;;  %7155 = vmatmul.mubr.f32.gmra.mxu0 %v2933_v53  ;;  %v2962_v31 = vsub.f32 %v9332_v2, %v2961_v56  ;;  %v2973_v47 = vand.u32 4294901760, %v2972_v16  ;;  %v3778_v16 = vld [vmem:[#allocation2 + $0x1c8] sm:$0xff] }
 0x369   :  { %7205 = vmatmul.mubr.f32.gmra.mxu1 %v9319_v25  ;;  %7212 = vmatpush3.msra.mxu0 %v9085_v40  ;;  %v10971_v40 = vld [vmem:[#allocation37_spill] sm:$0xff] }
 0x36a   :  { %7264 = vmatpush3.msra.mxu1 %v9119_v48  ;;  %7213 = vmatprep.subr.mxu0 %v9097_v4  ;;  %v2963_v46 = vand.u32 4294901760, %v2962_v31 }
 0x36b   :  { %7265 = vmatprep.subr.mxu1 %v9132_v10  ;;  %7283 = vmatprep.mubr.f32.mxu1 %v2901_v32  ;;  %v10981_v32 = vld [vmem:[#allocation24_spill] sm:$0xff] }
 0x36c   :  { %7214 = vmatpush3.msra.mxu0 %v9097_v4  ;;  %7266 = vmatpush3.msra.mxu1 %v9132_v10  ;;  %v10974_v4 = vld [vmem:[#allocation36_spill] sm:$0xff] }
 0x36d   :  { %7157 = vmatprep.mubr.f32.mxu0 %v2943_v60  ;;  %7215 = vmatprep.subr.mxu0 %v10971_v40 }
 0x36e   :  { %7267 = vmatprep.subr.mxu1 %v10972_v21  ;;  %7158 = vmatmul.mubr.f32.gmra.mxu0 %v2953_v9  ;;  %v9557_v9 = vand.u32 4294901760, %v3779_v49 }
 0x36f   :  { %7216 = vmatpush3.msra.mxu0 %v10971_v40  ;;  %7268 = vmatpush3.msra.mxu1 %v10972_v21 }
 0x370   :  { %7217 = vmatprep.subr.mxu0 %v10973_v54  ;;  %7269 = vmatprep.subr.mxu1 %v10974_v4 }
 0x371   :  { %7218 = vmatpush3.msra.mxu0 %v10973_v54  ;;  %7270 = vmatpush3.msra.mxu1 %v10974_v4  ;;  %v9566_v54 = vsub.f32 %v3779_v49, %v9557_v9 }
 0x372   :  { %7160 = vmatprep.mubr.f32.mxu0 %v2963_v46  ;;  %7219 = vmatprep.subr.mxu0 %v10975_v59 }
 0x373   :  { %7271 = vmatprep.subr.mxu1 %v10976_v36  ;;  %7161 = vmatmul.mubr.f32.gmra.mxu0 %v2973_v47  ;;  %11012 = vst [vmem:[#allocation41_spill] sm:$0xff] %v9566_v54 }
 0x374   :  { %7220 = vmatpush3.msra.mxu0 %v10975_v59  ;;  %7272 = vmatpush3.msra.mxu1 %v10976_v36  ;;  %v3777_v59 = vld [vmem:[#allocation2 + $0x1c0] sm:$0xff] }
 0x375   :  { %7221 = vmatprep.subr.mxu0 %v10977_v20  ;;  %7239 = vmatprep.mubr.f32.mxu0 %v9275_v22  ;;  %v10983_v22 = vld [vmem:[#allocation33_spill] sm:$0xff] }
 0x376   :  { %7273 = vmatprep.subr.mxu1 %v10978_v34  ;;  %7222 = vmatpush3.msra.mxu0 %v10977_v20  ;;  %v9576_v20 = vand.u32 4294901760, %v9566_v54 }
 0x377   :  { %7274 = vmatpush3.msra.mxu1 %v10978_v34  ;;  %7223 = vmatprep.subr.mxu0 %v10979_v23 }
 0x378   :  { %7275 = vmatprep.subr.mxu1 %v10980_v37  ;;  %7224 = vmatpush3.msra.mxu0 %v10979_v23  ;;  %11014 = vst [vmem:[#allocation42_spill] sm:$0xff] %v9576_v20  ;;  %v9581_v23 = vand.u32 4294901760, %v3777_v59 }
 0x379   :  { %7276 = vmatpush3.msra.mxu1 %v10980_v37  ;;  %7225 = vmatprep.subr.mxu0 %v10981_v32 }
 0x37a   :  { %7277 = vmatprep.subr.mxu1 %v10982_v26  ;;  %7226 = vmatpush3.msra.mxu0 %v10981_v32  ;;  %v3776_v32 = vld [vmem:[#allocation2 + $0x1b8] sm:$0xff] }
 0x37b   :  { %7278 = vmatpush3.msra.mxu1 %v10982_v26  ;;  %7227 = vmatprep.subr.mxu0 %v10983_v22 }
 0x37c   :  { %7279 = vmatprep.subr.mxu1 %v10984_v15  ;;  %7228 = vmatpush3.msra.mxu0 %v10983_v22 }
 0x37d   :  { %7280 = vmatpush3.msra.mxu1 %v10984_v15  ;;  %7229 = vmatprep.subr.mxu0 %v10985_v12 }
 0x37e   :  { %7281 = vmatprep.subr.mxu1 %v10986_v28  ;;  %7230 = vmatpush3.msra.mxu0 %v10985_v12  ;;  %v9595_v12 = vand.u32 4294901760, %v3776_v32 }
 0x37f   :  { %7282 = vmatpush3.msra.mxu1 %v10986_v28  ;;  %7231 = vmatprep.subr.mxu0 %v10987_v35 }
 0x380   :  { %7284 = vmatmul.mubr.f32.vlgmr.msra.gmra.mxu1 %v2911_v45  ;;  %7339 = vmatprep.subr.mxu1 %v9060_v44  ;;  %v10999_v45 = vld [vmem:[#allocation16_spill] sm:$0xff]  ;;  %11018 = vst [vmem:[#allocation21_spill] sm:$0xff] %v9595_v12 }
 0x381   :  { %7232 = vmatpush3.msra.mxu0 %v10987_v35  ;;  %7286 = vmatprep.mubr.f32.mxu1 %v2921_v11  ;;  %v11003_v11 = vld [vmem:[#allocation25_spill] sm:$0xff]  ;;  %v3775_v35 = vld [vmem:[#allocation2 + $0x1b0] sm:$0xff] }
 0x382   :  { %7340 = vmatpush3.msra.mxu1 %v9060_v44  ;;  %7233 = vmatprep.subr.mxu0 %v10988_v43  ;;  %v10990_v44 = vld [vmem:[#allocation30_spill] sm:$0xff] }
 0x383   :  { %7341 = vmatprep.subr.mxu1 %v9065_v17  ;;  %7234 = vmatpush3.msra.mxu0 %v10988_v43 }
 0x384   :  { %7342 = vmatpush3.msra.mxu1 %v9065_v17  ;;  %7235 = vmatprep.subr.mxu0 %v10989_v27  ;;  %v10991_v17 = vld [vmem:[#allocation40_spill] sm:$0xff] }
 0x385   :  { %7287 = vmatmul.mubr.f32.gmra.mxu1 %v2931_v7  ;;  %7343 = vmatprep.subr.mxu1 %v9075_v29  ;;  %v11004_v7 = vld [vmem:[#allocation13_spill] sm:$0xff] }
 0x386   :  { %7236 = vmatpush3.msra.mxu0 %v10989_v27  ;;  %7289 = vmatprep.mubr.f32.mxu1 %v2941_v33 }
 0x387   :  { %7344 = vmatpush3.msra.mxu1 %v9075_v29  ;;  %7237 = vmatprep.subr.mxu0 %v10990_v44  ;;  %v10992_v29 = vld [vmem:[#allocation26_spill] sm:$0xff] }
 0x388   :  { %7345 = vmatprep.subr.mxu1 %v9087_v19  ;;  %7238 = vmatpush3.msra.mxu0 %v10990_v44 }
 0x389   :  { %7346 = vmatpush3.msra.mxu1 %v9087_v19  ;;  %7240 = vmatmul.mubr.f32.vlgmr.msra.gmra.mxu0 %v9268_v61  ;;  %v10993_v19 = vld [vmem:[#allocation28_spill] sm:$0xff]  ;;  %v10998_v61 = vld [vmem:[#allocation27_spill] sm:$0xff] }
 0x38a   :  { %7290 = vmatmul.mubr.f32.gmra.mxu1 %v2951_v8  ;;  %7295 = vmatprep.subr.mxu0 %v10991_v17 }
 0x38b   :  { %7347 = vmatprep.subr.mxu1 %v9100_v51  ;;  %7242 = vmatprep.mubr.f32.mxu0 %v9294_v38  ;;  %v11002_v38 = vld [vmem:[#allocation17_spill] sm:$0xff] }
 0x38c   :  { %7292 = vmatprep.mubr.f32.mxu1 %v2961_v56  ;;  %7296 = vmatpush3.msra.mxu0 %v10991_v17  ;;  %v9605_v17 = vsub.f32 %v3776_v32, %v9595_v12 }
 0x38d   :  { %7348 = vmatpush3.msra.mxu1 %v9100_v51  ;;  %7297 = vmatprep.subr.mxu0 %v10992_v29  ;;  %v10994_v51 = vld [vmem:[#allocation20_spill] sm:$0xff] }
 0x38e   :  { %7349 = vmatprep.subr.mxu1 %v9108_v6  ;;  %7298 = vmatpush3.msra.mxu0 %v10992_v29  ;;  %11020 = vst [vmem:[#allocation8_spill] sm:$0xff] %v9605_v17  ;;  %v9608_v29 = vand.u32 4294901760, %v3775_v35 }
 0x38f   :  { %7350 = vmatpush3.msra.mxu1 %v9108_v6  ;;  %7243 = vmatmul.mubr.f32.gmra.mxu0 %v9282_v0  ;;  %v10995_v6 = vld [vmem:[#allocation9_spill] sm:$0xff]  ;;  %v11000_v0 = vld [vmem:[#allocation43_spill] sm:$0xff] }
 0x390   :  { %7293 = vmatmul.mubr.f32.gmra.mxu1 %v2971_v24  ;;  %7299 = vmatprep.subr.mxu0 %v10993_v19  ;;  %11021 = vst [vmem:[#allocation15_spill] sm:$0xff] %v9608_v29 }
 0x391   :  { %7351 = vmatprep.subr.mxu1 %v9119_v48  ;;  %7245 = vmatprep.mubr.f32.mxu0 %v9317_v5 }
 0x392   :  { %7300 = vmatpush3.msra.mxu0 %v10993_v19  ;;  %7352 = vmatpush3.msra.mxu1 %v9119_v48  ;;  %v10996_v48 = vld [vmem:[#allocation35_spill] sm:$0xff]  ;;  %v3774_v19 = vld [vmem:[#allocation2 + $0x1a8] sm:$0xff] }
 0x393   :  { %7371 = vmatprep.mubr.f32.mxu1 %v9270_v18  ;;  %7301 = vmatprep.subr.mxu0 %v10994_v51 }
 0x394   :  { %7353 = vmatprep.subr.mxu1 %v9132_v10  ;;  %7302 = vmatpush3.msra.mxu0 %v10994_v51 }
 0x395   :  { %7354 = vmatpush3.msra.mxu1 %v9132_v10  ;;  %7246 = vmatmul.mubr.f32.gmra.mxu0 %v9310_v14  ;;  %v10997_v10 = vld [vmem:[#allocation34_spill] sm:$0xff]  ;;  %v3784_v14 = vld [vmem:[#allocation2 + $0x1f8] sm:$0xff] }
 0x396   :  { %7303 = vmatprep.subr.mxu0 %v10995_v6  ;;  %7355 = vmatprep.subr.mxu1 %v10972_v21 }
 0x397   :  { %7248 = vmatprep.mubr.f32.mxu0 %v9332_v2  ;;  %7304 = vmatpush3.msra.mxu0 %v10995_v6  ;;  %v3780_v2 = vld [vmem:[#allocation2 + $0x1d8] sm:$0xff] }
 0x398   :  { %7356 = vmatpush3.msra.mxu1 %v10972_v21  ;;  %7305 = vmatprep.subr.mxu0 %v10996_v48  ;;  %v9549_v56 = vand.u32 4294901760, %v3780_v2 }
 0x399   :  { %7357 = vmatprep.subr.mxu1 %v10974_v4  ;;  %7306 = vmatpush3.msra.mxu0 %v10996_v48  ;;  %v9614_v48 = vand.u32 4294901760, %v9605_v17 }
 0x39a   :  { %7358 = vmatpush3.msra.mxu1 %v10974_v4  ;;  %7249 = vmatmul.mubr.f32.gmra.mxu0 %v9338_v63  ;;  %v9560_v40 = vsub.f32 %v3780_v2, %v9549_v56  ;;  %v9568_v4 = vand.u32 4294901760, %v3778_v16 }
 0x39b   :  { %7307 = vmatprep.subr.mxu0 %v10997_v10  ;;  %7359 = vmatprep.subr.mxu1 %v10976_v36  ;;  %11022 = vst [vmem:[#allocation14_spill] sm:$0xff] %v9614_v48 }
 0x39c   :  { %7308 = vmatpush3.msra.mxu0 %v10997_v10  ;;  %7327 = vmatprep.mubr.f32.mxu0 %v9270_v18  ;;  %v11001_v18 = vld [vmem:[#allocation19_spill] sm:$0xff]  ;;  %11011 = vst [vmem:[#allocation12_spill] sm:$0xff] %v9560_v40  ;;  %v9572_v47 = vand.u32 4294901760, %v9560_v40  ;;  %v9616_v10 = vand.u32 4294901760, %v3774_v19 }
 0x39d   :  { %7360 = vmatpush3.msra.mxu1 %v10976_v36  ;;  %7309 = vmatprep.subr.mxu0 %v10998_v61 }
 0x39e   :  { %7361 = vmatprep.subr.mxu1 %v10978_v34  ;;  %7310 = vmatpush3.msra.mxu0 %v10998_v61  ;;  %11013 = vst [vmem:[#allocation18_spill] sm:$0xff] %v9572_v47  ;;  %11023 = vst [vmem:[#allocation29_spill] sm:$0xff] %v9616_v10  ;;  %v9620_v61 = vsub.f32 %v3775_v35, %v9608_v29 }
 0x39f   :  { %7362 = vmatpush3.msra.mxu1 %v10978_v34  ;;  %7311 = vmatprep.subr.mxu0 %v10999_v45  ;;  %v9579_v34 = vsub.f32 %v3778_v16, %v9568_v4 }
 0x3a0   :  { %7363 = vmatprep.subr.mxu1 %v10980_v37  ;;  %7312 = vmatpush3.msra.mxu0 %v10999_v45  ;;  %11024 = vst [vmem:[#allocation31_spill] sm:$0xff] %v9620_v61  ;;  %v3773_v45 = vld [vmem:[#allocation2 + $0x1a0] sm:$0xff] }
 0x3a1   :  { %7364 = vmatpush3.msra.mxu1 %v10980_v37  ;;  %7313 = vmatprep.subr.mxu0 %v11000_v0  ;;  %11015 = vst [vmem:[#allocation11_spill] sm:$0xff] %v9579_v34  ;;  %v3982_v37 = vsub.f32 %v9560_v40, %v9572_v47  ;;  %v9590_v22 = vand.u32 4294901760, %v9579_v34 }
 0x3a2   :  { %7365 = vmatprep.subr.mxu1 %v10982_v26  ;;  %7314 = vmatpush3.msra.mxu0 %v11000_v0 }
 0x3a3   :  { %7366 = vmatpush3.msra.mxu1 %v10982_v26  ;;  %7315 = vmatprep.subr.mxu0 %v11001_v18  ;;  %v3989_v26 = vsub.f32 %v9566_v54, %v9576_v20  ;;  %11016 = vst [vmem:[#allocation22_spill] sm:$0xff] %v9590_v22  ;;  %v3996_v27 = vsub.f32 %v9579_v34, %v9590_v22 }
 0x3a4   :  { %7367 = vmatprep.subr.mxu1 %v10984_v15  ;;  %7316 = vmatpush3.msra.mxu0 %v11001_v18  ;;  %v4010_v18 = vsub.f32 %v9605_v17, %v9614_v48 }
 0x3a5   :  { %7368 = vmatpush3.msra.mxu1 %v10984_v15  ;;  %7317 = vmatprep.subr.mxu0 %v11002_v38  ;;  %v9593_v15 = vsub.f32 %v3777_v59, %v9581_v23  ;;  %v3990_v43 = vand.u32 4294901760, %v3989_v26  ;;  %v3997_v51 = vand.u32 4294901760, %v3996_v27 }
 0x3a6   :  { %7369 = vmatprep.subr.mxu1 %v10986_v28  ;;  %7318 = vmatpush3.msra.mxu0 %v11002_v38  ;;  %v9626_v38 = vsub.f32 %v3774_v19, %v9616_v10 }
 0x3a7   :  { %7370 = vmatpush3.msra.mxu1 %v10986_v28  ;;  %7319 = vmatprep.subr.mxu0 %v11003_v11  ;;  %11017 = vst [vmem:[#allocation24_spill] sm:$0xff] %v9593_v15  ;;  %v3983_v28 = vand.u32 4294901760, %v3982_v37  ;;  %v9602_v44 = vand.u32 4294901760, %v9593_v15  ;;  %v3769_v37 = vld [vmem:[#allocation2 + $0x180] sm:$0xff] }
 0x3a8   :  { %7372 = vmatmul.mubr.f32.vlgmr.msra.gmra.mxu1 %v9265_v58  ;;  %7320 = vmatpush3.msra.mxu0 %v11003_v11  ;;  %11025 = vst [vmem:[#allocation23_spill] sm:$0xff] %v9626_v38  ;;  %v9628_v11 = vand.u32 4294901760, %v3773_v45  ;;  %v9676_v35 = vand.u32 4294901760, %v3769_v37 }
 0x3a9   :  { %7374 = vmatprep.mubr.f32.mxu1 %v9284_v42  ;;  %7321 = vmatprep.subr.mxu0 %v11004_v7  ;;  %11019 = vst [vmem:[#allocation33_spill] sm:$0xff] %v9602_v44  ;;  %v4003_v6 = vsub.f32 %v9593_v15, %v9602_v44  ;;  %v11043_v44 = vld [vmem:[#allocation39_spill] sm:$0xff] }
 0x3aa   :  { %7322 = vmatpush3.msra.mxu0 %v11004_v7  ;;  %11026 = vst [vmem:[#allocation30_spill] sm:$0xff] %v9628_v11  ;;  %v9632_v7 = vand.u32 4294901760, %v9620_v61  ;;  %11038 = vst [vmem:[#allocation17_spill] sm:$0xff] %v9676_v35  ;;  %v2816_v22 = vsub.s32 3, %v11043_v44 }
 0x3ab   :  { %7323 = vmatprep.subr.mxu0 %v11005_v30  ;;  %v4004_v0 = vand.u32 4294901760, %v4003_v6 }
 0x3ac   :  { %7375 = vmatmul.mubr.f32.gmra.mxu1 %v9277_v39  ;;  %7324 = vmatpush3.msra.mxu0 %v11005_v30  ;;  %11027 = vst [vmem:[#allocation40_spill] sm:$0xff] %v9632_v7  ;;  %v3772_v30 = vld [vmem:[#allocation2 + $0x198] sm:$0xff] }
 0x3ad   :  { %7377 = vmatprep.mubr.f32.mxu1 %v9306_v1  ;;  %7325 = vmatprep.subr.mxu0 %v11006_v50 }
 0x3ae   :  { %7326 = vmatpush3.msra.mxu0 %v11006_v50  ;;  %v4011_v50 = vand.u32 4294901760, %v4010_v18 }
 0x3af   :  { %7328 = vmatmul.mubr.f32.vlgmr.msra.gmra.mxu0 %v9265_v58  ;;  %v9509_v58 = vand.u32 4294901760, %v3784_v14 }
 0x3b0   :  { %7378 = vmatmul.mubr.f32.gmra.mxu1 %v9298_v13  ;;  %7330 = vmatprep.mubr.f32.mxu0 %v9284_v42 }
 0x3b1   :  { %7380 = vmatprep.mubr.f32.mxu1 %v9322_v41  ;;  %v9512_v42 = vsub.f32 %v3784_v14, %v9509_v58  ;;  %7383 = vmatprep.subr.mxu0 %v9509_v58  ;;  %v9636_v14 = vand.u32 4294901760, %v9626_v38 }
 0x3b2   :  { %7384 = vmatpush3.msra.mxu0 %v9509_v58 }
 0x3b3   :  { %7331 = vmatmul.mubr.f32.gmra.mxu0 %v9277_v39  ;;  %v3782_v39 = vld [vmem:[#allocation2 + $0x1e8] sm:$0xff]  ;;  %7385 = vmatprep.subr.mxu0 %v9514_v55  ;;  %11028 = vst [vmem:[#allocation26_spill] sm:$0xff] %v9636_v14  ;;  %v4024_v2 = vsub.f32 %v9626_v38, %v9636_v14 }
 0x3b4   :  { %7381 = vmatmul.mubr.f32.gmra.mxu1 %v9319_v25  ;;  %7333 = vmatprep.mubr.f32.mxu0 %v9306_v1  ;;  %v9522_v1 = vsub.f32 %v3783_v62, %v9514_v55  ;;  %v9524_v5 = vand.u32 4294901760, %v3782_v39  ;;  %v9639_v62 = vsub.f32 %v3773_v45, %v9628_v11 }
 0x3b5   :  { %7386 = vmatpush3.msra.mxu0 %v9514_v55  ;;  %v4025_v16 = vand.u32 4294901760, %v4024_v2 }
 0x3b6   :  { %v9531_v52 = vand.u32 4294901760, %v9522_v1  ;;  %v9534_v3 = vsub.f32 %v3782_v39, %v9524_v5  ;;  %7387 = vmatprep.subr.mxu0 %v9524_v5  ;;  %11029 = vst [vmem:[#allocation28_spill] sm:$0xff] %v9639_v62  ;;  %v9641_v39 = vand.u32 4294901760, %v3772_v30 }
 0x3b7   :  { %7334 = vmatmul.mubr.f32.gmra.mxu0 %v9298_v13  ;;  %v9519_v13 = vand.u32 4294901760, %v9512_v42 }
 0x3b8   :  { %7336 = vmatprep.mubr.f32.mxu0 %v9322_v41  ;;  %11008 = vst [vmem:[#allocation10_spill] sm:$0xff] %v9531_v52  ;;  %7388 = vmatpush3.msra.mxu0 %v9524_v5  ;;  %v3961_v63 = vsub.f32 %v9522_v1, %v9531_v52  ;;  %v9543_v57 = vand.u32 4294901760, %v9534_v3  ;;  %11030 = vst [vmem:[#allocation20_spill] sm:$0xff] %v9641_v39 }
 0x3b9   :  { %11007 = vst [vmem:[#allocation37_spill] sm:$0xff] %v9519_v13  ;;  %v3954_v41 = vsub.f32 %v9512_v42, %v9519_v13 }
 0x3ba   :  { %11009 = vst [vmem:[#allocation32_spill] sm:$0xff] %v9543_v57  ;;  %v3962_v60 = vand.u32 4294901760, %v3961_v63  ;;  %v3968_v24 = vsub.f32 %v9534_v3, %v9543_v57  ;;  %v9653_v63 = vsub.f32 %v3772_v30, %v9641_v39 }
 0x3bb   :  { %7337 = vmatmul.mubr.f32.gmra.mxu0 %v9319_v25  ;;  %v3781_v25 = vld [vmem:[#allocation2 + $0x1e0] sm:$0xff]  ;;  %v3955_v8 = vand.u32 4294901760, %v3954_v41  ;;  %v3771_v41 = vld [vmem:[#allocation2 + $0x190] sm:$0xff] }
 0x3bc   :  { %v9536_v33 = vand.u32 4294901760, %v3781_v25  ;;  %v3969_v21 = vand.u32 4294901760, %v3968_v24  ;;  %11032 = vst [vmem:[#allocation35_spill] sm:$0xff] %v9653_v63  ;;  %v9655_v49 = vand.u32 4294901760, %v3771_v41  ;;  %v3770_v24 = vld [vmem:[#allocation2 + $0x188] sm:$0xff] }
 0x3bd   :  { %7427 = vmatprep.subr.mxu1 %v3955_v8 }
 0x3be   :  { %v9546_v53 = vsub.f32 %v3781_v25, %v9536_v33  ;;  %7389 = vmatprep.subr.mxu0 %v9536_v33  ;;  %7428 = vmatpush3.msra.mxu1 %v3955_v8  ;;  %v4017_v25 = vsub.f32 %v9620_v61, %v9632_v7  ;;  %v9650_v8 = vand.u32 4294901760, %v9639_v62  ;;  %11033 = vst [vmem:[#allocation34_spill] sm:$0xff] %v9655_v49 }
 0x3bf   :  { %7390 = vmatpush3.msra.mxu0 %v9536_v33  ;;  %7429 = vmatprep.subr.mxu1 %v3962_v60  ;;  %v9665_v59 = vsub.f32 %v3771_v41, %v9655_v49 }
 0x3c0   :  { %v9555_v31 = vand.u32 4294901760, %v9546_v53  ;;  %7391 = vmatprep.subr.mxu0 %v9549_v56  ;;  %7430 = vmatpush3.msra.mxu1 %v3962_v60  ;;  %11031 = vst [vmem:[#allocation9_spill] sm:$0xff] %v9650_v8  ;;  %v4018_v60 = vand.u32 4294901760, %v4017_v25 }
 0x3c1   :  { %7392 = vmatpush3.msra.mxu0 %v9549_v56  ;;  %7431 = vmatprep.subr.mxu1 %v3969_v21  ;;  %11035 = vst [vmem:[#allocation16_spill] sm:$0xff] %v9665_v59 }
 0x3c2   :  { %11010 = vst [vmem:[#allocation36_spill] sm:$0xff] %v9555_v31  ;;  %v3975_v46 = vsub.f32 %v9546_v53, %v9555_v31  ;;  %7393 = vmatprep.subr.mxu0 %v9557_v9  ;;  %7432 = vmatpush3.msra.mxu1 %v3969_v21  ;;  %v4031_v21 = vsub.f32 %v9639_v62, %v9650_v8  ;;  %v11044_v31 = vld [vmem:[#allocation45_spill] sm:$0xff] }
 0x3c3   :  { %7394 = vmatpush3.msra.mxu0 %v9557_v9  ;;  %v2817_v57 = vrot.slane %v11044_v31, %v2816_v22 }
 0x3c4   :  { %v3976_v36 = vand.u32 4294901760, %v3975_v46  ;;  %7395 = vmatprep.subr.mxu0 %v9568_v4  ;;  %v9662_v46 = vand.u32 4294901760, %v9653_v63  ;;  %v4032_v32 = vand.u32 4294901760, %v4031_v21 }
 0x3c5   :  { %7396 = vmatpush3.msra.mxu0 %v9568_v4 }
 0x3c6   :  { %7433 = vmatprep.subr.mxu1 %v3976_v36  ;;  %7397 = vmatprep.subr.mxu0 %v9581_v23  ;;  %11034 = vst [vmem:[#allocation27_spill] sm:$0xff] %v9662_v46  ;;  %v4038_v26 = vsub.f32 %v9653_v63, %v9662_v46 }
 0x3c7   :  { %7434 = vmatpush3.msra.mxu1 %v3976_v36  ;;  %7398 = vmatpush3.msra.mxu0 %v9581_v23  ;;  %v9668_v36 = vand.u32 4294901760, %v3770_v24 }
 0x3c8   :  { %7435 = vmatprep.subr.mxu1 %v3983_v28  ;;  %7399 = vmatprep.subr.mxu0 %v9595_v12  ;;  %v4039_v27 = vand.u32 4294901760, %v4038_v26 }
 0x3c9   :  { %7436 = vmatpush3.msra.mxu1 %v3983_v28  ;;  %7400 = vmatpush3.msra.mxu0 %v9595_v12  ;;  %11036 = vst [vmem:[#allocation43_spill] sm:$0xff] %v9668_v36  ;;  %v9674_v28 = vand.u32 4294901760, %v9665_v59 }
 0x3ca   :  { %7437 = vmatprep.subr.mxu1 %v3990_v43  ;;  %7401 = vmatprep.subr.mxu0 %v9608_v29 }
 0x3cb   :  { %7438 = vmatpush3.msra.mxu1 %v3990_v43  ;;  %7402 = vmatpush3.msra.mxu0 %v9608_v29  ;;  %11037 = vst [vmem:[#allocation19_spill] sm:$0xff] %v9674_v28  ;;  %v9680_v43 = vsub.f32 %v3770_v24, %v9668_v36  ;;  %v4045_v19 = vsub.f32 %v9665_v59, %v9674_v28 }
 0x3cc   :  { %7439 = vmatprep.subr.mxu1 %v3997_v51  ;;  %7403 = vmatprep.subr.mxu0 %v9616_v10 }
 0x3cd   :  { %7440 = vmatpush3.msra.mxu1 %v3997_v51  ;;  %7404 = vmatpush3.msra.mxu0 %v9616_v10  ;;  %11039 = vst [vmem:[#allocation25_spill] sm:$0xff] %v9680_v43  ;;  %v9686_v51 = vsub.f32 %v3769_v37, %v9676_v35  ;;  %v9690_v6 = vand.u32 4294901760, %v9680_v43  ;;  %v4046_v45 = vand.u32 4294901760, %v4045_v19 }
 0x3ce   :  { %7441 = vmatprep.subr.mxu1 %v4004_v0  ;;  %7405 = vmatprep.subr.mxu0 %v9628_v11 }
 0x3cf   :  { %7442 = vmatpush3.msra.mxu1 %v4004_v0  ;;  %7406 = vmatpush3.msra.mxu0 %v9628_v11  ;;  %11040 = vst [vmem:[#allocation13_spill] sm:$0xff] %v9686_v51  ;;  %11041 = vst [vmem:[#allocation38_spill] sm:$0xff] %v9690_v6  ;;  %v9694_v0 = vand.u32 4294901760, %v9686_v51  ;;  %v4052_v18 = vsub.f32 %v9680_v43, %v9690_v6 }
 0x3d0   :  { %7443 = vmatprep.subr.mxu1 %v4011_v50  ;;  %7407 = vmatprep.subr.mxu0 %v9641_v39 }
 0x3d1   :  { %7444 = vmatpush3.msra.mxu1 %v4011_v50  ;;  %7408 = vmatpush3.msra.mxu0 %v9641_v39  ;;  %11042 = vst [vmem:[#allocation44_spill] sm:$0xff] %v9694_v0  ;;  %v4059_v30 = vsub.f32 %v9686_v51, %v9694_v0  ;;  %v4053_v50 = vand.u32 4294901760, %v4052_v18 }
 0x3d2   :  { %7445 = vmatprep.subr.mxu1 %v4018_v60  ;;  %7409 = vmatprep.subr.mxu0 %v9655_v49 }
 0x3d3   :  { %7446 = vmatpush3.msra.mxu1 %v4018_v60  ;;  %7410 = vmatpush3.msra.mxu0 %v9655_v49  ;;  %v4060_v25 = vand.u32 4294901760, %v4059_v30 }
 0x3d4   :  { %7447 = vmatprep.subr.mxu1 %v4025_v16  ;;  %7411 = vmatprep.subr.mxu0 %v9668_v36 }
 0x3d5   :  { %7448 = vmatpush3.msra.mxu1 %v4025_v16  ;;  %7412 = vmatpush3.msra.mxu0 %v9668_v36 }
 0x3d6   :  { %7449 = vmatprep.subr.mxu1 %v4032_v32  ;;  %7413 = vmatprep.subr.mxu0 %v9676_v35 }
 0x3d7   :  { %7450 = vmatpush3.msra.mxu1 %v4032_v32  ;;  %7414 = vmatpush3.msra.mxu0 %v9676_v35 }
 0x3d8   :  { %7451 = vmatprep.subr.mxu1 %v4039_v27  ;;  %7471 = vmatprep.subr.mxu0 %v9512_v42 }
 0x3d9   :  { %7452 = vmatpush3.msra.mxu1 %v4039_v27 }
 0x3da   :  { %7453 = vmatprep.subr.mxu1 %v4046_v45 }
 0x3db   :  { %7454 = vmatpush3.msra.mxu1 %v4046_v45 }
 0x3dc   :  { %7455 = vmatprep.subr.mxu1 %v4053_v50 }
 0x3dd   :  { %7456 = vmatpush3.msra.mxu1 %v4053_v50 }
 0x3de   :  { %7457 = vmatprep.subr.mxu1 %v4060_v25 }
 0x3df   :  { %7458 = vmatpush3.msra.mxu1 %v4060_v25 }
 0x3e0   :  { %7515 = vmatprep.subr.mxu1 %v9509_v58 }
 0x419   :  { %v7197_v41 = vpop.f32.mrf.mxu1 }
 0x41b   :  { %v3126_v2 = vpop.f32.mrf.mxu1 }
 0x41d   :  { %v7200_v24 = vpop.f32.mrf.mxu1 }
 0x41f   :  { %v3138_v21 = vpop.f32.mrf.mxu1 }
 0x422   :  { %v7153_v60 = vpop.f32.mrf.mxu0 }
 0x423   :  { %v7203_v32 = vpop.f32.mrf.mxu1  ;;  %v2916_v51 = vadd.f32 %v7153_v60, %v2817_v57 }
 0x424   :  { %v2905_v16 = vpop.f32.mrf.mxu0 }
 0x425   :  { %v3150_v27 = vpop.f32.mrf.mxu1  ;;  %v2906_v59 = vadd.f32 %v2905_v16, %v2817_v57  ;;  %v3133_v62 = vadd.f32 %v7197_v41, %v2916_v51 }
 0x427   :  { %v3127_v39 = vadd.f32 %v3126_v2, %v2906_v59 }
 0x428   :  { %v7156_v37 = vpop.f32.mrf.mxu0 }
 0x429   :  { %v7206_v18 = vpop.f32.mrf.mxu1  ;;  %v2936_v35 = vadd.f32 %v7156_v37, %v2817_v57 }
 0x42a   :  { %v2925_v26 = vpop.f32.mrf.mxu0 }
 0x42b   :  { %v3162_v30 = vpop.f32.mrf.mxu1  ;;  %v2926_v49 = vadd.f32 %v2925_v26, %v2817_v57  ;;  %v3145_v11 = vadd.f32 %v7200_v24, %v2936_v35 }
 0x42d   :  { %v3139_v34 = vadd.f32 %v3138_v21, %v2926_v49 }
 0x42e   :  { %v7159_v19 = vpop.f32.mrf.mxu0 }
 0x42f   :  { %v2956_v10 = vadd.f32 %v7159_v19, %v2817_v57 }
 0x430   :  { %v2945_v45 = vpop.f32.mrf.mxu0 }
 0x431   :  { %v2946_v29 = vadd.f32 %v2945_v45, %v2817_v57  ;;  %v3157_v26 = vadd.f32 %v7203_v32, %v2956_v10 }
 0x433   :  { %v7162_v50 = vpop.f32.mrf.mxu0  ;;  %v3151_v35 = vadd.f32 %v3150_v27, %v2946_v29 }
 0x434   :  { %v2976_v16 = vadd.f32 %v7162_v50, %v2817_v57 }
 0x435   :  { %v2965_v25 = vpop.f32.mrf.mxu0 }
 0x436   :  { %v2966_v40 = vadd.f32 %v2965_v25, %v2817_v57  ;;  %v3169_v2 = vadd.f32 %v7206_v18, %v2976_v16 }
 0x440   :  { %v7285_v0 = vpop.f32.mrf.mxu1 }
 0x442   :  { %v3410_v6 = vpop.f32.mrf.mxu1 }
 0x445   :  { %v7288_v46 = vpop.f32.mrf.mxu1 }
 0x447   :  { %v3426_v14 = vpop.f32.mrf.mxu1 }
 0x449   :  { %v7241_v28 = vpop.f32.mrf.mxu0 }
 0x44a   :  { %v7291_v48 = vpop.f32.mrf.mxu1  ;;  %v3280_v61 = vadd.f32 %v7241_v28, %v3133_v62 }
 0x44b   :  { %v3272_v8 = vpop.f32.mrf.mxu0 }
 0x44c   :  { %v9704_v47 = vpop.f32.mrf.mxu1  ;;  %v3273_v17 = vadd.f32 %v3272_v8, %v3127_v39  ;;  %v3419_v60 = vadd.f32 %v7285_v0, %v3280_v61 }
 0x44e   :  { %v3411_v41 = vadd.f32 %v3410_v6, %v3273_v17 }
 0x44f   :  { %v7244_v7 = vpop.f32.mrf.mxu0 }
 0x450   :  { %v7294_v13 = vpop.f32.mrf.mxu1  ;;  %v3294_v22 = vadd.f32 %v7244_v7, %v3145_v11 }
 0x451   :  { %v3286_v20 = vpop.f32.mrf.mxu0 }
 0x452   :  { %v9707_v63 = vpop.f32.mrf.mxu1  ;;  %v3287_v37 = vadd.f32 %v3286_v20, %v3139_v34  ;;  %v3435_v39 = vadd.f32 %v7288_v46, %v3294_v22  ;;  %v3163_v20 = vadd.f32 %v3162_v30, %v2966_v40 }
 0x454   :  { %v3427_v0 = vadd.f32 %v3426_v14, %v3287_v37 }
 0x455   :  { %v7247_v52 = vpop.f32.mrf.mxu0 }
 0x456   :  { %v3308_v8 = vadd.f32 %v7247_v52, %v3157_v26 }
 0x457   :  { %v3300_v43 = vpop.f32.mrf.mxu0 }
 0x458   :  { %v3301_v21 = vadd.f32 %v3300_v43, %v3151_v35  ;;  %v3451_v52 = vadd.f32 %v7291_v48, %v3308_v8 }
 0x45a   :  { %v7250_v38 = vpop.f32.mrf.mxu0  ;;  %v3443_v40 = vadd.f32 %v9704_v47, %v3301_v21 }
 0x45b   :  { %v3322_v19 = vadd.f32 %v7250_v38, %v3169_v2 }
 0x45c   :  { %v3314_v31 = vpop.f32.mrf.mxu0 }
 0x45d   :  { %v3467_v27 = vadd.f32 %v7294_v13, %v3322_v19 }
 0x468   :  { %v7373_v36 = vpop.f32.mrf.mxu1 }
 0x46a   :  { %v3714_v44 = vpop.f32.mrf.mxu1 }
 0x46c   :  { %v7376_v15 = vpop.f32.mrf.mxu1 }
 0x46e   :  { %v3726_v54 = vpop.f32.mrf.mxu1 }
 0x46f   :  { %v7329_v12 = vpop.f32.mrf.mxu0 }
 0x470   :  { %v3592_v51 = vadd.f32 %v7329_v12, %v3419_v60  ;;  %v7379_v24 = vpop.f32.mrf.mxu1 }
 0x471   :  { %v3585_v62 = vpop.f32.mrf.mxu0 }
 0x472   :  { %v3721_v59 = vadd.f32 %v7373_v36, %v3592_v51  ;;  %v3586_v28 = vadd.f32 %v3585_v62, %v3411_v41  ;;  %v3315_v36 = vadd.f32 %v3314_v31, %v3163_v20  ;;  %v3738_v46 = vpop.f32.mrf.mxu1 }
 0x473   :  { %v7332_v11 = vpop.f32.mrf.mxu0 }
 0x474   :  { %v3761_v7 = vmax.f32 %v3721_v59, 0.0  ;;  %v3715_v61 = vadd.f32 %v3714_v44, %v3586_v28  ;;  %v3604_v49 = vadd.f32 %v7332_v11, %v3435_v39  ;;  %v7382_v30 = vpop.f32.mrf.mxu1  ;;  %v3459_v22 = vadd.f32 %v9707_v63, %v3315_v36 }
 0x475   :  { %v3597_v34 = vpop.f32.mrf.mxu0 }
 0x476   :  { %v9709_v12 = vand.u32 4294901760, %v3761_v7  ;;  %v3760_v57 = vmax.f32 %v3715_v61, 0.0  ;;  %v3733_v17 = vadd.f32 %v7376_v15, %v3604_v49  ;;  %v3598_v10 = vadd.f32 %v3597_v34, %v3427_v0  ;;  %v3750_v63 = vpop.f32.mrf.mxu1 }
 0x477   :  { %v7335_v29 = vpop.f32.mrf.mxu0 }
 0x478   :  { %v9712_v6 = vsub.f32 %v3761_v7, %v9709_v12  ;;  %v9714_v32 = vand.u32 4294901760, %v3760_v57  ;;  %v3763_v44 = vmax.f32 %v3733_v17, 0.0  ;;  %v3727_v14 = vadd.f32 %v3726_v54, %v3598_v10 }
 0x479   :  { %v3616_v43 = vadd.f32 %v7335_v29, %v3451_v52  ;;  %v3609_v38 = vpop.f32.mrf.mxu0 }
 0x47a   :  { %v3882_v18 = vand.u32 4294901760, %v9712_v6  ;;  %v9719_v15 = vsub.f32 %v3760_v57, %v9714_v32  ;;  %v9721_v45 = vand.u32 4294901760, %v3763_v44  ;;  %v3762_v48 = vmax.f32 %v3727_v14, 0.0  ;;  %7459 = vmatprep.mubr.f32.mxu1 %v9714_v32 }
 0x47b   :  { %v3745_v50 = vadd.f32 %v7379_v24, %v3616_v43  ;;  %v3610_v25 = vadd.f32 %v3609_v38, %v3443_v40  ;;  %v7338_v31 = vpop.f32.mrf.mxu0  ;;  %7460 = vmatmul.mubr.f32.vlgmr.msra.gmra.mxu1 %v9709_v12 }
 0x47c   :  { %v9726_v54 = vsub.f32 %v3763_v44, %v9721_v45  ;;  %v9728_v13 = vand.u32 4294901760, %v3762_v48  ;;  %v3628_v47 = vadd.f32 %v7338_v31, %v3467_v27  ;;  %7516 = vmatpush3.msra.mxu1 %v9509_v58  ;;  %v3883_v60 = vsub.f32 %v9712_v6, %v3882_v18 }
 0x47d   :  { %v3765_v16 = vmax.f32 %v3745_v50, 0.0  ;;  %v3739_v37 = vadd.f32 %v3738_v46, %v3610_v25  ;;  %7517 = vmatprep.subr.mxu1 %v9514_v55  ;;  %v3621_v51 = vpop.f32.mrf.mxu0  ;;  %v3872_v41 = vand.u32 4294901760, %v9719_v15  ;;  %v11047_v25 = vld [vmem:[#allocation41_spill] sm:$0xff] }
 0x47e   :  { %v9738_v26 = vsub.f32 %v3762_v48, %v9728_v13  ;;  %v3757_v62 = vadd.f32 %v7382_v30, %v3628_v47  ;;  %v3622_v59 = vadd.f32 %v3621_v51, %v3459_v22  ;;  %7518 = vmatpush3.msra.mxu1 %v9514_v55  ;;  %7462 = vmatprep.mubr.f32.mxu1 %v9728_v13  ;;  %v3902_v11 = vand.u32 4294901760, %v9726_v54  ;;  %v11046_v30 = vld [vmem:[#allocation21_spill] sm:$0xff]  ;;  %v11049_v47 = vld [vmem:[#allocation11_spill] sm:$0xff]  ;;  %v11054_v51 = vld [vmem:[#allocation20_spill] sm:$0xff] }
 0x47f   :  { %v9742_v28 = vand.u32 4294901760, %v3765_v16  ;;  %v3764_v39 = vmax.f32 %v3739_v37, 0.0  ;;  %7519 = vmatprep.subr.mxu1 %v9524_v5  ;;  %7463 = vmatmul.mubr.f32.gmra.mxu1 %v9721_v45  ;;  %v3873_v8 = vsub.f32 %v9719_v15, %v3872_v41  ;;  %v3884_v49 = vand.u32 4294901760, %v3883_v60  ;;  %v11050_v22 = vld [vmem:[#allocation29_spill] sm:$0xff]  ;;  %v11051_v60 = vld [vmem:[#allocation24_spill] sm:$0xff] }
 0x480   :  { %v3767_v35 = vmax.f32 %v3757_v62, 0.0  ;;  %v3751_v2 = vadd.f32 %v3750_v63, %v3622_v59  ;;  %7520 = vmatpush3.msra.mxu1 %v9524_v5  ;;  %v3892_v24 = vand.u32 4294901760, %v9738_v26  ;;  %v3903_v10 = vsub.f32 %v9726_v54, %v3902_v11  ;;  %v11053_v37 = vld [vmem:[#allocation8_spill] sm:$0xff]  ;;  %v11056_v62 = vld [vmem:[#allocation34_spill] sm:$0xff]  ;;  %v11058_v59 = vld [vmem:[#allocation43_spill] sm:$0xff] }
 0x481   :  { %v9750_v7 = vand.u32 4294901760, %v3764_v39  ;;  %7521 = vmatprep.subr.mxu1 %v9536_v33  ;;  %v3874_v61 = vand.u32 4294901760, %v3873_v8  ;;  %v9754_v0 = vsub.f32 %v3765_v16, %v9742_v28  ;;  %v11052_v16 = vld [vmem:[#allocation30_spill] sm:$0xff]  ;;  %v11059_v63 = vld [vmem:[#allocation28_spill] sm:$0xff]  ;;  %v11061_v8 = vld [vmem:[#allocation35_spill] sm:$0xff] }
 0x482   :  { %v3766_v21 = vmax.f32 %v3751_v2, 0.0  ;;  %7522 = vmatpush3.msra.mxu1 %v9536_v33  ;;  %v3893_v19 = vsub.f32 %v9738_v26, %v3892_v24  ;;  %v9763_v34 = vand.u32 4294901760, %v3767_v35  ;;  %v3904_v44 = vand.u32 4294901760, %v3903_v10  ;;  %v11063_v2 = vld [vmem:[#allocation25_spill] sm:$0xff] }
 0x483   :  { %v9761_v20 = vsub.f32 %v3764_v39, %v9750_v7  ;;  %7415 = vmatprep.mubr.f32.mxu0 %v3874_v61  ;;  %7465 = vmatprep.mubr.f32.mxu1 %v9750_v7  ;;  %v3922_v52 = vand.u32 4294901760, %v9754_v0  ;;  %v11060_v39 = vld [vmem:[#allocation17_spill] sm:$0xff]  ;;  %v11079_v61 = vld [vmem:[#allocation38_spill] sm:$0xff] }
 0x484   :  { %v9766_v57 = vand.u32 4294901760, %v3766_v21  ;;  %7523 = vmatprep.subr.mxu1 %v9549_v56  ;;  %7416 = vmatmul.mubr.f32.vlgmr.msra.gmra.mxu0 %v3884_v49  ;;  %v3894_v17 = vand.u32 4294901760, %v3893_v19  ;;  %v9782_v29 = vsub.f32 %v3767_v35, %v9763_v34  ;;  %v11062_v35 = vld [vmem:[#allocation16_spill] sm:$0xff] }
 0x485   :  { %7466 = vmatmul.mubr.f32.gmra.mxu1 %v9742_v28  ;;  %7472 = vmatpush3.msra.mxu0 %v9512_v42  ;;  %v3912_v36 = vand.u32 4294901760, %v9761_v20  ;;  %v11080_v49 = vld [vmem:[#allocation44_spill] sm:$0xff] }
 0x486   :  { %v9776_v46 = vsub.f32 %v3766_v21, %v9766_v57  ;;  %7524 = vmatpush3.msra.mxu1 %v9549_v56  ;;  %7473 = vmatprep.subr.mxu0 %v9522_v1  ;;  %v3942_v40 = vand.u32 4294901760, %v9782_v29  ;;  %v4753_v21 = vld [vmem:[#allocation4 + $0x70] sm:$0xff] }
 0x487   :  { %7525 = vmatprep.subr.mxu1 %v9557_v9  ;;  %7474 = vmatpush3.msra.mxu0 %v9522_v1  ;;  %v3913_v42 = vsub.f32 %v9761_v20, %v3912_v36  ;;  %v3923_v1 = vsub.f32 %v9754_v0, %v3922_v52  ;;  %v9958_v19 = vand.u32 4294901760, %v4753_v21 }
 0x488   :  { %7526 = vmatpush3.msra.mxu1 %v9557_v9  ;;  %7418 = vmatprep.mubr.f32.mxu0 %v3894_v17  ;;  %v3932_v14 = vand.u32 4294901760, %v9776_v46  ;;  %v3943_v48 = vsub.f32 %v9782_v29, %v3942_v40 }
 0x489   :  { %7468 = vmatprep.mubr.f32.mxu1 %v9766_v57  ;;  %7475 = vmatprep.subr.mxu0 %v9534_v3  ;;  %v3914_v43 = vand.u32 4294901760, %v3913_v42  ;;  %v3924_v27 = vand.u32 4294901760, %v3923_v1  ;;  %v4749_v1 = vld [vmem:[#allocation4 + $0x50] sm:$0xff] }
 0x48a   :  { %7527 = vmatprep.subr.mxu1 %v9568_v4  ;;  %7419 = vmatmul.mubr.f32.gmra.mxu0 %v3904_v44  ;;  %v3933_v38 = vsub.f32 %v9776_v46, %v3932_v14  ;;  %v3944_v31 = vand.u32 4294901760, %v3943_v48  ;;  %v4748_v48 = vld [vmem:[#allocation4 + $0x48] sm:$0xff] }
 0x48b   :  { %7469 = vmatmul.mubr.f32.gmra.mxu1 %v9763_v34  ;;  %7476 = vmatpush3.msra.mxu0 %v9534_v3  ;;  %v11045_v3 = vld [vmem:[#allocation12_spill] sm:$0xff] }
 0x48c   :  { %7528 = vmatpush3.msra.mxu1 %v9568_v4  ;;  %7477 = vmatprep.subr.mxu0 %v9546_v53  ;;  %v3934_v50 = vand.u32 4294901760, %v3933_v38 }
 0x48d   :  { %7529 = vmatprep.subr.mxu1 %v9581_v23  ;;  %7547 = vmatprep.mubr.f32.mxu1 %v3872_v41  ;;  %v11055_v41 = vld [vmem:[#allocation31_spill] sm:$0xff] }
 0x48e   :  { %7478 = vmatpush3.msra.mxu0 %v9546_v53  ;;  %7530 = vmatpush3.msra.mxu1 %v9581_v23  ;;  %v11048_v53 = vld [vmem:[#allocation15_spill] sm:$0xff] }
 0x48f   :  { %7421 = vmatprep.mubr.f32.mxu0 %v3914_v43  ;;  %7479 = vmatprep.subr.mxu0 %v11045_v3 }
 0x490   :  { %7531 = vmatprep.subr.mxu1 %v11046_v30  ;;  %7422 = vmatmul.mubr.f32.gmra.mxu0 %v3924_v27  ;;  %v10001_v27 = vand.u32 4294901760, %v4749_v1 }
 0x491   :  { %7480 = vmatpush3.msra.mxu0 %v11045_v3  ;;  %7532 = vmatpush3.msra.mxu1 %v11046_v30 }
 0x492   :  { %7481 = vmatprep.subr.mxu0 %v11047_v25  ;;  %7533 = vmatprep.subr.mxu1 %v11048_v53 }
 0x493   :  { %7482 = vmatpush3.msra.mxu0 %v11047_v25  ;;  %7534 = vmatpush3.msra.mxu1 %v11048_v53  ;;  %v10010_v25 = vsub.f32 %v4749_v1, %v10001_v27 }
 0x494   :  { %7424 = vmatprep.mubr.f32.mxu0 %v3934_v50  ;;  %7483 = vmatprep.subr.mxu0 %v11049_v47 }
 0x495   :  { %7535 = vmatprep.subr.mxu1 %v11050_v22  ;;  %7425 = vmatmul.mubr.f32.gmra.mxu0 %v3944_v31  ;;  %11086 = vst [vmem:[#allocation11_spill] sm:$0xff] %v10010_v25 }
 0x496   :  { %7484 = vmatpush3.msra.mxu0 %v11049_v47  ;;  %7536 = vmatpush3.msra.mxu1 %v11050_v22  ;;  %v4747_v47 = vld [vmem:[#allocation4 + $0x40] sm:$0xff] }
 0x497   :  { %7485 = vmatprep.subr.mxu0 %v11051_v60  ;;  %7503 = vmatprep.mubr.f32.mxu0 %v9719_v15  ;;  %v11057_v15 = vld [vmem:[#allocation23_spill] sm:$0xff] }
 0x498   :  { %7537 = vmatprep.subr.mxu1 %v11052_v16  ;;  %7486 = vmatpush3.msra.mxu0 %v11051_v60  ;;  %v10020_v60 = vand.u32 4294901760, %v10010_v25 }
 0x499   :  { %7538 = vmatpush3.msra.mxu1 %v11052_v16  ;;  %7487 = vmatprep.subr.mxu0 %v11053_v37 }
 0x49a   :  { %7539 = vmatprep.subr.mxu1 %v11054_v51  ;;  %7488 = vmatpush3.msra.mxu0 %v11053_v37  ;;  %11088 = vst [vmem:[#allocation24_spill] sm:$0xff] %v10020_v60  ;;  %v10025_v37 = vand.u32 4294901760, %v4747_v47 }
 0x49b   :  { %7540 = vmatpush3.msra.mxu1 %v11054_v51  ;;  %7489 = vmatprep.subr.mxu0 %v11055_v41 }
 0x49c   :  { %7541 = vmatprep.subr.mxu1 %v11056_v62  ;;  %7490 = vmatpush3.msra.mxu0 %v11055_v41  ;;  %v4746_v41 = vld [vmem:[#allocation4 + $0x38] sm:$0xff] }
 0x49d   :  { %7542 = vmatpush3.msra.mxu1 %v11056_v62  ;;  %7491 = vmatprep.subr.mxu0 %v11057_v15 }
 0x49e   :  { %7543 = vmatprep.subr.mxu1 %v11058_v59  ;;  %7492 = vmatpush3.msra.mxu0 %v11057_v15 }
 0x49f   :  { %7544 = vmatpush3.msra.mxu1 %v11058_v59  ;;  %7493 = vmatprep.subr.mxu0 %v11059_v63 }
 0x4a0   :  { %7545 = vmatprep.subr.mxu1 %v11060_v39  ;;  %7494 = vmatpush3.msra.mxu0 %v11059_v63  ;;  %v10039_v63 = vand.u32 4294901760, %v4746_v41 }
 0x4a1   :  { %7546 = vmatpush3.msra.mxu1 %v11060_v39  ;;  %7495 = vmatprep.subr.mxu0 %v11061_v8 }
 0x4a2   :  { %7548 = vmatmul.mubr.f32.vlgmr.msra.gmra.mxu1 %v3882_v18  ;;  %7603 = vmatprep.subr.mxu1 %v9509_v58  ;;  %v11073_v18 = vld [vmem:[#allocation14_spill] sm:$0xff]  ;;  %11092 = vst [vmem:[#allocation31_spill] sm:$0xff] %v10039_v63 }
 0x4a3   :  { %7496 = vmatpush3.msra.mxu0 %v11061_v8  ;;  %7550 = vmatprep.mubr.f32.mxu1 %v3892_v24  ;;  %v11077_v24 = vld [vmem:[#allocation27_spill] sm:$0xff]  ;;  %v4745_v8 = vld [vmem:[#allocation4 + $0x30] sm:$0xff] }
 0x4a4   :  { %7604 = vmatpush3.msra.mxu1 %v9509_v58  ;;  %7497 = vmatprep.subr.mxu0 %v11062_v35  ;;  %v11064_v58 = vld [vmem:[#allocation13_spill] sm:$0xff] }
 0x4a5   :  { %7605 = vmatprep.subr.mxu1 %v9514_v55  ;;  %7498 = vmatpush3.msra.mxu0 %v11062_v35 }
 0x4a6   :  { %7606 = vmatpush3.msra.mxu1 %v9514_v55  ;;  %7499 = vmatprep.subr.mxu0 %v11063_v2  ;;  %v11065_v55 = vld [vmem:[#allocation37_spill] sm:$0xff] }
 0x4a7   :  { %7551 = vmatmul.mubr.f32.gmra.mxu1 %v3902_v11  ;;  %7607 = vmatprep.subr.mxu1 %v9524_v5  ;;  %v11078_v11 = vld [vmem:[#allocation19_spill] sm:$0xff] }
 0x4a8   :  { %7500 = vmatpush3.msra.mxu0 %v11063_v2  ;;  %7553 = vmatprep.mubr.f32.mxu1 %v3912_v36 }
 0x4a9   :  { %7608 = vmatpush3.msra.mxu1 %v9524_v5  ;;  %7501 = vmatprep.subr.mxu0 %v11064_v58  ;;  %v11066_v5 = vld [vmem:[#allocation10_spill] sm:$0xff] }
 0x4aa   :  { %7609 = vmatprep.subr.mxu1 %v9536_v33  ;;  %7502 = vmatpush3.msra.mxu0 %v11064_v58 }
 0x4ab   :  { %7610 = vmatpush3.msra.mxu1 %v9536_v33  ;;  %7504 = vmatmul.mubr.f32.vlgmr.msra.gmra.mxu0 %v9712_v6  ;;  %v11067_v33 = vld [vmem:[#allocation32_spill] sm:$0xff]  ;;  %v11072_v6 = vld [vmem:[#allocation33_spill] sm:$0xff] }
 0x4ac   :  { %7554 = vmatmul.mubr.f32.gmra.mxu1 %v3922_v52  ;;  %7559 = vmatprep.subr.mxu0 %v11065_v55 }
 0x4ad   :  { %7611 = vmatprep.subr.mxu1 %v9549_v56  ;;  %7506 = vmatprep.mubr.f32.mxu0 %v9738_v26  ;;  %v11076_v26 = vld [vmem:[#allocation9_spill] sm:$0xff] }
 0x4ae   :  { %7556 = vmatprep.mubr.f32.mxu1 %v3932_v14  ;;  %7560 = vmatpush3.msra.mxu0 %v11065_v55  ;;  %v10049_v55 = vsub.f32 %v4746_v41, %v10039_v63 }
 0x4af   :  { %7612 = vmatpush3.msra.mxu1 %v9549_v56  ;;  %7561 = vmatprep.subr.mxu0 %v11066_v5  ;;  %v11068_v56 = vld [vmem:[#allocation36_spill] sm:$0xff] }
 0x4b0   :  { %7613 = vmatprep.subr.mxu1 %v9557_v9  ;;  %7562 = vmatpush3.msra.mxu0 %v11066_v5  ;;  %11094 = vst [vmem:[#allocation23_spill] sm:$0xff] %v10049_v55  ;;  %v10052_v5 = vand.u32 4294901760, %v4745_v8 }
 0x4b1   :  { %7614 = vmatpush3.msra.mxu1 %v9557_v9  ;;  %7507 = vmatmul.mubr.f32.gmra.mxu0 %v9726_v54  ;;  %v11069_v9 = vld [vmem:[#allocation18_spill] sm:$0xff]  ;;  %v11074_v54 = vld [vmem:[#allocation40_spill] sm:$0xff] }
 0x4b2   :  { %7557 = vmatmul.mubr.f32.gmra.mxu1 %v3942_v40  ;;  %7563 = vmatprep.subr.mxu0 %v11067_v33  ;;  %11095 = vst [vmem:[#allocation43_spill] sm:$0xff] %v10052_v5 }
 0x4b3   :  { %7615 = vmatprep.subr.mxu1 %v9568_v4  ;;  %7509 = vmatprep.mubr.f32.mxu0 %v9761_v20 }
 0x4b4   :  { %7564 = vmatpush3.msra.mxu0 %v11067_v33  ;;  %7616 = vmatpush3.msra.mxu1 %v9568_v4  ;;  %v11070_v4 = vld [vmem:[#allocation42_spill] sm:$0xff]  ;;  %v4744_v33 = vld [vmem:[#allocation4 + $0x28] sm:$0xff] }
 0x4b5   :  { %7635 = vmatprep.mubr.f32.mxu1 %v9714_v32  ;;  %7565 = vmatprep.subr.mxu0 %v11068_v56 }
 0x4b6   :  { %7617 = vmatprep.subr.mxu1 %v9581_v23  ;;  %7566 = vmatpush3.msra.mxu0 %v11068_v56 }
 0x4b7   :  { %7618 = vmatpush3.msra.mxu1 %v9581_v23  ;;  %7510 = vmatmul.mubr.f32.gmra.mxu0 %v9754_v0  ;;  %v11071_v23 = vld [vmem:[#allocation22_spill] sm:$0xff]  ;;  %v4754_v0 = vld [vmem:[#allocation4 + $0x78] sm:$0xff] }
 0x4b8   :  { %7567 = vmatprep.subr.mxu0 %v11069_v9  ;;  %7619 = vmatprep.subr.mxu1 %v11046_v30 }
 0x4b9   :  { %7512 = vmatprep.mubr.f32.mxu0 %v9776_v46  ;;  %7568 = vmatpush3.msra.mxu0 %v11069_v9  ;;  %v4750_v46 = vld [vmem:[#allocation4 + $0x58] sm:$0xff] }
 0x4ba   :  { %7620 = vmatpush3.msra.mxu1 %v11046_v30  ;;  %7569 = vmatprep.subr.mxu0 %v11070_v4  ;;  %v9993_v14 = vand.u32 4294901760, %v4750_v46 }
 0x4bb   :  { %7621 = vmatprep.subr.mxu1 %v11048_v53  ;;  %7570 = vmatpush3.msra.mxu0 %v11070_v4  ;;  %v10058_v4 = vand.u32 4294901760, %v10049_v55 }
 0x4bc   :  { %7622 = vmatpush3.msra.mxu1 %v11048_v53  ;;  %7513 = vmatmul.mubr.f32.gmra.mxu0 %v9782_v29  ;;  %v10004_v3 = vsub.f32 %v4750_v46, %v9993_v14  ;;  %v10012_v53 = vand.u32 4294901760, %v4748_v48 }
 0x4bd   :  { %7571 = vmatprep.subr.mxu0 %v11071_v23  ;;  %7623 = vmatprep.subr.mxu1 %v11050_v22  ;;  %11096 = vst [vmem:[#allocation28_spill] sm:$0xff] %v10058_v4 }
 0x4be   :  { %7572 = vmatpush3.msra.mxu0 %v11071_v23  ;;  %7591 = vmatprep.mubr.f32.mxu0 %v9714_v32  ;;  %v11075_v32 = vld [vmem:[#allocation26_spill] sm:$0xff]  ;;  %11085 = vst [vmem:[#allocation15_spill] sm:$0xff] %v10004_v3  ;;  %v10016_v31 = vand.u32 4294901760, %v10004_v3  ;;  %v10060_v23 = vand.u32 4294901760, %v4744_v33 }
 0x4bf   :  { %7624 = vmatpush3.msra.mxu1 %v11050_v22  ;;  %7573 = vmatprep.subr.mxu0 %v11072_v6 }
 0x4c0   :  { %7625 = vmatprep.subr.mxu1 %v11052_v16  ;;  %7574 = vmatpush3.msra.mxu0 %v11072_v6  ;;  %11087 = vst [vmem:[#allocation29_spill] sm:$0xff] %v10016_v31  ;;  %11097 = vst [vmem:[#allocation17_spill] sm:$0xff] %v10060_v23  ;;  %v10064_v6 = vsub.f32 %v4745_v8, %v10052_v5 }
 0x4c1   :  { %7626 = vmatpush3.msra.mxu1 %v11052_v16  ;;  %7575 = vmatprep.subr.mxu0 %v11073_v18  ;;  %v10023_v16 = vsub.f32 %v4748_v48, %v10012_v53 }
 0x4c2   :  { %7627 = vmatprep.subr.mxu1 %v11054_v51  ;;  %7576 = vmatpush3.msra.mxu0 %v11073_v18  ;;  %11098 = vst [vmem:[#allocation35_spill] sm:$0xff] %v10064_v6  ;;  %v4743_v18 = vld [vmem:[#allocation4 + $0x20] sm:$0xff] }
 0x4c3   :  { %7628 = vmatpush3.msra.mxu1 %v11054_v51  ;;  %7577 = vmatprep.subr.mxu0 %v11074_v54  ;;  %11089 = vst [vmem:[#allocation30_spill] sm:$0xff] %v10023_v16  ;;  %v4952_v51 = vsub.f32 %v10004_v3, %v10016_v31  ;;  %v10034_v15 = vand.u32 4294901760, %v10023_v16 }
 0x4c4   :  { %7629 = vmatprep.subr.mxu1 %v11056_v62  ;;  %7578 = vmatpush3.msra.mxu0 %v11074_v54 }
 0x4c5   :  { %7630 = vmatpush3.msra.mxu1 %v11056_v62  ;;  %7579 = vmatprep.subr.mxu0 %v11075_v32  ;;  %v4959_v62 = vsub.f32 %v10010_v25, %v10020_v60  ;;  %11090 = vst [vmem:[#allocation8_spill] sm:$0xff] %v10034_v15  ;;  %v4966_v2 = vsub.f32 %v10023_v16, %v10034_v15 }
 0x4c6   :  { %7631 = vmatprep.subr.mxu1 %v11058_v59  ;;  %7580 = vmatpush3.msra.mxu0 %v11075_v32  ;;  %v4980_v32 = vsub.f32 %v10049_v55, %v10058_v4 }
 0x4c7   :  { %7632 = vmatpush3.msra.mxu1 %v11058_v59  ;;  %7581 = vmatprep.subr.mxu0 %v11076_v26  ;;  %v10037_v59 = vsub.f32 %v4747_v47, %v10025_v37  ;;  %v4960_v35 = vand.u32 4294901760, %v4959_v62  ;;  %v4967_v56 = vand.u32 4294901760, %v4966_v2 }
 0x4c8   :  { %7633 = vmatprep.subr.mxu1 %v11060_v39  ;;  %7582 = vmatpush3.msra.mxu0 %v11076_v26  ;;  %v10070_v26 = vsub.f32 %v4744_v33, %v10060_v23 }
 0x4c9   :  { %7634 = vmatpush3.msra.mxu1 %v11060_v39  ;;  %7583 = vmatprep.subr.mxu0 %v11077_v24  ;;  %11091 = vst [vmem:[#allocation20_spill] sm:$0xff] %v10037_v59  ;;  %v4953_v39 = vand.u32 4294901760, %v4952_v51  ;;  %v10046_v58 = vand.u32 4294901760, %v10037_v59  ;;  %v4739_v51 = vld [vmem:[#allocation4] sm:$0xff] }
 0x4ca   :  { %7636 = vmatmul.mubr.f32.vlgmr.msra.gmra.mxu1 %v9709_v12  ;;  %7584 = vmatpush3.msra.mxu0 %v11077_v24  ;;  %11099 = vst [vmem:[#allocation16_spill] sm:$0xff] %v10070_v26  ;;  %v10072_v24 = vand.u32 4294901760, %v4743_v18  ;;  %v10120_v8 = vand.u32 4294901760, %v4739_v51 }
 0x4cb   :  { %7638 = vmatprep.mubr.f32.mxu1 %v9728_v13  ;;  %7585 = vmatprep.subr.mxu0 %v11078_v11  ;;  %11093 = vst [vmem:[#allocation34_spill] sm:$0xff] %v10046_v58  ;;  %v4973_v9 = vsub.f32 %v10037_v59, %v10046_v58  ;;  %v11117_v58 = vld [vmem:[#allocation39_spill] sm:$0xff] }
 0x4cc   :  { %7586 = vmatpush3.msra.mxu0 %v11078_v11  ;;  %11100 = vst [vmem:[#allocation25_spill] sm:$0xff] %v10072_v24  ;;  %v10076_v11 = vand.u32 4294901760, %v10064_v6  ;;  %11112 = vst [vmem:[#allocation26_spill] sm:$0xff] %v10120_v8  ;;  %v3787_v15 = vsub.s32 4, %v11117_v58 }
 0x4cd   :  { %7587 = vmatprep.subr.mxu0 %v11079_v61  ;;  %v4974_v54 = vand.u32 4294901760, %v4973_v9 }
 0x4ce   :  { %7639 = vmatmul.mubr.f32.gmra.mxu1 %v9721_v45  ;;  %7588 = vmatpush3.msra.mxu0 %v11079_v61  ;;  %11101 = vst [vmem:[#allocation13_spill] sm:$0xff] %v10076_v11  ;;  %v4742_v61 = vld [vmem:[#allocation4 + $0x18] sm:$0xff] }
 0x4cf   :  { %7641 = vmatprep.mubr.f32.mxu1 %v9750_v7  ;;  %7589 = vmatprep.subr.mxu0 %v11080_v49 }
 0x4d0   :  { %7590 = vmatpush3.msra.mxu0 %v11080_v49  ;;  %v4981_v49 = vand.u32 4294901760, %v4980_v32 }
 0x4d1   :  { %7592 = vmatmul.mubr.f32.vlgmr.msra.gmra.mxu0 %v9709_v12  ;;  %v9953_v12 = vand.u32 4294901760, %v4754_v0 }
 0x4d2   :  { %7642 = vmatmul.mubr.f32.gmra.mxu1 %v9742_v28  ;;  %7594 = vmatprep.mubr.f32.mxu0 %v9728_v13 }
 0x4d3   :  { %7644 = vmatprep.mubr.f32.mxu1 %v9766_v57  ;;  %v9956_v13 = vsub.f32 %v4754_v0, %v9953_v12  ;;  %7647 = vmatprep.subr.mxu0 %v9953_v12  ;;  %v10080_v0 = vand.u32 4294901760, %v10070_v26 }
 0x4d4   :  { %7648 = vmatpush3.msra.mxu0 %v9953_v12 }
 0x4d5   :  { %7595 = vmatmul.mubr.f32.gmra.mxu0 %v9721_v45  ;;  %v4752_v45 = vld [vmem:[#allocation4 + $0x68] sm:$0xff]  ;;  %7649 = vmatprep.subr.mxu0 %v9958_v19  ;;  %11102 = vst [vmem:[#allocation37_spill] sm:$0xff] %v10080_v0  ;;  %v4994_v46 = vsub.f32 %v10070_v26, %v10080_v0 }
 0x4d6   :  { %7645 = vmatmul.mubr.f32.gmra.mxu1 %v9763_v34  ;;  %7597 = vmatprep.mubr.f32.mxu0 %v9750_v7  ;;  %v9966_v7 = vsub.f32 %v4753_v21, %v9958_v19  ;;  %v9968_v20 = vand.u32 4294901760, %v4752_v45  ;;  %v10083_v21 = vsub.f32 %v4743_v18, %v10072_v24 }
 0x4d7   :  { %7650 = vmatpush3.msra.mxu0 %v9958_v19  ;;  %v4995_v48 = vand.u32 4294901760, %v4994_v46 }
 0x4d8   :  { %v9975_v17 = vand.u32 4294901760, %v9966_v7  ;;  %v9978_v10 = vsub.f32 %v4752_v45, %v9968_v20  ;;  %7651 = vmatprep.subr.mxu0 %v9968_v20  ;;  %11103 = vst [vmem:[#allocation10_spill] sm:$0xff] %v10083_v21  ;;  %v10085_v45 = vand.u32 4294901760, %v4742_v61 }
 0x4d9   :  { %7598 = vmatmul.mubr.f32.gmra.mxu0 %v9742_v28  ;;  %v9963_v28 = vand.u32 4294901760, %v9956_v13 }
 0x4da   :  { %7600 = vmatprep.mubr.f32.mxu0 %v9766_v57  ;;  %11082 = vst [vmem:[#allocation12_spill] sm:$0xff] %v9975_v17  ;;  %7652 = vmatpush3.msra.mxu0 %v9968_v20  ;;  %v4931_v29 = vsub.f32 %v9966_v7, %v9975_v17  ;;  %v9987_v42 = vand.u32 4294901760, %v9978_v10  ;;  %11104 = vst [vmem:[#allocation32_spill] sm:$0xff] %v10085_v45 }
 0x4db   :  { %11081 = vst [vmem:[#allocation45_spill] sm:$0xff] %v9963_v28  ;;  %v4924_v57 = vsub.f32 %v9956_v13, %v9963_v28 }
 0x4dc   :  { %11083 = vst [vmem:[#allocation21_spill] sm:$0xff] %v9987_v42  ;;  %v4932_v43 = vand.u32 4294901760, %v4931_v29  ;;  %v4938_v40 = vsub.f32 %v9978_v10, %v9987_v42  ;;  %v10097_v29 = vsub.f32 %v4742_v61, %v10085_v45 }
 0x4dd   :  { %7601 = vmatmul.mubr.f32.gmra.mxu0 %v9763_v34  ;;  %v4751_v34 = vld [vmem:[#allocation4 + $0x60] sm:$0xff]  ;;  %v4925_v52 = vand.u32 4294901760, %v4924_v57  ;;  %v4741_v57 = vld [vmem:[#allocation4 + $0x10] sm:$0xff] }
 0x4de   :  { %v9980_v36 = vand.u32 4294901760, %v4751_v34  ;;  %v4939_v30 = vand.u32 4294901760, %v4938_v40  ;;  %11106 = vst [vmem:[#allocation18_spill] sm:$0xff] %v10097_v29  ;;  %v10099_v1 = vand.u32 4294901760, %v4741_v57  ;;  %v4740_v40 = vld [vmem:[#allocation4 + $0x8] sm:$0xff] }
 0x4df   :  { %7691 = vmatprep.subr.mxu1 %v4925_v52 }
 0x4e0   :  { %v9990_v44 = vsub.f32 %v4751_v34, %v9980_v36  ;;  %7653 = vmatprep.subr.mxu0 %v9980_v36  ;;  %7692 = vmatpush3.msra.mxu1 %v4925_v52  ;;  %v4987_v34 = vsub.f32 %v10064_v6, %v10076_v11  ;;  %v10094_v52 = vand.u32 4294901760, %v10083_v21  ;;  %11107 = vst [vmem:[#allocation42_spill] sm:$0xff] %v10099_v1 }
 0x4e1   :  { %7654 = vmatpush3.msra.mxu0 %v9980_v36  ;;  %7693 = vmatprep.subr.mxu1 %v4932_v43  ;;  %v10109_v47 = vsub.f32 %v4741_v57, %v10099_v1 }
 0x4e2   :  { %v9999_v38 = vand.u32 4294901760, %v9990_v44  ;;  %7655 = vmatprep.subr.mxu0 %v9993_v14  ;;  %7694 = vmatpush3.msra.mxu1 %v4932_v43  ;;  %11105 = vst [vmem:[#allocation36_spill] sm:$0xff] %v10094_v52  ;;  %v4988_v43 = vand.u32 4294901760, %v4987_v34 }
 0x4e3   :  { %7656 = vmatpush3.msra.mxu0 %v9993_v14  ;;  %7695 = vmatprep.subr.mxu1 %v4939_v30  ;;  %11109 = vst [vmem:[#allocation33_spill] sm:$0xff] %v10109_v47 }
 0x4e4   :  { %11084 = vst [vmem:[#allocation41_spill] sm:$0xff] %v9999_v38  ;;  %v4945_v50 = vsub.f32 %v9990_v44, %v9999_v38  ;;  %7657 = vmatprep.subr.mxu0 %v10001_v27  ;;  %7696 = vmatpush3.msra.mxu1 %v4939_v30  ;;  %v5001_v30 = vsub.f32 %v10083_v21, %v10094_v52  ;;  %v10155_v38 = vld [vmem:[%s10438_s4] sm:$0x3f] }
 0x4e5   :  { %7658 = vmatpush3.msra.mxu0 %v10001_v27  ;;  %11118 = vst [vmem:[#allocation44_spill] sm:$0xff] %v10155_v38  ;;  %v3788_v42 = vrot.slane %v10155_v38, %v3787_v15 }
 0x4e6   :  { %v4946_v22 = vand.u32 4294901760, %v4945_v50  ;;  %7659 = vmatprep.subr.mxu0 %v10012_v53  ;;  %v10106_v50 = vand.u32 4294901760, %v10097_v29  ;;  %v5002_v41 = vand.u32 4294901760, %v5001_v30 }
 0x4e7   :  { %7660 = vmatpush3.msra.mxu0 %v10012_v53 }
 0x4e8   :  { %7697 = vmatprep.subr.mxu1 %v4946_v22  ;;  %7661 = vmatprep.subr.mxu0 %v10025_v37  ;;  %11108 = vst [vmem:[#allocation22_spill] sm:$0xff] %v10106_v50  ;;  %v5008_v62 = vsub.f32 %v10097_v29, %v10106_v50 }
 0x4e9   :  { %7698 = vmatpush3.msra.mxu1 %v4946_v22  ;;  %7662 = vmatpush3.msra.mxu0 %v10025_v37  ;;  %v10112_v22 = vand.u32 4294901760, %v4740_v40 }
 0x4ea   :  { %7699 = vmatprep.subr.mxu1 %v4953_v39  ;;  %7663 = vmatprep.subr.mxu0 %v10039_v63  ;;  %v5009_v2 = vand.u32 4294901760, %v5008_v62 }
 0x4eb   :  { %7700 = vmatpush3.msra.mxu1 %v4953_v39  ;;  %7664 = vmatpush3.msra.mxu0 %v10039_v63  ;;  %11110 = vst [vmem:[#allocation14_spill] sm:$0xff] %v10112_v22  ;;  %v10118_v39 = vand.u32 4294901760, %v10109_v47 }
 0x4ec   :  { %7701 = vmatprep.subr.mxu1 %v4960_v35  ;;  %7665 = vmatprep.subr.mxu0 %v10052_v5 }
 0x4ed   :  { %7702 = vmatpush3.msra.mxu1 %v4960_v35  ;;  %7666 = vmatpush3.msra.mxu0 %v10052_v5  ;;  %11111 = vst [vmem:[#allocation40_spill] sm:$0xff] %v10118_v39  ;;  %v10124_v35 = vsub.f32 %v4740_v40, %v10112_v22  ;;  %v5015_v33 = vsub.f32 %v10109_v47, %v10118_v39 }
 0x4ee   :  { %7703 = vmatprep.subr.mxu1 %v4967_v56  ;;  %7667 = vmatprep.subr.mxu0 %v10060_v23 }
 0x4ef   :  { %7704 = vmatpush3.msra.mxu1 %v4967_v56  ;;  %7668 = vmatpush3.msra.mxu0 %v10060_v23  ;;  %11113 = vst [vmem:[#allocation9_spill] sm:$0xff] %v10124_v35  ;;  %v10130_v56 = vsub.f32 %v4739_v51, %v10120_v8  ;;  %v10134_v9 = vand.u32 4294901760, %v10124_v35  ;;  %v5016_v18 = vand.u32 4294901760, %v5015_v33 }
 0x4f0   :  { %7705 = vmatprep.subr.mxu1 %v4974_v54  ;;  %7669 = vmatprep.subr.mxu0 %v10072_v24 }
 0x4f1   :  { %7706 = vmatpush3.msra.mxu1 %v4974_v54  ;;  %7670 = vmatpush3.msra.mxu0 %v10072_v24  ;;  %11114 = vst [vmem:[#allocation27_spill] sm:$0xff] %v10130_v56  ;;  %11115 = vst [vmem:[#allocation19_spill] sm:$0xff] %v10134_v9  ;;  %v10138_v54 = vand.u32 4294901760, %v10130_v56  ;;  %v5022_v32 = vsub.f32 %v10124_v35, %v10134_v9 }
 0x4f2   :  { %7707 = vmatprep.subr.mxu1 %v4981_v49  ;;  %7671 = vmatprep.subr.mxu0 %v10085_v45 }
 0x4f3   :  { %7708 = vmatpush3.msra.mxu1 %v4981_v49  ;;  %7672 = vmatpush3.msra.mxu0 %v10085_v45  ;;  %11116 = vst [vmem:[#allocation38_spill] sm:$0xff] %v10138_v54  ;;  %v5029_v61 = vsub.f32 %v10130_v56, %v10138_v54  ;;  %v5023_v49 = vand.u32 4294901760, %v5022_v32 }
 0x4f4   :  { %7709 = vmatprep.subr.mxu1 %v4988_v43  ;;  %7673 = vmatprep.subr.mxu0 %v10099_v1 }
 0x4f5   :  { %7710 = vmatpush3.msra.mxu1 %v4988_v43  ;;  %7674 = vmatpush3.msra.mxu0 %v10099_v1  ;;  %v5030_v34 = vand.u32 4294901760, %v5029_v61 }
 0x4f6   :  { %7711 = vmatprep.subr.mxu1 %v4995_v48  ;;  %7675 = vmatprep.subr.mxu0 %v10112_v22 }
 0x4f7   :  { %7712 = vmatpush3.msra.mxu1 %v4995_v48  ;;  %7676 = vmatpush3.msra.mxu0 %v10112_v22 }
 0x4f8   :  { %7713 = vmatprep.subr.mxu1 %v5002_v41  ;;  %7677 = vmatprep.subr.mxu0 %v10120_v8 }
 0x4f9   :  { %7714 = vmatpush3.msra.mxu1 %v5002_v41  ;;  %7678 = vmatpush3.msra.mxu0 %v10120_v8 }
 0x4fa   :  { %7715 = vmatprep.subr.mxu1 %v5009_v2  ;;  %7735 = vmatprep.subr.mxu0 %v9956_v13 }
 0x4fb   :  { %7716 = vmatpush3.msra.mxu1 %v5009_v2 }
 0x4fc   :  { %7717 = vmatprep.subr.mxu1 %v5016_v18 }
 0x4fd   :  { %7718 = vmatpush3.msra.mxu1 %v5016_v18 }
 0x4fe   :  { %7719 = vmatprep.subr.mxu1 %v5023_v49 }
 0x4ff   :  { %7720 = vmatpush3.msra.mxu1 %v5023_v49 }
 0x500   :  { %7721 = vmatprep.subr.mxu1 %v5030_v34 }
 0x501   :  { %7722 = vmatpush3.msra.mxu1 %v5030_v34 }
 0x502   :  { %7779 = vmatprep.subr.mxu1 %v9953_v12 }
 0x53b   :  { %v7461_v57 = vpop.f32.mrf.mxu1 }
 0x53d   :  { %v4097_v46 = vpop.f32.mrf.mxu1 }
 0x53f   :  { %v7464_v40 = vpop.f32.mrf.mxu1 }
 0x541   :  { %v4109_v30 = vpop.f32.mrf.mxu1 }
 0x544   :  { %v7417_v43 = vpop.f32.mrf.mxu0 }
 0x545   :  { %v7467_v41 = vpop.f32.mrf.mxu1  ;;  %v3887_v56 = vadd.f32 %v7417_v43, %v3788_v42 }
 0x546   :  { %v3876_v48 = vpop.f32.mrf.mxu0 }
 0x547   :  { %v4121_v2 = vpop.f32.mrf.mxu1  ;;  %v3877_v47 = vadd.f32 %v3876_v48, %v3788_v42  ;;  %v4104_v21 = vadd.f32 %v7461_v57, %v3887_v56 }
 0x549   :  { %v4098_v6 = vadd.f32 %v4097_v46, %v3877_v47 }
 0x54a   :  { %v7420_v51 = vpop.f32.mrf.mxu0 }
 0x54b   :  { %v7470_v32 = vpop.f32.mrf.mxu1  ;;  %v3907_v8 = vadd.f32 %v7420_v51, %v3788_v42 }
 0x54c   :  { %v3896_v62 = vpop.f32.mrf.mxu0 }
 0x54d   :  { %v10147_v61 = vpop.f32.mrf.mxu1  ;;  %v3897_v26 = vadd.f32 %v3896_v62, %v3788_v42  ;;  %v4116_v24 = vadd.f32 %v7464_v40, %v3907_v8 }
 0x54f   :  { %v4110_v16 = vadd.f32 %v4109_v30, %v3897_v26 }
 0x550   :  { %v7423_v33 = vpop.f32.mrf.mxu0 }
 0x551   :  { %v3927_v23 = vadd.f32 %v7423_v33, %v3788_v42 }
 0x552   :  { %v3916_v18 = vpop.f32.mrf.mxu0 }
 0x553   :  { %v3917_v5 = vadd.f32 %v3916_v18, %v3788_v42  ;;  %v4128_v3 = vadd.f32 %v7467_v41, %v3927_v23 }
 0x555   :  { %v7426_v54 = vpop.f32.mrf.mxu0  ;;  %v4122_v8 = vadd.f32 %v4121_v2, %v3917_v5 }
 0x556   :  { %v3947_v48 = vadd.f32 %v7426_v54, %v3788_v42 }
 0x557   :  { %v3936_v9 = vpop.f32.mrf.mxu0 }
 0x558   :  { %v4140_v46 = vadd.f32 %v7470_v32, %v3947_v48 }
 0x562   :  { %v7549_v49 = vpop.f32.mrf.mxu1 }
 0x564   :  { %v4381_v34 = vpop.f32.mrf.mxu1 }
 0x567   :  { %v7552_v50 = vpop.f32.mrf.mxu1 }
 0x569   :  { %v4397_v0 = vpop.f32.mrf.mxu1 }
 0x56b   :  { %v7505_v39 = vpop.f32.mrf.mxu0 }
 0x56c   :  { %v7555_v4 = vpop.f32.mrf.mxu1  ;;  %v4251_v1 = vadd.f32 %v7505_v39, %v4104_v21 }
 0x56d   :  { %v4243_v52 = vpop.f32.mrf.mxu0 }
 0x56e   :  { %v10150_v31 = vpop.f32.mrf.mxu1  ;;  %v4244_v55 = vadd.f32 %v4243_v52, %v4098_v6  ;;  %v4390_v43 = vadd.f32 %v7549_v49, %v4251_v1  ;;  %v3937_v6 = vadd.f32 %v3936_v9, %v3788_v42 }
 0x570   :  { %v4382_v57 = vadd.f32 %v4381_v34, %v4244_v55 }
 0x571   :  { %v7508_v11 = vpop.f32.mrf.mxu0 }
 0x572   :  { %v7558_v28 = vpop.f32.mrf.mxu1  ;;  %v4265_v38 = vadd.f32 %v7508_v11, %v4116_v24 }
 0x573   :  { %v4257_v60 = vpop.f32.mrf.mxu0 }
 0x574   :  { %v10158_v29 = vpop.f32.mrf.mxu1  ;;  %v4258_v63 = vadd.f32 %v4257_v60, %v4110_v16  ;;  %v4406_v39 = vadd.f32 %v7552_v50, %v4265_v38  ;;  %v4134_v38 = vadd.f32 %v10147_v61, %v3937_v6 }
 0x576   :  { %v4398_v54 = vadd.f32 %v4397_v0, %v4258_v63 }
 0x577   :  { %v7511_v17 = vpop.f32.mrf.mxu0 }
 0x578   :  { %v4279_v52 = vadd.f32 %v7511_v17, %v4128_v3 }
 0x579   :  { %v4271_v35 = vpop.f32.mrf.mxu0 }
 0x57a   :  { %v4272_v30 = vadd.f32 %v4271_v35, %v4122_v8  ;;  %v4422_v42 = vadd.f32 %v7555_v4, %v4279_v52 }
 0x57c   :  { %v7514_v22 = vpop.f32.mrf.mxu0  ;;  %v4414_v35 = vadd.f32 %v10150_v31, %v4272_v30 }
 0x57d   :  { %v4293_v60 = vadd.f32 %v7514_v22, %v4140_v46 }
 0x57e   :  { %v4285_v15 = vpop.f32.mrf.mxu0 }
 0x57f   :  { %v4286_v0 = vadd.f32 %v4285_v15, %v4134_v38  ;;  %v4438_v41 = vadd.f32 %v7558_v28, %v4293_v60 }
 0x581   :  { %v4430_v48 = vadd.f32 %v10158_v29, %v4286_v0 }
 0x58a   :  { %v7637_v58 = vpop.f32.mrf.mxu1 }
 0x58c   :  { %v4685_v45 = vpop.f32.mrf.mxu1 }
 0x58e   :  { %v7640_v59 = vpop.f32.mrf.mxu1 }
 0x590   :  { %v4697_v51 = vpop.f32.mrf.mxu1 }
 0x591   :  { %v7593_v25 = vpop.f32.mrf.mxu0 }
 0x592   :  { %v4563_v56 = vadd.f32 %v7593_v25, %v4390_v43  ;;  %v7643_v26 = vpop.f32.mrf.mxu1 }
 0x593   :  { %v4556_v62 = vpop.f32.mrf.mxu0 }
 0x594   :  { %v4692_v21 = vadd.f32 %v7637_v58, %v4563_v56  ;;  %v4557_v47 = vadd.f32 %v4556_v62, %v4382_v57 }
 0x595   :  { %v7596_v40 = vpop.f32.mrf.mxu0 }
 0x596   :  { %v4732_v24 = vmax.f32 %v4692_v21, 0.0  ;;  %v4686_v11 = vadd.f32 %v4685_v45, %v4557_v47  ;;  %v4575_v1 = vadd.f32 %v7596_v40, %v4406_v39  ;;  %v4709_v45 = vpop.f32.mrf.mxu1 }
 0x597   :  { %v4568_v16 = vpop.f32.mrf.mxu0 }
 0x598   :  { %v10160_v25 = vand.u32 4294901760, %v4732_v24  ;;  %v4731_v55 = vmax.f32 %v4686_v11, 0.0  ;;  %v4704_v23 = vadd.f32 %v7640_v59, %v4575_v1  ;;  %v4569_v58 = vadd.f32 %v4568_v16, %v4398_v54  ;;  %v7646_v31 = vpop.f32.mrf.mxu1 }
 0x599   :  { %v7599_v17 = vpop.f32.mrf.mxu0 }
 0x59a   :  { %v10164_v3 = vsub.f32 %v4732_v24, %v10160_v25  ;;  %v10166_v5 = vand.u32 4294901760, %v4731_v55  ;;  %v4734_v50 = vmax.f32 %v4704_v23, 0.0  ;;  %v4698_v63 = vadd.f32 %v4697_v51, %v4569_v58  ;;  %v4721_v8 = vpop.f32.mrf.mxu1 }
 0x59b   :  { %v4587_v22 = vadd.f32 %v7599_v17, %v4422_v42  ;;  %v4580_v9 = vpop.f32.mrf.mxu0 }
 0x59c   :  { %v4852_v59 = vand.u32 4294901760, %v10164_v3  ;;  %v10171_v2 = vsub.f32 %v4731_v55, %v10166_v5  ;;  %v10173_v4 = vand.u32 4294901760, %v4734_v50  ;;  %v4733_v33 = vmax.f32 %v4698_v63, 0.0  ;;  %7723 = vmatprep.mubr.f32.mxu1 %v10166_v5 }
 0x59d   :  { %v4716_v32 = vadd.f32 %v7643_v26, %v4587_v22  ;;  %v4581_v18 = vadd.f32 %v4580_v9, %v4414_v35  ;;  %v7602_v61 = vpop.f32.mrf.mxu0  ;;  %7724 = vmatmul.mubr.f32.vlgmr.msra.gmra.mxu1 %v10160_v25 }
 0x59e   :  { %v10178_v49 = vsub.f32 %v4734_v50, %v10173_v4  ;;  %v10180_v28 = vand.u32 4294901760, %v4733_v33  ;;  %v4599_v34 = vadd.f32 %v7602_v61, %v4438_v41  ;;  %7780 = vmatpush3.msra.mxu1 %v9953_v12  ;;  %v4842_v56 = vand.u32 4294901760, %v10171_v2  ;;  %v11121_v61 = vld [vmem:[#allocation11_spill] sm:$0xff] }
 0x59f   :  { %v4736_v15 = vmax.f32 %v4716_v32, 0.0  ;;  %v4710_v43 = vadd.f32 %v4709_v45, %v4581_v18  ;;  %7781 = vmatprep.subr.mxu1 %v9958_v19  ;;  %v4592_v51 = vpop.f32.mrf.mxu0  ;;  %v4853_v57 = vsub.f32 %v10164_v3, %v4852_v59  ;;  %v11120_v32 = vld [vmem:[#allocation31_spill] sm:$0xff] }
 0x5a0   :  { %v10190_v62 = vsub.f32 %v4733_v33, %v10180_v28  ;;  %v4728_v21 = vadd.f32 %v7646_v31, %v4599_v34  ;;  %7782 = vmatpush3.msra.mxu1 %v9958_v19  ;;  %7726 = vmatprep.mubr.f32.mxu1 %v10180_v28  ;;  %v4593_v6 = vadd.f32 %v4592_v51, %v4430_v48  ;;  %v4872_v52 = vand.u32 4294901760, %v10178_v49  ;;  %v11119_v33 = vld [vmem:[#allocation15_spill] sm:$0xff]  ;;  %v11123_v34 = vld [vmem:[#allocation30_spill] sm:$0xff]  ;;  %v11126_v48 = vld [vmem:[#allocation25_spill] sm:$0xff] }
 0x5a1   :  { %v10194_v47 = vand.u32 4294901760, %v4736_v15  ;;  %v4735_v39 = vmax.f32 %v4710_v43, 0.0  ;;  %7783 = vmatprep.subr.mxu1 %v9968_v20  ;;  %7727 = vmatmul.mubr.f32.gmra.mxu1 %v10173_v4  ;;  %v4843_v29 = vsub.f32 %v10171_v2, %v4842_v56  ;;  %v4854_v1 = vand.u32 4294901760, %v4853_v57  ;;  %v11125_v43 = vld [vmem:[#allocation20_spill] sm:$0xff]  ;;  %v11127_v51 = vld [vmem:[#allocation23_spill] sm:$0xff] }
 0x5a2   :  { %v4738_v46 = vmax.f32 %v4728_v21, 0.0  ;;  %7784 = vmatpush3.msra.mxu1 %v9968_v20  ;;  %v4862_v40 = vand.u32 4294901760, %v10190_v62  ;;  %v4722_v26 = vadd.f32 %v4721_v8, %v4593_v6  ;;  %v4873_v58 = vsub.f32 %v10178_v49, %v4872_v52  ;;  %v11129_v57 = vld [vmem:[#allocation35_spill] sm:$0xff]  ;;  %v11130_v21 = vld [vmem:[#allocation42_spill] sm:$0xff] }
 0x5a3   :  { %v10202_v24 = vand.u32 4294901760, %v4735_v39  ;;  %7785 = vmatprep.subr.mxu1 %v9980_v36  ;;  %v4844_v11 = vand.u32 4294901760, %v4843_v29  ;;  %v10206_v54 = vsub.f32 %v4736_v15, %v10194_v47  ;;  %v11124_v15 = vld [vmem:[#allocation17_spill] sm:$0xff]  ;;  %v11133_v6 = vld [vmem:[#allocation10_spill] sm:$0xff] }
 0x5a4   :  { %7786 = vmatpush3.msra.mxu1 %v9980_v36  ;;  %v4863_v30 = vsub.f32 %v10190_v62, %v4862_v40  ;;  %v10215_v16 = vand.u32 4294901760, %v4738_v46  ;;  %v4737_v55 = vmax.f32 %v4722_v26, 0.0  ;;  %v4874_v63 = vand.u32 4294901760, %v4873_v58  ;;  %v11134_v29 = vld [vmem:[#allocation26_spill] sm:$0xff]  ;;  %v11137_v26 = vld [vmem:[#allocation9_spill] sm:$0xff] }
 0x5a5   :  { %v10213_v60 = vsub.f32 %v4735_v39, %v10202_v24  ;;  %7679 = vmatprep.mubr.f32.mxu0 %v4844_v11  ;;  %7729 = vmatprep.mubr.f32.mxu1 %v10202_v24  ;;  %v4892_v17 = vand.u32 4294901760, %v10206_v54  ;;  %v11132_v39 = vld [vmem:[#allocation14_spill] sm:$0xff]  ;;  %v11153_v11 = vld [vmem:[#allocation19_spill] sm:$0xff] }
 0x5a6   :  { %7787 = vmatprep.subr.mxu1 %v9993_v14  ;;  %7680 = vmatmul.mubr.f32.vlgmr.msra.gmra.mxu0 %v4854_v1  ;;  %v4864_v23 = vand.u32 4294901760, %v4863_v30  ;;  %v10222_v38 = vand.u32 4294901760, %v4737_v55  ;;  %v10231_v45 = vsub.f32 %v4738_v46, %v10215_v16  ;;  %v11135_v8 = vld [vmem:[#allocation18_spill] sm:$0xff]  ;;  %v11136_v46 = vld [vmem:[#allocation33_spill] sm:$0xff] }
 0x5a7   :  { %7730 = vmatmul.mubr.f32.gmra.mxu1 %v10194_v47  ;;  %7736 = vmatpush3.msra.mxu0 %v9956_v13  ;;  %v4882_v42 = vand.u32 4294901760, %v10213_v60  ;;  %v11154_v1 = vld [vmem:[#allocation38_spill] sm:$0xff] }
 0x5a8   :  { %7788 = vmatpush3.msra.mxu1 %v9993_v14  ;;  %7737 = vmatprep.subr.mxu0 %v9966_v7  ;;  %v10234_v50 = vsub.f32 %v4737_v55, %v10222_v38  ;;  %v4912_v22 = vand.u32 4294901760, %v10231_v45 }
 0x5a9   :  { %7789 = vmatprep.subr.mxu1 %v10001_v27  ;;  %7738 = vmatpush3.msra.mxu0 %v9966_v7  ;;  %v4883_v13 = vsub.f32 %v10213_v60, %v4882_v42  ;;  %v4893_v7 = vsub.f32 %v10206_v54, %v4892_v17 }
 0x5aa   :  { %7790 = vmatpush3.msra.mxu1 %v10001_v27  ;;  %7682 = vmatprep.mubr.f32.mxu0 %v4864_v23  ;;  %v4902_v0 = vand.u32 4294901760, %v10234_v50 }
 0x5ab   :  { %7732 = vmatprep.mubr.f32.mxu1 %v10222_v38  ;;  %7739 = vmatprep.subr.mxu0 %v9978_v10  ;;  %v4884_v35 = vand.u32 4294901760, %v4883_v13  ;;  %v4894_v41 = vand.u32 4294901760, %v4893_v7 }
 0x5ac   :  { %7791 = vmatprep.subr.mxu1 %v10012_v53  ;;  %7683 = vmatmul.mubr.f32.gmra.mxu0 %v4874_v63  ;;  %v4903_v9 = vsub.f32 %v10234_v50, %v4902_v0 }
 0x5ad   :  { %7733 = vmatmul.mubr.f32.gmra.mxu1 %v10215_v16  ;;  %7740 = vmatpush3.msra.mxu0 %v9978_v10  ;;  %v4913_v10 = vsub.f32 %v10231_v45, %v4912_v22 }
 0x5ae   :  { %7792 = vmatpush3.msra.mxu1 %v10012_v53  ;;  %7741 = vmatprep.subr.mxu0 %v9990_v44  ;;  %v4904_v18 = vand.u32 4294901760, %v4903_v9 }
 0x5af   :  { %7793 = vmatprep.subr.mxu1 %v10025_v37  ;;  %7811 = vmatprep.mubr.f32.mxu1 %v4842_v56  ;;  %v4914_v31 = vand.u32 4294901760, %v4913_v10  ;;  %v11128_v56 = vld [vmem:[#allocation32_spill] sm:$0xff] }
 0x5b0   :  { %7742 = vmatpush3.msra.mxu0 %v9990_v44  ;;  %7794 = vmatpush3.msra.mxu1 %v10025_v37  ;;  %v11122_v44 = vld [vmem:[#allocation43_spill] sm:$0xff] }
 0x5b1   :  { %7685 = vmatprep.mubr.f32.mxu0 %v4884_v35  ;;  %7743 = vmatprep.subr.mxu0 %v11119_v33 }
 0x5b2   :  { %7795 = vmatprep.subr.mxu1 %v11120_v32  ;;  %7686 = vmatmul.mubr.f32.gmra.mxu0 %v4894_v41  ;;  %v11155_v41 = vld [vmem:[#allocation39_spill] sm:$0xff] }
 0x5b3   :  { %7744 = vmatpush3.msra.mxu0 %v11119_v33  ;;  %7796 = vmatpush3.msra.mxu1 %v11120_v32  ;;  %v4757_v33 = vsub.s32 5, %v11155_v41 }
 0x5b4   :  { %7745 = vmatprep.subr.mxu0 %v11121_v61  ;;  %7797 = vmatprep.subr.mxu1 %v11122_v44 }
 0x5b5   :  { %7746 = vmatpush3.msra.mxu0 %v11121_v61  ;;  %7798 = vmatpush3.msra.mxu1 %v11122_v44 }
 0x5b6   :  { %7688 = vmatprep.mubr.f32.mxu0 %v4904_v18  ;;  %7747 = vmatprep.subr.mxu0 %v11123_v34  ;;  %v11156_v18 = vld [vmem:[#allocation44_spill] sm:$0xff] }
 0x5b7   :  { %7799 = vmatprep.subr.mxu1 %v11124_v15  ;;  %7689 = vmatmul.mubr.f32.gmra.mxu0 %v4914_v31  ;;  %v4758_v61 = vrot.slane %v11156_v18, %v4757_v33 }
 0x5b8   :  { %7748 = vmatpush3.msra.mxu0 %v11123_v34  ;;  %7800 = vmatpush3.msra.mxu1 %v11124_v15 }
 0x5b9   :  { %7749 = vmatprep.subr.mxu0 %v11125_v43  ;;  %7767 = vmatprep.mubr.f32.mxu0 %v10171_v2  ;;  %v11131_v2 = vld [vmem:[#allocation16_spill] sm:$0xff] }
 0x5ba   :  { %7801 = vmatprep.subr.mxu1 %v11126_v48  ;;  %7750 = vmatpush3.msra.mxu0 %v11125_v43 }
 0x5bb   :  { %7802 = vmatpush3.msra.mxu1 %v11126_v48  ;;  %7751 = vmatprep.subr.mxu0 %v11127_v51 }
 0x5bc   :  { %7803 = vmatprep.subr.mxu1 %v11128_v56  ;;  %7752 = vmatpush3.msra.mxu0 %v11127_v51 }
 0x5bd   :  { %7804 = vmatpush3.msra.mxu1 %v11128_v56  ;;  %7753 = vmatprep.subr.mxu0 %v11129_v57 }
 0x5be   :  { %7805 = vmatprep.subr.mxu1 %v11130_v21  ;;  %7754 = vmatpush3.msra.mxu0 %v11129_v57 }
 0x5bf   :  { %7806 = vmatpush3.msra.mxu1 %v11130_v21  ;;  %7755 = vmatprep.subr.mxu0 %v11131_v2 }
 0x5c0   :  { %7807 = vmatprep.subr.mxu1 %v11132_v39  ;;  %7756 = vmatpush3.msra.mxu0 %v11131_v2 }
 0x5c1   :  { %7808 = vmatpush3.msra.mxu1 %v11132_v39  ;;  %7757 = vmatprep.subr.mxu0 %v11133_v6 }
 0x5c2   :  { %7809 = vmatprep.subr.mxu1 %v11134_v29  ;;  %7758 = vmatpush3.msra.mxu0 %v11133_v6 }
 0x5c3   :  { %7810 = vmatpush3.msra.mxu1 %v11134_v29  ;;  %7759 = vmatprep.subr.mxu0 %v11135_v8 }
 0x5c4   :  { %7812 = vmatmul.mubr.f32.vlgmr.msra.gmra.mxu1 %v4852_v59  ;;  %7867 = vmatprep.subr.mxu1 %v9953_v12  ;;  %v11147_v59 = vld [vmem:[#allocation28_spill] sm:$0xff] }
 0x5c5   :  { %7760 = vmatpush3.msra.mxu0 %v11135_v8  ;;  %7814 = vmatprep.mubr.f32.mxu1 %v4862_v40  ;;  %v11152_v40 = vld [vmem:[#allocation40_spill] sm:$0xff] }
 0x5c6   :  { %7868 = vmatpush3.msra.mxu1 %v9953_v12  ;;  %7761 = vmatprep.subr.mxu0 %v11136_v46  ;;  %v11138_v12 = vld [vmem:[#allocation27_spill] sm:$0xff] }
 0x5c7   :  { %7869 = vmatprep.subr.mxu1 %v9958_v19  ;;  %7762 = vmatpush3.msra.mxu0 %v11136_v46 }
 0x5c8   :  { %7870 = vmatpush3.msra.mxu1 %v9958_v19  ;;  %7763 = vmatprep.subr.mxu0 %v11137_v26  ;;  %v11139_v19 = vld [vmem:[#allocation45_spill] sm:$0xff] }
 0x5c9   :  { %7815 = vmatmul.mubr.f32.gmra.mxu1 %v4872_v52  ;;  %7871 = vmatprep.subr.mxu1 %v9968_v20  ;;  %v11151_v52 = vld [vmem:[#allocation22_spill] sm:$0xff] }
 0x5ca   :  { %7764 = vmatpush3.msra.mxu0 %v11137_v26  ;;  %7817 = vmatprep.mubr.f32.mxu1 %v4882_v42 }
 0x5cb   :  { %7872 = vmatpush3.msra.mxu1 %v9968_v20  ;;  %7765 = vmatprep.subr.mxu0 %v11138_v12  ;;  %v11140_v20 = vld [vmem:[#allocation12_spill] sm:$0xff] }
 0x5cc   :  { %7873 = vmatprep.subr.mxu1 %v9980_v36  ;;  %7766 = vmatpush3.msra.mxu0 %v11138_v12 }
 0x5cd   :  { %7874 = vmatpush3.msra.mxu1 %v9980_v36  ;;  %7768 = vmatmul.mubr.f32.vlgmr.msra.gmra.mxu0 %v10164_v3  ;;  %v11141_v36 = vld [vmem:[#allocation21_spill] sm:$0xff]  ;;  %v11146_v3 = vld [vmem:[#allocation34_spill] sm:$0xff] }
 0x5ce   :  { %7818 = vmatmul.mubr.f32.gmra.mxu1 %v4892_v17  ;;  %7823 = vmatprep.subr.mxu0 %v11139_v19 }
 0x5cf   :  { %7875 = vmatprep.subr.mxu1 %v9993_v14  ;;  %7770 = vmatprep.mubr.f32.mxu0 %v10190_v62  ;;  %v11150_v62 = vld [vmem:[#allocation36_spill] sm:$0xff] }
 0x5d0   :  { %7820 = vmatprep.mubr.f32.mxu1 %v4902_v0  ;;  %7824 = vmatpush3.msra.mxu0 %v11139_v19 }
 0x5d1   :  { %7876 = vmatpush3.msra.mxu1 %v9993_v14  ;;  %7825 = vmatprep.subr.mxu0 %v11140_v20  ;;  %v11142_v14 = vld [vmem:[#allocation41_spill] sm:$0xff] }
 0x5d2   :  { %7877 = vmatprep.subr.mxu1 %v10001_v27  ;;  %7826 = vmatpush3.msra.mxu0 %v11140_v20 }
 0x5d3   :  { %7878 = vmatpush3.msra.mxu1 %v10001_v27  ;;  %7771 = vmatmul.mubr.f32.gmra.mxu0 %v10178_v49  ;;  %v11143_v27 = vld [vmem:[#allocation29_spill] sm:$0xff] }
 0x5d4   :  { %7821 = vmatmul.mubr.f32.gmra.mxu1 %v4912_v22  ;;  %7827 = vmatprep.subr.mxu0 %v11141_v36  ;;  %v11148_v49 = vld [vmem:[#allocation13_spill] sm:$0xff] }
 0x5d5   :  { %7879 = vmatprep.subr.mxu1 %v10012_v53  ;;  %7773 = vmatprep.mubr.f32.mxu0 %v10213_v60 }
 0x5d6   :  { %7828 = vmatpush3.msra.mxu0 %v11141_v36  ;;  %7880 = vmatpush3.msra.mxu1 %v10012_v53  ;;  %v11144_v53 = vld [vmem:[#allocation24_spill] sm:$0xff] }
 0x5d7   :  { %7899 = vmatprep.mubr.f32.mxu1 %v10166_v5  ;;  %7829 = vmatprep.subr.mxu0 %v11142_v14 }
 0x5d8   :  { %7881 = vmatprep.subr.mxu1 %v10025_v37  ;;  %7830 = vmatpush3.msra.mxu0 %v11142_v14 }
 0x5d9   :  { %7882 = vmatpush3.msra.mxu1 %v10025_v37  ;;  %7774 = vmatmul.mubr.f32.gmra.mxu0 %v10206_v54  ;;  %v11145_v37 = vld [vmem:[#allocation8_spill] sm:$0xff] }
 0x5da   :  { %7831 = vmatprep.subr.mxu0 %v11143_v27  ;;  %7883 = vmatprep.subr.mxu1 %v11120_v32 }
 0x5db   :  { %7776 = vmatprep.mubr.f32.mxu0 %v10234_v50  ;;  %7832 = vmatpush3.msra.mxu0 %v11143_v27 }
 0x5dc   :  { %7884 = vmatpush3.msra.mxu1 %v11120_v32  ;;  %7833 = vmatprep.subr.mxu0 %v11144_v53 }
 0x5dd   :  { %7885 = vmatprep.subr.mxu1 %v11122_v44  ;;  %7834 = vmatpush3.msra.mxu0 %v11144_v53 }
 0x5de   :  { %7886 = vmatpush3.msra.mxu1 %v11122_v44  ;;  %7777 = vmatmul.mubr.f32.gmra.mxu0 %v10231_v45 }
 0x5df   :  { %7835 = vmatprep.subr.mxu0 %v11145_v37  ;;  %7887 = vmatprep.subr.mxu1 %v11124_v15 }
 0x5e0   :  { %7836 = vmatpush3.msra.mxu0 %v11145_v37  ;;  %7855 = vmatprep.mubr.f32.mxu0 %v10166_v5  ;;  %v11149_v5 = vld [vmem:[#allocation37_spill] sm:$0xff] }
 0x5e1   :  { %7888 = vmatpush3.msra.mxu1 %v11124_v15  ;;  %7837 = vmatprep.subr.mxu0 %v11146_v3 }
 0x5e2   :  { %7889 = vmatprep.subr.mxu1 %v11126_v48  ;;  %7838 = vmatpush3.msra.mxu0 %v11146_v3 }
 0x5e3   :  { %7890 = vmatpush3.msra.mxu1 %v11126_v48  ;;  %7839 = vmatprep.subr.mxu0 %v11147_v59 }
 0x5e4   :  { %7891 = vmatprep.subr.mxu1 %v11128_v56  ;;  %7840 = vmatpush3.msra.mxu0 %v11147_v59 }
 0x5e5   :  { %7892 = vmatpush3.msra.mxu1 %v11128_v56  ;;  %7841 = vmatprep.subr.mxu0 %v11148_v49 }
 0x5e6   :  { %7893 = vmatprep.subr.mxu1 %v11130_v21  ;;  %7842 = vmatpush3.msra.mxu0 %v11148_v49 }
 0x5e7   :  { %7894 = vmatpush3.msra.mxu1 %v11130_v21  ;;  %7843 = vmatprep.subr.mxu0 %v11149_v5 }
 0x5e8   :  { %7895 = vmatprep.subr.mxu1 %v11132_v39  ;;  %7844 = vmatpush3.msra.mxu0 %v11149_v5 }
 0x5e9   :  { %7896 = vmatpush3.msra.mxu1 %v11132_v39  ;;  %7845 = vmatprep.subr.mxu0 %v11150_v62 }
 0x5ea   :  { %7897 = vmatprep.subr.mxu1 %v11134_v29  ;;  %7846 = vmatpush3.msra.mxu0 %v11150_v62 }
 0x5eb   :  { %7898 = vmatpush3.msra.mxu1 %v11134_v29  ;;  %7847 = vmatprep.subr.mxu0 %v11151_v52 }
 0x5ec   :  { %7900 = vmatmul.mubr.f32.vlgmr.msra.gmra.mxu1 %v10160_v25  ;;  %7848 = vmatpush3.msra.mxu0 %v11151_v52 }
 0x5ed   :  { %7902 = vmatprep.mubr.f32.mxu1 %v10180_v28  ;;  %7849 = vmatprep.subr.mxu0 %v11152_v40 }
 0x5ee   :  { %7850 = vmatpush3.msra.mxu0 %v11152_v40 }
 0x5ef   :  { %7851 = vmatprep.subr.mxu0 %v11153_v11 }
 0x5f0   :  { %7903 = vmatmul.mubr.f32.gmra.mxu1 %v10173_v4  ;;  %7852 = vmatpush3.msra.mxu0 %v11153_v11 }
 0x5f1   :  { %7905 = vmatprep.mubr.f32.mxu1 %v10202_v24  ;;  %7853 = vmatprep.subr.mxu0 %v11154_v1 }
 0x5f2   :  { %7854 = vmatpush3.msra.mxu0 %v11154_v1 }
 0x5f3   :  { %7856 = vmatmul.mubr.f32.vlgmr.msra.gmra.mxu0 %v10160_v25 }
 0x5f4   :  { %7906 = vmatmul.mubr.f32.gmra.mxu1 %v10194_v47  ;;  %7858 = vmatprep.mubr.f32.mxu0 %v10180_v28 }
 0x5f5   :  { %7908 = vmatprep.mubr.f32.mxu1 %v10222_v38 }
 0x5f7   :  { %7859 = vmatmul.mubr.f32.gmra.mxu0 %v10173_v4 }
 0x5f8   :  { %7909 = vmatmul.mubr.f32.gmra.mxu1 %v10215_v16  ;;  %7861 = vmatprep.mubr.f32.mxu0 %v10202_v24 }
 0x5fb   :  { %7862 = vmatmul.mubr.f32.gmra.mxu0 %v10194_v47 }
 0x5fc   :  { %7864 = vmatprep.mubr.f32.mxu0 %v10222_v38 }
 0x5ff   :  { %7865 = vmatmul.mubr.f32.gmra.mxu0 %v10215_v16 }
 0x65d   :  { %v7725_v54 = vpop.f32.mrf.mxu1 }
 0x65f   :  { %v5067_v25 = vpop.f32.mrf.mxu1 }
 0x661   :  { %v7728_v60 = vpop.f32.mrf.mxu1 }
 0x663   :  { %v5079_v28 = vpop.f32.mrf.mxu1 }
 0x666   :  { %v7681_v30 = vpop.f32.mrf.mxu0 }
 0x667   :  { %v7731_v58 = vpop.f32.mrf.mxu1  ;;  %v4857_v34 = vadd.f32 %v7681_v30, %v4758_v61 }
 0x668   :  { %v4846_v55 = vpop.f32.mrf.mxu0 }
 0x669   :  { %v5091_v4 = vpop.f32.mrf.mxu1  ;;  %v4847_v43 = vadd.f32 %v4846_v55, %v4758_v61  ;;  %v5074_v56 = vadd.f32 %v7725_v54, %v4857_v34 }
 0x66b   :  { %v5068_v6 = vadd.f32 %v5067_v25, %v4847_v43 }
 0x66c   :  { %v7684_v23 = vpop.f32.mrf.mxu0 }
 0x66d   :  { %v7734_v45 = vpop.f32.mrf.mxu1  ;;  %v4877_v51 = vadd.f32 %v7684_v23, %v4758_v61 }
 0x66e   :  { %v4866_v42 = vpop.f32.mrf.mxu0 }
 0x66f   :  { %v5103_v24 = vpop.f32.mrf.mxu1  ;;  %v4867_v2 = vadd.f32 %v4866_v42, %v4758_v61  ;;  %v5086_v26 = vadd.f32 %v7728_v60, %v4877_v51 }
 0x671   :  { %v5080_v14 = vadd.f32 %v5079_v28, %v4867_v2 }
 0x672   :  { %v7687_v17 = vpop.f32.mrf.mxu0 }
 0x673   :  { %v4897_v8 = vadd.f32 %v7687_v17, %v4758_v61 }
 0x674   :  { %v4886_v50 = vpop.f32.mrf.mxu0 }
 0x675   :  { %v4887_v19 = vadd.f32 %v4886_v50, %v4758_v61  ;;  %v5098_v49 = vadd.f32 %v7731_v58, %v4897_v8 }
 0x677   :  { %v7690_v47 = vpop.f32.mrf.mxu0  ;;  %v5092_v40 = vadd.f32 %v5091_v4, %v4887_v19 }
 0x678   :  { %v4917_v53 = vadd.f32 %v7690_v47, %v4758_v61 }
 0x679   :  { %v4906_v38 = vpop.f32.mrf.mxu0 }
 0x67a   :  { %v4907_v52 = vadd.f32 %v4906_v38, %v4758_v61  ;;  %v5110_v60 = vadd.f32 %v7734_v45, %v4917_v53 }
 0x67c   :  { %v5104_v50 = vadd.f32 %v5103_v24, %v4907_v52 }
 0x684   :  { %v7813_v13 = vpop.f32.mrf.mxu1 }
 0x686   :  { %v5351_v63 = vpop.f32.mrf.mxu1 }
 0x689   :  { %v7816_v16 = vpop.f32.mrf.mxu1 }
 0x68b   :  { %v5367_v22 = vpop.f32.mrf.mxu1 }
 0x68d   :  { %v7769_v0 = vpop.f32.mrf.mxu0 }
 0x68e   :  { %v7819_v9 = vpop.f32.mrf.mxu1  ;;  %v5221_v39 = vadd.f32 %v7769_v0, %v5074_v56 }
 0x68f   :  { %v5213_v7 = vpop.f32.mrf.mxu0 }
 0x690   :  { %v5383_v32 = vpop.f32.mrf.mxu1  ;;  %v5214_v46 = vadd.f32 %v5213_v7, %v5068_v6  ;;  %v5360_v27 = vadd.f32 %v7813_v13, %v5221_v39 }
 0x692   :  { %v5352_v62 = vadd.f32 %v5351_v63, %v5214_v46 }
 0x693   :  { %v7772_v35 = vpop.f32.mrf.mxu0 }
 0x694   :  { %v7822_v31 = vpop.f32.mrf.mxu1  ;;  %v5235_v36 = vadd.f32 %v7772_v35, %v5086_v26 }
 0x695   :  { %v5227_v10 = vpop.f32.mrf.mxu0 }
 0x696   :  { %v10407_v48 = vpop.f32.mrf.mxu1  ;;  %v5228_v59 = vadd.f32 %v5227_v10, %v5080_v14  ;;  %v5376_v30 = vadd.f32 %v7816_v16, %v5235_v36 }
 0x698   :  { %v5368_v58 = vadd.f32 %v5367_v22, %v5228_v59 }
 0x699   :  { %v7775_v44 = vpop.f32.mrf.mxu0 }
 0x69a   :  { %v5249_v1 = vadd.f32 %v7775_v44, %v5098_v49 }
 0x69b   :  { %v5241_v15 = vpop.f32.mrf.mxu0 }
 0x69c   :  { %v5242_v42 = vadd.f32 %v5241_v15, %v5092_v40  ;;  %v5392_v45 = vadd.f32 %v7819_v9, %v5249_v1 }
 0x69e   :  { %v7778_v21 = vpop.f32.mrf.mxu0  ;;  %v5384_v22 = vadd.f32 %v5383_v32, %v5242_v42 }
 0x69f   :  { %v5263_v47 = vadd.f32 %v7778_v21, %v5110_v60 }
 0x6a0   :  { %v5255_v20 = vpop.f32.mrf.mxu0 }
 0x6a1   :  { %v5256_v16 = vadd.f32 %v5255_v20, %v5104_v50  ;;  %v5408_v10 = vadd.f32 %v7822_v31, %v5263_v47 }
 0x6a3   :  { %v5400_v34 = vadd.f32 %v10407_v48, %v5256_v16 }
 0x6ac   :  { %v7901_v57 = vpop.f32.mrf.mxu1 }
 0x6ae   :  { %v5655_v29 = vpop.f32.mrf.mxu1 }
 0x6b0   :  { %v7904_v12 = vpop.f32.mrf.mxu1 }
 0x6b2   :  { %v5667_v37 = vpop.f32.mrf.mxu1 }
 0x6b3   :  { %v7857_v3 = vpop.f32.mrf.mxu0 }
 0x6b4   :  { %v5533_v5 = vadd.f32 %v7857_v3, %v5360_v27  ;;  %v7907_v55 = vpop.f32.mrf.mxu1 }
 0x6b5   :  { %v5526_v11 = vpop.f32.mrf.mxu0 }
 0x6b6   :  { %v5662_v54 = vadd.f32 %v7901_v57, %v5533_v5  ;;  %v5527_v25 = vadd.f32 %v5526_v11, %v5352_v62  ;;  %v5679_v38 = vpop.f32.mrf.mxu1 }
 0x6b7   :  { %v7860_v23 = vpop.f32.mrf.mxu0 }
 0x6b8   :  { %5702 = vst [vmem:[%s10439_s5 + $0x8] sm:$0xff] %v5662_v54  ;;  %v5656_v28 = vadd.f32 %v5655_v29, %v5527_v25  ;;  %v5545_v17 = vadd.f32 %v7860_v23, %v5376_v30  ;;  %v7910_v18 = vpop.f32.mrf.mxu1 }
 0x6b9   :  { %v5538_v13 = vpop.f32.mrf.mxu0 }
 0x6ba   :  { %5701 = vst [vmem:[%s10439_s5] sm:$0xff] %v5656_v28  ;;  %v5674_v4 = vadd.f32 %v7904_v12, %v5545_v17  ;;  %v5539_v63 = vadd.f32 %v5538_v13, %v5368_v58  ;;  %v5691_v51 = vpop.f32.mrf.mxu1 }
 0x6bb   :  { %v7863_v0 = vpop.f32.mrf.mxu0 }
 0x6bc   :  { %5704 = vst [vmem:[%s10439_s5 + $0x18] sm:$0xff] %v5674_v4  ;;  %v5668_v7 = vadd.f32 %v5667_v37, %v5539_v63  ;;  %v5557_v35 = vadd.f32 %v7863_v0, %v5392_v45 }
 0x6bd   :  { %v5550_v24 = vpop.f32.mrf.mxu0 }
 0x6be   :  { %5703 = vst [vmem:[%s10439_s5 + $0x10] sm:$0xff] %v5668_v7  ;;  %v5686_v41 = vadd.f32 %v7907_v55, %v5557_v35  ;;  %v5551_v33 = vadd.f32 %v5550_v24, %v5384_v22 }
 0x6bf   :  { %v7866_v9 = vpop.f32.mrf.mxu0 }
 0x6c0   :  { %5706 = vst [vmem:[%s10439_s5 + $0x28] sm:$0xff] %v5686_v41  ;;  %v5680_v61 = vadd.f32 %v5679_v38, %v5551_v33  ;;  %v5569_v44 = vadd.f32 %v7866_v9, %v5408_v10 }
 0x6c1   :  { %v5562_v15 = vpop.f32.mrf.mxu0 }
 0x6c2   :  { %5705 = vst [vmem:[%s10439_s5 + $0x20] sm:$0xff] %v5680_v61  ;;  %v5698_v32 = vadd.f32 %v7910_v18, %v5569_v44  ;;  %v5563_v43 = vadd.f32 %v5562_v15, %v5400_v34 }
 0x6c4   :  { %5708 = vst [vmem:[%s10439_s5 + $0x38] sm:$0xff] %v5698_v32  ;;  %v5692_v31 = vadd.f32 %v5691_v51, %v5563_v43 }
 0x6c6   :  { %5707 = vst [vmem:[%s10439_s5 + $0x30] sm:$0xff] %v5692_v31 }
 0x6c7   :  { %5713 = vsyncpa [#allocation3], 1 }
 0x6c8   :  { %5714 = vsyncpa [#allocation5], 1 }

</bundles_post_ra>
